<compile_context>
chip_gen: v7x
topology: tpu7x:2x2x1
jax: 0.10.0
libtpu: 0.0.40
codegen_flags: <defaults>
</compile_context>

<pallas_src>
import functools

import jax
import jax.numpy as jnp
from jax import lax
from jax.experimental import pallas as pl
from jax.experimental.pallas import tpu as pltpu

# ----- model hyper-parameters (small, consistent with the module) -----
EMBED_DIM = 32
NUM_HEADS = 4
FFN_HIDDEN = 64
NUM_LAYERS = 2
BATCH = 2
TGT_SEQ = 8
SRC_SEQ = 8
LN_EPS = 1e-5
NEG = -1e9


def decoder_stack_kernel(
    x_ref, enc_ref, self_mask_ref, cross_mask_ref,
    sa_win_ref, sa_bin_ref, sa_wo_ref, sa_bo_ref,
    ca_wq_ref, ca_bq_ref, ca_wkv_ref, ca_bkv_ref, ca_wo_ref, ca_bo_ref,
    n1g_ref, n1b_ref, n2g_ref, n2b_ref, n3g_ref, n3b_ref,
    w1_ref, b1_ref, w2_ref, b2_ref,
    out_ref,
    *, num_layers, num_heads):
    """Full decoder stack forward on a (B*S, E) slab, entirely in VMEM."""
    E = x_ref.shape[-1]
    H = num_heads
    d = E // H
    scale = 1.0 / float(d) ** 0.5

    self_mask = self_mask_ref[...]     # (B*S, B*S) additive (causal + block-diag)
    cross_mask = cross_mask_ref[...]   # (B*S, B*T) additive (padding + block-diag)

    def matmul(a, b):
        return jnp.dot(a, b, preferred_element_type=jnp.float32)

    def layer_norm(v, g, b):
        mu = jnp.mean(v, axis=-1, keepdims=True)
        var = jnp.mean((v - mu) ** 2, axis=-1, keepdims=True)
        return (v - mu) * lax.rsqrt(var + LN_EPS) * g + b

    def attention(q, k, v, add_mask, wo_t, bo):
        # q: (Nq, E), k/v: (Nk, E), add_mask: (Nq, Nk). Weights pre-transposed.
        out = None
        for h in range(H):
            sl = slice(h * d, (h + 1) * d)
            # q_h @ k_h^T without an explicit transpose (transposed-RHS contraction)
            s = lax.dot_general(q[:, sl], k[:, sl], (((1,), (1,)), ((), ())),
                                preferred_element_type=jnp.float32)
            s = s * scale + add_mask
            s = s - jnp.max(s, axis=-1, keepdims=True)
            p = jnp.exp(s)
            p = p * pl.reciprocal(jnp.sum(p, axis=-1, keepdims=True), approx=True)
            oh = matmul(p, v[:, sl])                 # (Nq, d)
            contrib = matmul(oh, wo_t[sl, :])        # fold output proj per head
            out = contrib if out is None else out + contrib
        return out + bo

    x = x_ref[...]      # (B*S, E)
    enc = enc_ref[...]  # (B*T, E)

    for layer in range(num_layers):
        # --- self-attention + residual + LayerNorm (dropout = identity) ---
        qkv = matmul(x, sa_win_ref[layer]) + sa_bin_ref[layer]      # (B*S, 3E)
        sa = attention(qkv[:, 0:E], qkv[:, E:2 * E], qkv[:, 2 * E:3 * E],
                       self_mask, sa_wo_ref[layer], sa_bo_ref[layer])
        x = layer_norm(x + sa, n1g_ref[layer], n1b_ref[layer])

        # --- cross-attention + residual + LayerNorm ---
        q = matmul(x, ca_wq_ref[layer]) + ca_bq_ref[layer]          # (B*S, E)
        kv = matmul(enc, ca_wkv_ref[layer]) + ca_bkv_ref[layer]     # (B*T, 2E)
        ca = attention(q, kv[:, 0:E], kv[:, E:2 * E],
                       cross_mask, ca_wo_ref[layer], ca_bo_ref[layer])
        x = layer_norm(x + ca, n2g_ref[layer], n2b_ref[layer])

        # --- FFN + residual + LayerNorm ---
        hdn = jnp.maximum(matmul(x, w1_ref[layer]) + b1_ref[layer], 0.0)
        ffn = matmul(hdn, w2_ref[layer]) + b2_ref[layer]
        x = layer_norm(x + ffn, n3g_ref[layer], n3b_ref[layer])

    out_ref[...] = x


def transformer_decoder(x, enc, tgt_mask_add, key_padding_bool, stacked):
    """x: (B,S,E), enc: (B,T,E), tgt_mask_add: (S,S) additive,
    key_padding_bool: (B,T) True=pad, stacked: layer-stacked pre-transposed params."""
    B, S, E = x.shape
    T = enc.shape[1]

    # Fold batch into one slab (free wrapper-side reshape).
    x_flat = x.reshape(B * S, E)
    enc_flat = enc.reshape(B * T, E)

    # Block-diagonal additive masks so one (B*S, B*K) score matrix per head
    # covers every batch element at once.
    batch_eye = jnp.eye(B, dtype=bool)
    self_mask = jnp.where(batch_eye[:, None, :, None],
                          tgt_mask_add[None, :, None, :], NEG)
    self_mask = self_mask.astype(jnp.float32).reshape(B * S, B * S)

    valid_keys = jnp.logical_not(key_padding_bool)           # (B, T)
    allowed_cross = jnp.broadcast_to(
        batch_eye[:, None, :, None] & valid_keys[None, None, :, :], (B, S, B, T))
    cross_mask = jnp.where(allowed_cross, 0.0, NEG)
    cross_mask = cross_mask.astype(jnp.float32).reshape(B * S, B * T)

    args = [
        x_flat, enc_flat, self_mask, cross_mask,
        stacked["sa_win_t"], stacked["sa_bin"], stacked["sa_wo_t"], stacked["sa_bo"],
        stacked["ca_wq_t"], stacked["ca_bq"], stacked["ca_wkv_t"], stacked["ca_bkv"],
        stacked["ca_wo_t"], stacked["ca_bo"],
        stacked["n1g"], stacked["n1b"], stacked["n2g"], stacked["n2b"],
        stacked["n3g"], stacked["n3b"],
        stacked["w1_t"], stacked["b1"], stacked["w2_t"], stacked["b2"],
    ]
    num_layers = stacked["sa_win_t"].shape[0]

    out_flat = pl.pallas_call(
        functools.partial(decoder_stack_kernel,
                          num_layers=num_layers, num_heads=NUM_HEADS),
        out_shape=jax.ShapeDtypeStruct((B * S, E), jnp.float32),
        in_specs=[pl.BlockSpec(memory_space=pltpu.MemorySpace.VMEM)] * len(args),
        out_specs=pl.BlockSpec(memory_space=pltpu.MemorySpace.VMEM),
    )(*args)
    return out_flat.reshape(B, S, E)


def init_block_params(key, embed_dim, ffn_hidden):
    """Parameters in PyTorch nn.MultiheadAttention / nn.Linear conventions."""
    ks = jax.random.split(key, 10)
    scale = 0.05
    f32 = jnp.float32

    def rnd(k, shape):
        return (scale * jax.random.normal(k, shape)).astype(f32)

    return {
        # self-attention: in_proj_weight (3E, E) = [Wq; Wk; Wv], out_proj (E, E)
        "sa_w": rnd(ks[0], (3 * embed_dim, embed_dim)),
        "sa_b": rnd(ks[1], (3 * embed_dim,)),
        "sa_ow": rnd(ks[2], (embed_dim, embed_dim)),
        "sa_ob": jnp.zeros((embed_dim,), f32),
        # cross-attention
        "ca_w": rnd(ks[3], (3 * embed_dim, embed_dim)),
        "ca_b": rnd(ks[4], (3 * embed_dim,)),
        "ca_ow": rnd(ks[5], (embed_dim, embed_dim)),
        "ca_ob": jnp.zeros((embed_dim,), f32),
        # layer norms
        "n1g": jnp.ones((embed_dim,), f32), "n1b": jnp.zeros((embed_dim,), f32),
        "n2g": jnp.ones((embed_dim,), f32), "n2b": jnp.zeros((embed_dim,), f32),
        "n3g": jnp.ones((embed_dim,), f32), "n3b": jnp.zeros((embed_dim,), f32),
        # FFN: Linear(E->F), Linear(F->E) in PyTorch layout (out, in)
        "w1": rnd(ks[6], (ffn_hidden, embed_dim)),
        "b1": rnd(ks[7], (ffn_hidden,)),
        "w2": rnd(ks[8], (embed_dim, ffn_hidden)),
        "b2": rnd(ks[9], (embed_dim,)),
    }


def stack_params(layer_params, embed_dim):
    """Stack per-layer params along a leading layer axis and pre-transpose every
    weight so the kernel computes y = x @ W_t + b with no in-kernel transposes."""
    E = embed_dim

    def stk(fn, name):
        return jnp.stack([fn(p[name]) for p in layer_params], axis=0)

    t = lambda w: w.T
    row = lambda b: b.reshape(1, -1)

    return {
        "sa_win_t": stk(t, "sa_w"),                                        # (L, E, 3E)
        "sa_bin": stk(row, "sa_b"),                                        # (L, 1, 3E)
        "sa_wo_t": stk(t, "sa_ow"),                                        # (L, E, E)
        "sa_bo": stk(row, "sa_ob"),                                        # (L, 1, E)
        "ca_wq_t": jnp.stack([p["ca_w"][0:E, :].T for p in layer_params]),        # (L, E, E)
        "ca_bq": jnp.stack([p["ca_b"][0:E].reshape(1, -1) for p in layer_params]),
        "ca_wkv_t": jnp.stack([p["ca_w"][E:3 * E, :].T for p in layer_params]),   # (L, E, 2E)
        "ca_bkv": jnp.stack([p["ca_b"][E:3 * E].reshape(1, -1) for p in layer_params]),
        "ca_wo_t": stk(t, "ca_ow"),
        "ca_bo": stk(row, "ca_ob"),
        "n1g": stk(row, "n1g"), "n1b": stk(row, "n1b"),
        "n2g": stk(row, "n2g"), "n2b": stk(row, "n2b"),
        "n3g": stk(row, "n3g"), "n3b": stk(row, "n3b"),
        "w1_t": stk(t, "w1"), "b1": stk(row, "b1"),                        # (L, E, F), (L, 1, F)
        "w2_t": stk(t, "w2"), "b2": stk(row, "b2"),                        # (L, F, E), (L, 1, E)
    }


if __name__ == "__main__":
    root = jax.random.PRNGKey(0)
    k_x, k_enc, k_params = jax.random.split(root, 3)

    x = jax.random.normal(k_x, (BATCH, TGT_SEQ, EMBED_DIM), dtype=jnp.float32)
    enc = jax.random.normal(k_enc, (BATCH, SRC_SEQ, EMBED_DIM), dtype=jnp.float32)

    # causal target mask (additive), matching attn_mask semantics
    causal = jnp.tril(jnp.ones((TGT_SEQ, TGT_SEQ), dtype=bool))
    tgt_mask_add = jnp.where(causal, 0.0, NEG).astype(jnp.float32)

    # src key padding mask: pad last 2 source positions of batch element 1
    pad_bool = jnp.zeros((BATCH, SRC_SEQ), dtype=bool).at[1, -2:].set(True)

    layer_keys = jax.random.split(k_params, NUM_LAYERS)
    per_layer = [init_block_params(k, EMBED_DIM, FFN_HIDDEN) for k in layer_keys]
    stacked = stack_params(per_layer, EMBED_DIM)

    out = transformer_decoder(x, enc, tgt_mask_add, pad_bool, stacked)
    out = jax.block_until_ready(out)
    assert out.shape == (BATCH, TGT_SEQ, EMBED_DIM)
    assert bool(jnp.all(jnp.isfinite(out)))
    print("KERNEL_OK")
</pallas_src>

<mosaic_0001>
module attributes {stable_mosaic.version = 11 : i64} {
  func.func @decoder_stack_kernel(%arg0: memref<16x32xf32, #tpu.memory_space<vmem>>, %arg1: memref<16x32xf32, #tpu.memory_space<vmem>>, %arg2: memref<16x16xf32, #tpu.memory_space<vmem>>, %arg3: memref<16x16xf32, #tpu.memory_space<vmem>>, %arg4: memref<2x32x96xf32, #tpu.memory_space<vmem>>, %arg5: memref<2x1x96xf32, #tpu.memory_space<vmem>>, %arg6: memref<2x32x32xf32, #tpu.memory_space<vmem>>, %arg7: memref<2x1x32xf32, #tpu.memory_space<vmem>>, %arg8: memref<2x32x32xf32, #tpu.memory_space<vmem>>, %arg9: memref<2x1x32xf32, #tpu.memory_space<vmem>>, %arg10: memref<2x32x64xf32, #tpu.memory_space<vmem>>, %arg11: memref<2x1x64xf32, #tpu.memory_space<vmem>>, %arg12: memref<2x32x32xf32, #tpu.memory_space<vmem>>, %arg13: memref<2x1x32xf32, #tpu.memory_space<vmem>>, %arg14: memref<2x1x32xf32, #tpu.memory_space<vmem>>, %arg15: memref<2x1x32xf32, #tpu.memory_space<vmem>>, %arg16: memref<2x1x32xf32, #tpu.memory_space<vmem>>, %arg17: memref<2x1x32xf32, #tpu.memory_space<vmem>>, %arg18: memref<2x1x32xf32, #tpu.memory_space<vmem>>, %arg19: memref<2x1x32xf32, #tpu.memory_space<vmem>>, %arg20: memref<2x32x64xf32, #tpu.memory_space<vmem>>, %arg21: memref<2x1x64xf32, #tpu.memory_space<vmem>>, %arg22: memref<2x64x32xf32, #tpu.memory_space<vmem>>, %arg23: memref<2x1x32xf32, #tpu.memory_space<vmem>>, %arg24: memref<16x32xf32, #tpu.memory_space<vmem>>) attributes {dimension_semantics = [], scalar_prefetch = 0 : i64, scratch_operands = 0 : i64, tpu.core_type = #tpu.core_type<tc>} {
    %c0 = arith.constant 0 : index
    %c0_0 = arith.constant 0 : index
    %0 = vector.load %arg2[%c0, %c0_0] : memref<16x16xf32, #tpu.memory_space<vmem>>, vector<16x16xf32>
    %c0_1 = arith.constant 0 : index
    %c0_2 = arith.constant 0 : index
    %1 = vector.load %arg3[%c0_1, %c0_2] : memref<16x16xf32, #tpu.memory_space<vmem>>, vector<16x16xf32>
    %c0_3 = arith.constant 0 : index
    %c0_4 = arith.constant 0 : index
    %2 = vector.load %arg0[%c0_3, %c0_4] : memref<16x32xf32, #tpu.memory_space<vmem>>, vector<16x32xf32>
    %c0_5 = arith.constant 0 : index
    %c0_6 = arith.constant 0 : index
    %3 = vector.load %arg1[%c0_5, %c0_6] : memref<16x32xf32, #tpu.memory_space<vmem>>, vector<16x32xf32>
    %c0_7 = arith.constant 0 : index
    %c0_8 = arith.constant 0 : index
    %c0_9 = arith.constant 0 : index
    %4 = vector.load %arg4[%c0_7, %c0_8, %c0_9] : memref<2x32x96xf32, #tpu.memory_space<vmem>>, vector<1x32x96xf32>
    %5 = vector.shape_cast %4 : vector<1x32x96xf32> to vector<32x96xf32>
    %cst = arith.constant dense<0.000000e+00> : vector<16x96xf32>
    %6 = tpu.matmul %2, %5, %cst {dimension_numbers = #tpu.dot_dimension_numbers<[1], [0], [0], [1], [0, 0, 1, 1], [], []>} : vector<16x32xf32>, vector<32x96xf32>, vector<16x96xf32> -> vector<16x96xf32>
    %c0_10 = arith.constant 0 : index
    %c0_11 = arith.constant 0 : index
    %c0_12 = arith.constant 0 : index
    %7 = vector.load %arg5[%c0_10, %c0_11, %c0_12] : memref<2x1x96xf32, #tpu.memory_space<vmem>>, vector<1x1x96xf32>
    %8 = vector.shape_cast %7 : vector<1x1x96xf32> to vector<1x96xf32>
    %9 = vector.broadcast %8 : vector<1x96xf32> to vector<16x96xf32>
    %10 = arith.addf %6, %9 : vector<16x96xf32>
    %11 = vector.extract_strided_slice %10 {offsets = [0, 0], sizes = [16, 32], strides = [1, 1]} : vector<16x96xf32> to vector<16x32xf32>
    %12 = vector.extract_strided_slice %10 {offsets = [0, 32], sizes = [16, 32], strides = [1, 1]} : vector<16x96xf32> to vector<16x32xf32>
    %13 = vector.extract_strided_slice %10 {offsets = [0, 64], sizes = [16, 32], strides = [1, 1]} : vector<16x96xf32> to vector<16x32xf32>
    %c0_13 = arith.constant 0 : index
    %c0_14 = arith.constant 0 : index
    %c0_15 = arith.constant 0 : index
    %14 = vector.load %arg6[%c0_13, %c0_14, %c0_15] : memref<2x32x32xf32, #tpu.memory_space<vmem>>, vector<1x32x32xf32>
    %15 = vector.shape_cast %14 : vector<1x32x32xf32> to vector<32x32xf32>
    %c0_16 = arith.constant 0 : index
    %c0_17 = arith.constant 0 : index
    %c0_18 = arith.constant 0 : index
    %16 = vector.load %arg7[%c0_16, %c0_17, %c0_18] : memref<2x1x32xf32, #tpu.memory_space<vmem>>, vector<1x1x32xf32>
    %17 = vector.shape_cast %16 : vector<1x1x32xf32> to vector<1x32xf32>
    %18 = vector.extract_strided_slice %11 {offsets = [0, 0], sizes = [16, 8], strides = [1, 1]} : vector<16x32xf32> to vector<16x8xf32>
    %19 = vector.extract_strided_slice %12 {offsets = [0, 0], sizes = [16, 8], strides = [1, 1]} : vector<16x32xf32> to vector<16x8xf32>
    %cst_19 = arith.constant dense<0.000000e+00> : vector<16x16xf32>
    %20 = tpu.matmul %18, %19, %cst_19 {dimension_numbers = #tpu.dot_dimension_numbers<[1], [1], [0], [0], [0, 0, 1, 0], [], []>} : vector<16x8xf32>, vector<16x8xf32>, vector<16x16xf32> -> vector<16x16xf32>
    %cst_20 = arith.constant 0.353553385 : f32
    %21 = vector.broadcast %cst_20 : f32 to vector<16x16xf32>
    %22 = arith.mulf %20, %21 : vector<16x16xf32>
    %23 = arith.addf %22, %0 : vector<16x16xf32>
    %cst_21 = arith.constant dense<0xFF800000> : vector<16xf32>
    %24 = vector.multi_reduction <maximumf>, %23, %cst_21 [1] : vector<16x16xf32> to vector<16xf32>
    %25 = vector.shape_cast %24 : vector<16xf32> to vector<16x1xf32>
    %26 = vector.broadcast %25 : vector<16x1xf32> to vector<16x16xf32>
    %27 = arith.subf %23, %26 : vector<16x16xf32>
    %28 = math.exp %27 : vector<16x16xf32>
    %cst_22 = arith.constant dense<0.000000e+00> : vector<16xf32>
    %29 = vector.multi_reduction <add>, %28, %cst_22 [1] : vector<16x16xf32> to vector<16xf32>
    %30 = vector.shape_cast %29 : vector<16xf32> to vector<16x1xf32>
    %31 = tpu.reciprocal %30 {approx = true} : vector<16x1xf32> -> vector<16x1xf32>
    %32 = vector.broadcast %31 : vector<16x1xf32> to vector<16x16xf32>
    %33 = arith.mulf %28, %32 : vector<16x16xf32>
    %34 = vector.extract_strided_slice %13 {offsets = [0, 0], sizes = [16, 8], strides = [1, 1]} : vector<16x32xf32> to vector<16x8xf32>
    %cst_23 = arith.constant dense<0.000000e+00> : vector<16x8xf32>
    %35 = tpu.matmul %33, %34, %cst_23 {dimension_numbers = #tpu.dot_dimension_numbers<[1], [0], [0], [1], [0, 0, 1, 1], [], []>} : vector<16x16xf32>, vector<16x8xf32>, vector<16x8xf32> -> vector<16x8xf32>
    %36 = vector.extract_strided_slice %15 {offsets = [0, 0], sizes = [8, 32], strides = [1, 1]} : vector<32x32xf32> to vector<8x32xf32>
    %cst_24 = arith.constant dense<0.000000e+00> : vector<16x32xf32>
    %37 = tpu.matmul %35, %36, %cst_24 {dimension_numbers = #tpu.dot_dimension_numbers<[1], [0], [0], [1], [0, 0, 1, 1], [], []>} : vector<16x8xf32>, vector<8x32xf32>, vector<16x32xf32> -> vector<16x32xf32>
    %38 = vector.extract_strided_slice %11 {offsets = [0, 8], sizes = [16, 8], strides = [1, 1]} : vector<16x32xf32> to vector<16x8xf32>
    %39 = vector.extract_strided_slice %12 {offsets = [0, 8], sizes = [16, 8], strides = [1, 1]} : vector<16x32xf32> to vector<16x8xf32>
    %cst_25 = arith.constant dense<0.000000e+00> : vector<16x16xf32>
    %40 = tpu.matmul %38, %39, %cst_25 {dimension_numbers = #tpu.dot_dimension_numbers<[1], [1], [0], [0], [0, 0, 1, 0], [], []>} : vector<16x8xf32>, vector<16x8xf32>, vector<16x16xf32> -> vector<16x16xf32>
    %cst_26 = arith.constant 0.353553385 : f32
    %41 = vector.broadcast %cst_26 : f32 to vector<16x16xf32>
    %42 = arith.mulf %40, %41 : vector<16x16xf32>
    %43 = arith.addf %42, %0 : vector<16x16xf32>
    %cst_27 = arith.constant dense<0xFF800000> : vector<16xf32>
    %44 = vector.multi_reduction <maximumf>, %43, %cst_27 [1] : vector<16x16xf32> to vector<16xf32>
    %45 = vector.shape_cast %44 : vector<16xf32> to vector<16x1xf32>
    %46 = vector.broadcast %45 : vector<16x1xf32> to vector<16x16xf32>
    %47 = arith.subf %43, %46 : vector<16x16xf32>
    %48 = math.exp %47 : vector<16x16xf32>
    %cst_28 = arith.constant dense<0.000000e+00> : vector<16xf32>
    %49 = vector.multi_reduction <add>, %48, %cst_28 [1] : vector<16x16xf32> to vector<16xf32>
    %50 = vector.shape_cast %49 : vector<16xf32> to vector<16x1xf32>
    %51 = tpu.reciprocal %50 {approx = true} : vector<16x1xf32> -> vector<16x1xf32>
    %52 = vector.broadcast %51 : vector<16x1xf32> to vector<16x16xf32>
    %53 = arith.mulf %48, %52 : vector<16x16xf32>
    %54 = vector.extract_strided_slice %13 {offsets = [0, 8], sizes = [16, 8], strides = [1, 1]} : vector<16x32xf32> to vector<16x8xf32>
    %cst_29 = arith.constant dense<0.000000e+00> : vector<16x8xf32>
    %55 = tpu.matmul %53, %54, %cst_29 {dimension_numbers = #tpu.dot_dimension_numbers<[1], [0], [0], [1], [0, 0, 1, 1], [], []>} : vector<16x16xf32>, vector<16x8xf32>, vector<16x8xf32> -> vector<16x8xf32>
    %56 = vector.extract_strided_slice %15 {offsets = [8, 0], sizes = [8, 32], strides = [1, 1]} : vector<32x32xf32> to vector<8x32xf32>
    %cst_30 = arith.constant dense<0.000000e+00> : vector<16x32xf32>
    %57 = tpu.matmul %55, %56, %cst_30 {dimension_numbers = #tpu.dot_dimension_numbers<[1], [0], [0], [1], [0, 0, 1, 1], [], []>} : vector<16x8xf32>, vector<8x32xf32>, vector<16x32xf32> -> vector<16x32xf32>
    %58 = arith.addf %37, %57 : vector<16x32xf32>
    %59 = vector.extract_strided_slice %11 {offsets = [0, 16], sizes = [16, 8], strides = [1, 1]} : vector<16x32xf32> to vector<16x8xf32>
    %60 = vector.extract_strided_slice %12 {offsets = [0, 16], sizes = [16, 8], strides = [1, 1]} : vector<16x32xf32> to vector<16x8xf32>
    %cst_31 = arith.constant dense<0.000000e+00> : vector<16x16xf32>
    %61 = tpu.matmul %59, %60, %cst_31 {dimension_numbers = #tpu.dot_dimension_numbers<[1], [1], [0], [0], [0, 0, 1, 0], [], []>} : vector<16x8xf32>, vector<16x8xf32>, vector<16x16xf32> -> vector<16x16xf32>
    %cst_32 = arith.constant 0.353553385 : f32
    %62 = vector.broadcast %cst_32 : f32 to vector<16x16xf32>
    %63 = arith.mulf %61, %62 : vector<16x16xf32>
    %64 = arith.addf %63, %0 : vector<16x16xf32>
    %cst_33 = arith.constant dense<0xFF800000> : vector<16xf32>
    %65 = vector.multi_reduction <maximumf>, %64, %cst_33 [1] : vector<16x16xf32> to vector<16xf32>
    %66 = vector.shape_cast %65 : vector<16xf32> to vector<16x1xf32>
    %67 = vector.broadcast %66 : vector<16x1xf32> to vector<16x16xf32>
    %68 = arith.subf %64, %67 : vector<16x16xf32>
    %69 = math.exp %68 : vector<16x16xf32>
    %cst_34 = arith.constant dense<0.000000e+00> : vector<16xf32>
    %70 = vector.multi_reduction <add>, %69, %cst_34 [1] : vector<16x16xf32> to vector<16xf32>
    %71 = vector.shape_cast %70 : vector<16xf32> to vector<16x1xf32>
    %72 = tpu.reciprocal %71 {approx = true} : vector<16x1xf32> -> vector<16x1xf32>
    %73 = vector.broadcast %72 : vector<16x1xf32> to vector<16x16xf32>
    %74 = arith.mulf %69, %73 : vector<16x16xf32>
    %75 = vector.extract_strided_slice %13 {offsets = [0, 16], sizes = [16, 8], strides = [1, 1]} : vector<16x32xf32> to vector<16x8xf32>
    %cst_35 = arith.constant dense<0.000000e+00> : vector<16x8xf32>
    %76 = tpu.matmul %74, %75, %cst_35 {dimension_numbers = #tpu.dot_dimension_numbers<[1], [0], [0], [1], [0, 0, 1, 1], [], []>} : vector<16x16xf32>, vector<16x8xf32>, vector<16x8xf32> -> vector<16x8xf32>
    %77 = vector.extract_strided_slice %15 {offsets = [16, 0], sizes = [8, 32], strides = [1, 1]} : vector<32x32xf32> to vector<8x32xf32>
    %cst_36 = arith.constant dense<0.000000e+00> : vector<16x32xf32>
    %78 = tpu.matmul %76, %77, %cst_36 {dimension_numbers = #tpu.dot_dimension_numbers<[1], [0], [0], [1], [0, 0, 1, 1], [], []>} : vector<16x8xf32>, vector<8x32xf32>, vector<16x32xf32> -> vector<16x32xf32>
    %79 = arith.addf %58, %78 : vector<16x32xf32>
    %80 = vector.extract_strided_slice %11 {offsets = [0, 24], sizes = [16, 8], strides = [1, 1]} : vector<16x32xf32> to vector<16x8xf32>
    %81 = vector.extract_strided_slice %12 {offsets = [0, 24], sizes = [16, 8], strides = [1, 1]} : vector<16x32xf32> to vector<16x8xf32>
    %cst_37 = arith.constant dense<0.000000e+00> : vector<16x16xf32>
    %82 = tpu.matmul %80, %81, %cst_37 {dimension_numbers = #tpu.dot_dimension_numbers<[1], [1], [0], [0], [0, 0, 1, 0], [], []>} : vector<16x8xf32>, vector<16x8xf32>, vector<16x16xf32> -> vector<16x16xf32>
    %cst_38 = arith.constant 0.353553385 : f32
    %83 = vector.broadcast %cst_38 : f32 to vector<16x16xf32>
    %84 = arith.mulf %82, %83 : vector<16x16xf32>
    %85 = arith.addf %84, %0 : vector<16x16xf32>
    %cst_39 = arith.constant dense<0xFF800000> : vector<16xf32>
    %86 = vector.multi_reduction <maximumf>, %85, %cst_39 [1] : vector<16x16xf32> to vector<16xf32>
    %87 = vector.shape_cast %86 : vector<16xf32> to vector<16x1xf32>
    %88 = vector.broadcast %87 : vector<16x1xf32> to vector<16x16xf32>
    %89 = arith.subf %85, %88 : vector<16x16xf32>
    %90 = math.exp %89 : vector<16x16xf32>
    %cst_40 = arith.constant dense<0.000000e+00> : vector<16xf32>
    %91 = vector.multi_reduction <add>, %90, %cst_40 [1] : vector<16x16xf32> to vector<16xf32>
    %92 = vector.shape_cast %91 : vector<16xf32> to vector<16x1xf32>
    %93 = tpu.reciprocal %92 {approx = true} : vector<16x1xf32> -> vector<16x1xf32>
    %94 = vector.broadcast %93 : vector<16x1xf32> to vector<16x16xf32>
    %95 = arith.mulf %90, %94 : vector<16x16xf32>
    %96 = vector.extract_strided_slice %13 {offsets = [0, 24], sizes = [16, 8], strides = [1, 1]} : vector<16x32xf32> to vector<16x8xf32>
    %cst_41 = arith.constant dense<0.000000e+00> : vector<16x8xf32>
    %97 = tpu.matmul %95, %96, %cst_41 {dimension_numbers = #tpu.dot_dimension_numbers<[1], [0], [0], [1], [0, 0, 1, 1], [], []>} : vector<16x16xf32>, vector<16x8xf32>, vector<16x8xf32> -> vector<16x8xf32>
    %98 = vector.extract_strided_slice %15 {offsets = [24, 0], sizes = [8, 32], strides = [1, 1]} : vector<32x32xf32> to vector<8x32xf32>
    %cst_42 = arith.constant dense<0.000000e+00> : vector<16x32xf32>
    %99 = tpu.matmul %97, %98, %cst_42 {dimension_numbers = #tpu.dot_dimension_numbers<[1], [0], [0], [1], [0, 0, 1, 1], [], []>} : vector<16x8xf32>, vector<8x32xf32>, vector<16x32xf32> -> vector<16x32xf32>
    %100 = arith.addf %79, %99 : vector<16x32xf32>
    %101 = vector.broadcast %17 : vector<1x32xf32> to vector<16x32xf32>
    %102 = arith.addf %100, %101 : vector<16x32xf32>
    %103 = arith.addf %2, %102 : vector<16x32xf32>
    %c0_43 = arith.constant 0 : index
    %c0_44 = arith.constant 0 : index
    %c0_45 = arith.constant 0 : index
    %104 = vector.load %arg14[%c0_43, %c0_44, %c0_45] : memref<2x1x32xf32, #tpu.memory_space<vmem>>, vector<1x1x32xf32>
    %105 = vector.shape_cast %104 : vector<1x1x32xf32> to vector<1x32xf32>
    %c0_46 = arith.constant 0 : index
    %c0_47 = arith.constant 0 : index
    %c0_48 = arith.constant 0 : index
    %106 = vector.load %arg15[%c0_46, %c0_47, %c0_48] : memref<2x1x32xf32, #tpu.memory_space<vmem>>, vector<1x1x32xf32>
    %107 = vector.shape_cast %106 : vector<1x1x32xf32> to vector<1x32xf32>
    %cst_49 = arith.constant dense<0.000000e+00> : vector<16xf32>
    %108 = vector.multi_reduction <add>, %103, %cst_49 [1] : vector<16x32xf32> to vector<16xf32>
    %109 = vector.shape_cast %108 : vector<16xf32> to vector<16x1xf32>
    %cst_50 = arith.constant 3.200000e+01 : f32
    %110 = vector.broadcast %cst_50 : f32 to vector<16x1xf32>
    %111 = arith.divf %109, %110 : vector<16x1xf32>
    %112 = vector.broadcast %111 : vector<16x1xf32> to vector<16x32xf32>
    %113 = arith.subf %103, %112 : vector<16x32xf32>
    %114 = arith.mulf %113, %113 : vector<16x32xf32>
    %cst_51 = arith.constant dense<0.000000e+00> : vector<16xf32>
    %115 = vector.multi_reduction <add>, %114, %cst_51 [1] : vector<16x32xf32> to vector<16xf32>
    %116 = vector.shape_cast %115 : vector<16xf32> to vector<16x1xf32>
    %cst_52 = arith.constant 3.200000e+01 : f32
    %117 = vector.broadcast %cst_52 : f32 to vector<16x1xf32>
    %118 = arith.divf %116, %117 : vector<16x1xf32>
    %119 = vector.broadcast %111 : vector<16x1xf32> to vector<16x32xf32>
    %120 = arith.subf %103, %119 : vector<16x32xf32>
    %cst_53 = arith.constant 9.99999974E-6 : f32
    %121 = vector.broadcast %cst_53 : f32 to vector<16x1xf32>
    %122 = arith.addf %118, %121 : vector<16x1xf32>
    %123 = math.rsqrt %122 : vector<16x1xf32>
    %124 = vector.broadcast %123 : vector<16x1xf32> to vector<16x32xf32>
    %125 = arith.mulf %120, %124 : vector<16x32xf32>
    %126 = vector.broadcast %105 : vector<1x32xf32> to vector<16x32xf32>
    %127 = arith.mulf %125, %126 : vector<16x32xf32>
    %128 = vector.broadcast %107 : vector<1x32xf32> to vector<16x32xf32>
    %129 = arith.addf %127, %128 : vector<16x32xf32>
    %c0_54 = arith.constant 0 : index
    %c0_55 = arith.constant 0 : index
    %c0_56 = arith.constant 0 : index
    %130 = vector.load %arg8[%c0_54, %c0_55, %c0_56] : memref<2x32x32xf32, #tpu.memory_space<vmem>>, vector<1x32x32xf32>
    %131 = vector.shape_cast %130 : vector<1x32x32xf32> to vector<32x32xf32>
    %cst_57 = arith.constant dense<0.000000e+00> : vector<16x32xf32>
    %132 = tpu.matmul %129, %131, %cst_57 {dimension_numbers = #tpu.dot_dimension_numbers<[1], [0], [0], [1], [0, 0, 1, 1], [], []>} : vector<16x32xf32>, vector<32x32xf32>, vector<16x32xf32> -> vector<16x32xf32>
    %c0_58 = arith.constant 0 : index
    %c0_59 = arith.constant 0 : index
    %c0_60 = arith.constant 0 : index
    %133 = vector.load %arg9[%c0_58, %c0_59, %c0_60] : memref<2x1x32xf32, #tpu.memory_space<vmem>>, vector<1x1x32xf32>
    %134 = vector.shape_cast %133 : vector<1x1x32xf32> to vector<1x32xf32>
    %135 = vector.broadcast %134 : vector<1x32xf32> to vector<16x32xf32>
    %136 = arith.addf %132, %135 : vector<16x32xf32>
    %c0_61 = arith.constant 0 : index
    %c0_62 = arith.constant 0 : index
    %c0_63 = arith.constant 0 : index
    %137 = vector.load %arg10[%c0_61, %c0_62, %c0_63] : memref<2x32x64xf32, #tpu.memory_space<vmem>>, vector<1x32x64xf32>
    %138 = vector.shape_cast %137 : vector<1x32x64xf32> to vector<32x64xf32>
    %cst_64 = arith.constant dense<0.000000e+00> : vector<16x64xf32>
    %139 = tpu.matmul %3, %138, %cst_64 {dimension_numbers = #tpu.dot_dimension_numbers<[1], [0], [0], [1], [0, 0, 1, 1], [], []>} : vector<16x32xf32>, vector<32x64xf32>, vector<16x64xf32> -> vector<16x64xf32>
    %c0_65 = arith.constant 0 : index
    %c0_66 = arith.constant 0 : index
    %c0_67 = arith.constant 0 : index
    %140 = vector.load %arg11[%c0_65, %c0_66, %c0_67] : memref<2x1x64xf32, #tpu.memory_space<vmem>>, vector<1x1x64xf32>
    %141 = vector.shape_cast %140 : vector<1x1x64xf32> to vector<1x64xf32>
    %142 = vector.broadcast %141 : vector<1x64xf32> to vector<16x64xf32>
    %143 = arith.addf %139, %142 : vector<16x64xf32>
    %144 = vector.extract_strided_slice %143 {offsets = [0, 0], sizes = [16, 32], strides = [1, 1]} : vector<16x64xf32> to vector<16x32xf32>
    %145 = vector.extract_strided_slice %143 {offsets = [0, 32], sizes = [16, 32], strides = [1, 1]} : vector<16x64xf32> to vector<16x32xf32>
    %c0_68 = arith.constant 0 : index
    %c0_69 = arith.constant 0 : index
    %c0_70 = arith.constant 0 : index
    %146 = vector.load %arg12[%c0_68, %c0_69, %c0_70] : memref<2x32x32xf32, #tpu.memory_space<vmem>>, vector<1x32x32xf32>
    %147 = vector.shape_cast %146 : vector<1x32x32xf32> to vector<32x32xf32>
    %c0_71 = arith.constant 0 : index
    %c0_72 = arith.constant 0 : index
    %c0_73 = arith.constant 0 : index
    %148 = vector.load %arg13[%c0_71, %c0_72, %c0_73] : memref<2x1x32xf32, #tpu.memory_space<vmem>>, vector<1x1x32xf32>
    %149 = vector.shape_cast %148 : vector<1x1x32xf32> to vector<1x32xf32>
    %150 = vector.extract_strided_slice %136 {offsets = [0, 0], sizes = [16, 8], strides = [1, 1]} : vector<16x32xf32> to vector<16x8xf32>
    %151 = vector.extract_strided_slice %144 {offsets = [0, 0], sizes = [16, 8], strides = [1, 1]} : vector<16x32xf32> to vector<16x8xf32>
    %cst_74 = arith.constant dense<0.000000e+00> : vector<16x16xf32>
    %152 = tpu.matmul %150, %151, %cst_74 {dimension_numbers = #tpu.dot_dimension_numbers<[1], [1], [0], [0], [0, 0, 1, 0], [], []>} : vector<16x8xf32>, vector<16x8xf32>, vector<16x16xf32> -> vector<16x16xf32>
    %cst_75 = arith.constant 0.353553385 : f32
    %153 = vector.broadcast %cst_75 : f32 to vector<16x16xf32>
    %154 = arith.mulf %152, %153 : vector<16x16xf32>
    %155 = arith.addf %154, %1 : vector<16x16xf32>
    %cst_76 = arith.constant dense<0xFF800000> : vector<16xf32>
    %156 = vector.multi_reduction <maximumf>, %155, %cst_76 [1] : vector<16x16xf32> to vector<16xf32>
    %157 = vector.shape_cast %156 : vector<16xf32> to vector<16x1xf32>
    %158 = vector.broadcast %157 : vector<16x1xf32> to vector<16x16xf32>
    %159 = arith.subf %155, %158 : vector<16x16xf32>
    %160 = math.exp %159 : vector<16x16xf32>
    %cst_77 = arith.constant dense<0.000000e+00> : vector<16xf32>
    %161 = vector.multi_reduction <add>, %160, %cst_77 [1] : vector<16x16xf32> to vector<16xf32>
    %162 = vector.shape_cast %161 : vector<16xf32> to vector<16x1xf32>
    %163 = tpu.reciprocal %162 {approx = true} : vector<16x1xf32> -> vector<16x1xf32>
    %164 = vector.broadcast %163 : vector<16x1xf32> to vector<16x16xf32>
    %165 = arith.mulf %160, %164 : vector<16x16xf32>
    %166 = vector.extract_strided_slice %145 {offsets = [0, 0], sizes = [16, 8], strides = [1, 1]} : vector<16x32xf32> to vector<16x8xf32>
    %cst_78 = arith.constant dense<0.000000e+00> : vector<16x8xf32>
    %167 = tpu.matmul %165, %166, %cst_78 {dimension_numbers = #tpu.dot_dimension_numbers<[1], [0], [0], [1], [0, 0, 1, 1], [], []>} : vector<16x16xf32>, vector<16x8xf32>, vector<16x8xf32> -> vector<16x8xf32>
    %168 = vector.extract_strided_slice %147 {offsets = [0, 0], sizes = [8, 32], strides = [1, 1]} : vector<32x32xf32> to vector<8x32xf32>
    %cst_79 = arith.constant dense<0.000000e+00> : vector<16x32xf32>
    %169 = tpu.matmul %167, %168, %cst_79 {dimension_numbers = #tpu.dot_dimension_numbers<[1], [0], [0], [1], [0, 0, 1, 1], [], []>} : vector<16x8xf32>, vector<8x32xf32>, vector<16x32xf32> -> vector<16x32xf32>
    %170 = vector.extract_strided_slice %136 {offsets = [0, 8], sizes = [16, 8], strides = [1, 1]} : vector<16x32xf32> to vector<16x8xf32>
    %171 = vector.extract_strided_slice %144 {offsets = [0, 8], sizes = [16, 8], strides = [1, 1]} : vector<16x32xf32> to vector<16x8xf32>
    %cst_80 = arith.constant dense<0.000000e+00> : vector<16x16xf32>
    %172 = tpu.matmul %170, %171, %cst_80 {dimension_numbers = #tpu.dot_dimension_numbers<[1], [1], [0], [0], [0, 0, 1, 0], [], []>} : vector<16x8xf32>, vector<16x8xf32>, vector<16x16xf32> -> vector<16x16xf32>
    %cst_81 = arith.constant 0.353553385 : f32
    %173 = vector.broadcast %cst_81 : f32 to vector<16x16xf32>
    %174 = arith.mulf %172, %173 : vector<16x16xf32>
    %175 = arith.addf %174, %1 : vector<16x16xf32>
    %cst_82 = arith.constant dense<0xFF800000> : vector<16xf32>
    %176 = vector.multi_reduction <maximumf>, %175, %cst_82 [1] : vector<16x16xf32> to vector<16xf32>
    %177 = vector.shape_cast %176 : vector<16xf32> to vector<16x1xf32>
    %178 = vector.broadcast %177 : vector<16x1xf32> to vector<16x16xf32>
    %179 = arith.subf %175, %178 : vector<16x16xf32>
    %180 = math.exp %179 : vector<16x16xf32>
    %cst_83 = arith.constant dense<0.000000e+00> : vector<16xf32>
    %181 = vector.multi_reduction <add>, %180, %cst_83 [1] : vector<16x16xf32> to vector<16xf32>
    %182 = vector.shape_cast %181 : vector<16xf32> to vector<16x1xf32>
    %183 = tpu.reciprocal %182 {approx = true} : vector<16x1xf32> -> vector<16x1xf32>
    %184 = vector.broadcast %183 : vector<16x1xf32> to vector<16x16xf32>
    %185 = arith.mulf %180, %184 : vector<16x16xf32>
    %186 = vector.extract_strided_slice %145 {offsets = [0, 8], sizes = [16, 8], strides = [1, 1]} : vector<16x32xf32> to vector<16x8xf32>
    %cst_84 = arith.constant dense<0.000000e+00> : vector<16x8xf32>
    %187 = tpu.matmul %185, %186, %cst_84 {dimension_numbers = #tpu.dot_dimension_numbers<[1], [0], [0], [1], [0, 0, 1, 1], [], []>} : vector<16x16xf32>, vector<16x8xf32>, vector<16x8xf32> -> vector<16x8xf32>
    %188 = vector.extract_strided_slice %147 {offsets = [8, 0], sizes = [8, 32], strides = [1, 1]} : vector<32x32xf32> to vector<8x32xf32>
    %cst_85 = arith.constant dense<0.000000e+00> : vector<16x32xf32>
    %189 = tpu.matmul %187, %188, %cst_85 {dimension_numbers = #tpu.dot_dimension_numbers<[1], [0], [0], [1], [0, 0, 1, 1], [], []>} : vector<16x8xf32>, vector<8x32xf32>, vector<16x32xf32> -> vector<16x32xf32>
    %190 = arith.addf %169, %189 : vector<16x32xf32>
    %191 = vector.extract_strided_slice %136 {offsets = [0, 16], sizes = [16, 8], strides = [1, 1]} : vector<16x32xf32> to vector<16x8xf32>
    %192 = vector.extract_strided_slice %144 {offsets = [0, 16], sizes = [16, 8], strides = [1, 1]} : vector<16x32xf32> to vector<16x8xf32>
    %cst_86 = arith.constant dense<0.000000e+00> : vector<16x16xf32>
    %193 = tpu.matmul %191, %192, %cst_86 {dimension_numbers = #tpu.dot_dimension_numbers<[1], [1], [0], [0], [0, 0, 1, 0], [], []>} : vector<16x8xf32>, vector<16x8xf32>, vector<16x16xf32> -> vector<16x16xf32>
    %cst_87 = arith.constant 0.353553385 : f32
    %194 = vector.broadcast %cst_87 : f32 to vector<16x16xf32>
    %195 = arith.mulf %193, %194 : vector<16x16xf32>
    %196 = arith.addf %195, %1 : vector<16x16xf32>
    %cst_88 = arith.constant dense<0xFF800000> : vector<16xf32>
    %197 = vector.multi_reduction <maximumf>, %196, %cst_88 [1] : vector<16x16xf32> to vector<16xf32>
    %198 = vector.shape_cast %197 : vector<16xf32> to vector<16x1xf32>
    %199 = vector.broadcast %198 : vector<16x1xf32> to vector<16x16xf32>
    %200 = arith.subf %196, %199 : vector<16x16xf32>
    %201 = math.exp %200 : vector<16x16xf32>
    %cst_89 = arith.constant dense<0.000000e+00> : vector<16xf32>
    %202 = vector.multi_reduction <add>, %201, %cst_89 [1] : vector<16x16xf32> to vector<16xf32>
    %203 = vector.shape_cast %202 : vector<16xf32> to vector<16x1xf32>
    %204 = tpu.reciprocal %203 {approx = true} : vector<16x1xf32> -> vector<16x1xf32>
    %205 = vector.broadcast %204 : vector<16x1xf32> to vector<16x16xf32>
    %206 = arith.mulf %201, %205 : vector<16x16xf32>
    %207 = vector.extract_strided_slice %145 {offsets = [0, 16], sizes = [16, 8], strides = [1, 1]} : vector<16x32xf32> to vector<16x8xf32>
    %cst_90 = arith.constant dense<0.000000e+00> : vector<16x8xf32>
    %208 = tpu.matmul %206, %207, %cst_90 {dimension_numbers = #tpu.dot_dimension_numbers<[1], [0], [0], [1], [0, 0, 1, 1], [], []>} : vector<16x16xf32>, vector<16x8xf32>, vector<16x8xf32> -> vector<16x8xf32>
    %209 = vector.extract_strided_slice %147 {offsets = [16, 0], sizes = [8, 32], strides = [1, 1]} : vector<32x32xf32> to vector<8x32xf32>
    %cst_91 = arith.constant dense<0.000000e+00> : vector<16x32xf32>
    %210 = tpu.matmul %208, %209, %cst_91 {dimension_numbers = #tpu.dot_dimension_numbers<[1], [0], [0], [1], [0, 0, 1, 1], [], []>} : vector<16x8xf32>, vector<8x32xf32>, vector<16x32xf32> -> vector<16x32xf32>
    %211 = arith.addf %190, %210 : vector<16x32xf32>
    %212 = vector.extract_strided_slice %136 {offsets = [0, 24], sizes = [16, 8], strides = [1, 1]} : vector<16x32xf32> to vector<16x8xf32>
    %213 = vector.extract_strided_slice %144 {offsets = [0, 24], sizes = [16, 8], strides = [1, 1]} : vector<16x32xf32> to vector<16x8xf32>
    %cst_92 = arith.constant dense<0.000000e+00> : vector<16x16xf32>
    %214 = tpu.matmul %212, %213, %cst_92 {dimension_numbers = #tpu.dot_dimension_numbers<[1], [1], [0], [0], [0, 0, 1, 0], [], []>} : vector<16x8xf32>, vector<16x8xf32>, vector<16x16xf32> -> vector<16x16xf32>
    %cst_93 = arith.constant 0.353553385 : f32
    %215 = vector.broadcast %cst_93 : f32 to vector<16x16xf32>
    %216 = arith.mulf %214, %215 : vector<16x16xf32>
    %217 = arith.addf %216, %1 : vector<16x16xf32>
    %cst_94 = arith.constant dense<0xFF800000> : vector<16xf32>
    %218 = vector.multi_reduction <maximumf>, %217, %cst_94 [1] : vector<16x16xf32> to vector<16xf32>
    %219 = vector.shape_cast %218 : vector<16xf32> to vector<16x1xf32>
    %220 = vector.broadcast %219 : vector<16x1xf32> to vector<16x16xf32>
    %221 = arith.subf %217, %220 : vector<16x16xf32>
    %222 = math.exp %221 : vector<16x16xf32>
    %cst_95 = arith.constant dense<0.000000e+00> : vector<16xf32>
    %223 = vector.multi_reduction <add>, %222, %cst_95 [1] : vector<16x16xf32> to vector<16xf32>
    %224 = vector.shape_cast %223 : vector<16xf32> to vector<16x1xf32>
    %225 = tpu.reciprocal %224 {approx = true} : vector<16x1xf32> -> vector<16x1xf32>
    %226 = vector.broadcast %225 : vector<16x1xf32> to vector<16x16xf32>
    %227 = arith.mulf %222, %226 : vector<16x16xf32>
    %228 = vector.extract_strided_slice %145 {offsets = [0, 24], sizes = [16, 8], strides = [1, 1]} : vector<16x32xf32> to vector<16x8xf32>
    %cst_96 = arith.constant dense<0.000000e+00> : vector<16x8xf32>
    %229 = tpu.matmul %227, %228, %cst_96 {dimension_numbers = #tpu.dot_dimension_numbers<[1], [0], [0], [1], [0, 0, 1, 1], [], []>} : vector<16x16xf32>, vector<16x8xf32>, vector<16x8xf32> -> vector<16x8xf32>
    %230 = vector.extract_strided_slice %147 {offsets = [24, 0], sizes = [8, 32], strides = [1, 1]} : vector<32x32xf32> to vector<8x32xf32>
    %cst_97 = arith.constant dense<0.000000e+00> : vector<16x32xf32>
    %231 = tpu.matmul %229, %230, %cst_97 {dimension_numbers = #tpu.dot_dimension_numbers<[1], [0], [0], [1], [0, 0, 1, 1], [], []>} : vector<16x8xf32>, vector<8x32xf32>, vector<16x32xf32> -> vector<16x32xf32>
    %232 = arith.addf %211, %231 : vector<16x32xf32>
    %233 = vector.broadcast %149 : vector<1x32xf32> to vector<16x32xf32>
    %234 = arith.addf %232, %233 : vector<16x32xf32>
    %235 = arith.addf %129, %234 : vector<16x32xf32>
    %c0_98 = arith.constant 0 : index
    %c0_99 = arith.constant 0 : index
    %c0_100 = arith.constant 0 : index
    %236 = vector.load %arg16[%c0_98, %c0_99, %c0_100] : memref<2x1x32xf32, #tpu.memory_space<vmem>>, vector<1x1x32xf32>
    %237 = vector.shape_cast %236 : vector<1x1x32xf32> to vector<1x32xf32>
    %c0_101 = arith.constant 0 : index
    %c0_102 = arith.constant 0 : index
    %c0_103 = arith.constant 0 : index
    %238 = vector.load %arg17[%c0_101, %c0_102, %c0_103] : memref<2x1x32xf32, #tpu.memory_space<vmem>>, vector<1x1x32xf32>
    %239 = vector.shape_cast %238 : vector<1x1x32xf32> to vector<1x32xf32>
    %cst_104 = arith.constant dense<0.000000e+00> : vector<16xf32>
    %240 = vector.multi_reduction <add>, %235, %cst_104 [1] : vector<16x32xf32> to vector<16xf32>
    %241 = vector.shape_cast %240 : vector<16xf32> to vector<16x1xf32>
    %cst_105 = arith.constant 3.200000e+01 : f32
    %242 = vector.broadcast %cst_105 : f32 to vector<16x1xf32>
    %243 = arith.divf %241, %242 : vector<16x1xf32>
    %244 = vector.broadcast %243 : vector<16x1xf32> to vector<16x32xf32>
    %245 = arith.subf %235, %244 : vector<16x32xf32>
    %246 = arith.mulf %245, %245 : vector<16x32xf32>
    %cst_106 = arith.constant dense<0.000000e+00> : vector<16xf32>
    %247 = vector.multi_reduction <add>, %246, %cst_106 [1] : vector<16x32xf32> to vector<16xf32>
    %248 = vector.shape_cast %247 : vector<16xf32> to vector<16x1xf32>
    %cst_107 = arith.constant 3.200000e+01 : f32
    %249 = vector.broadcast %cst_107 : f32 to vector<16x1xf32>
    %250 = arith.divf %248, %249 : vector<16x1xf32>
    %251 = vector.broadcast %243 : vector<16x1xf32> to vector<16x32xf32>
    %252 = arith.subf %235, %251 : vector<16x32xf32>
    %cst_108 = arith.constant 9.99999974E-6 : f32
    %253 = vector.broadcast %cst_108 : f32 to vector<16x1xf32>
    %254 = arith.addf %250, %253 : vector<16x1xf32>
    %255 = math.rsqrt %254 : vector<16x1xf32>
    %256 = vector.broadcast %255 : vector<16x1xf32> to vector<16x32xf32>
    %257 = arith.mulf %252, %256 : vector<16x32xf32>
    %258 = vector.broadcast %237 : vector<1x32xf32> to vector<16x32xf32>
    %259 = arith.mulf %257, %258 : vector<16x32xf32>
    %260 = vector.broadcast %239 : vector<1x32xf32> to vector<16x32xf32>
    %261 = arith.addf %259, %260 : vector<16x32xf32>
    %c0_109 = arith.constant 0 : index
    %c0_110 = arith.constant 0 : index
    %c0_111 = arith.constant 0 : index
    %262 = vector.load %arg20[%c0_109, %c0_110, %c0_111] : memref<2x32x64xf32, #tpu.memory_space<vmem>>, vector<1x32x64xf32>
    %263 = vector.shape_cast %262 : vector<1x32x64xf32> to vector<32x64xf32>
    %cst_112 = arith.constant dense<0.000000e+00> : vector<16x64xf32>
    %264 = tpu.matmul %261, %263, %cst_112 {dimension_numbers = #tpu.dot_dimension_numbers<[1], [0], [0], [1], [0, 0, 1, 1], [], []>} : vector<16x32xf32>, vector<32x64xf32>, vector<16x64xf32> -> vector<16x64xf32>
    %c0_113 = arith.constant 0 : index
    %c0_114 = arith.constant 0 : index
    %c0_115 = arith.constant 0 : index
    %265 = vector.load %arg21[%c0_113, %c0_114, %c0_115] : memref<2x1x64xf32, #tpu.memory_space<vmem>>, vector<1x1x64xf32>
    %266 = vector.shape_cast %265 : vector<1x1x64xf32> to vector<1x64xf32>
    %267 = vector.broadcast %266 : vector<1x64xf32> to vector<16x64xf32>
    %268 = arith.addf %264, %267 : vector<16x64xf32>
    %cst_116 = arith.constant 0.000000e+00 : f32
    %269 = vector.broadcast %cst_116 : f32 to vector<16x64xf32>
    %270 = arith.maximumf %268, %269 : vector<16x64xf32>
    %c0_117 = arith.constant 0 : index
    %c0_118 = arith.constant 0 : index
    %c0_119 = arith.constant 0 : index
    %271 = vector.load %arg22[%c0_117, %c0_118, %c0_119] : memref<2x64x32xf32, #tpu.memory_space<vmem>>, vector<1x64x32xf32>
    %272 = vector.shape_cast %271 : vector<1x64x32xf32> to vector<64x32xf32>
    %cst_120 = arith.constant dense<0.000000e+00> : vector<16x32xf32>
    %273 = tpu.matmul %270, %272, %cst_120 {dimension_numbers = #tpu.dot_dimension_numbers<[1], [0], [0], [1], [0, 0, 1, 1], [], []>} : vector<16x64xf32>, vector<64x32xf32>, vector<16x32xf32> -> vector<16x32xf32>
    %c0_121 = arith.constant 0 : index
    %c0_122 = arith.constant 0 : index
    %c0_123 = arith.constant 0 : index
    %274 = vector.load %arg23[%c0_121, %c0_122, %c0_123] : memref<2x1x32xf32, #tpu.memory_space<vmem>>, vector<1x1x32xf32>
    %275 = vector.shape_cast %274 : vector<1x1x32xf32> to vector<1x32xf32>
    %276 = vector.broadcast %275 : vector<1x32xf32> to vector<16x32xf32>
    %277 = arith.addf %273, %276 : vector<16x32xf32>
    %278 = arith.addf %261, %277 : vector<16x32xf32>
    %c0_124 = arith.constant 0 : index
    %c0_125 = arith.constant 0 : index
    %c0_126 = arith.constant 0 : index
    %279 = vector.load %arg18[%c0_124, %c0_125, %c0_126] : memref<2x1x32xf32, #tpu.memory_space<vmem>>, vector<1x1x32xf32>
    %280 = vector.shape_cast %279 : vector<1x1x32xf32> to vector<1x32xf32>
    %c0_127 = arith.constant 0 : index
    %c0_128 = arith.constant 0 : index
    %c0_129 = arith.constant 0 : index
    %281 = vector.load %arg19[%c0_127, %c0_128, %c0_129] : memref<2x1x32xf32, #tpu.memory_space<vmem>>, vector<1x1x32xf32>
    %282 = vector.shape_cast %281 : vector<1x1x32xf32> to vector<1x32xf32>
    %cst_130 = arith.constant dense<0.000000e+00> : vector<16xf32>
    %283 = vector.multi_reduction <add>, %278, %cst_130 [1] : vector<16x32xf32> to vector<16xf32>
    %284 = vector.shape_cast %283 : vector<16xf32> to vector<16x1xf32>
    %cst_131 = arith.constant 3.200000e+01 : f32
    %285 = vector.broadcast %cst_131 : f32 to vector<16x1xf32>
    %286 = arith.divf %284, %285 : vector<16x1xf32>
    %287 = vector.broadcast %286 : vector<16x1xf32> to vector<16x32xf32>
    %288 = arith.subf %278, %287 : vector<16x32xf32>
    %289 = arith.mulf %288, %288 : vector<16x32xf32>
    %cst_132 = arith.constant dense<0.000000e+00> : vector<16xf32>
    %290 = vector.multi_reduction <add>, %289, %cst_132 [1] : vector<16x32xf32> to vector<16xf32>
    %291 = vector.shape_cast %290 : vector<16xf32> to vector<16x1xf32>
    %cst_133 = arith.constant 3.200000e+01 : f32
    %292 = vector.broadcast %cst_133 : f32 to vector<16x1xf32>
    %293 = arith.divf %291, %292 : vector<16x1xf32>
    %294 = vector.broadcast %286 : vector<16x1xf32> to vector<16x32xf32>
    %295 = arith.subf %278, %294 : vector<16x32xf32>
    %cst_134 = arith.constant 9.99999974E-6 : f32
    %296 = vector.broadcast %cst_134 : f32 to vector<16x1xf32>
    %297 = arith.addf %293, %296 : vector<16x1xf32>
    %298 = math.rsqrt %297 : vector<16x1xf32>
    %299 = vector.broadcast %298 : vector<16x1xf32> to vector<16x32xf32>
    %300 = arith.mulf %295, %299 : vector<16x32xf32>
    %301 = vector.broadcast %280 : vector<1x32xf32> to vector<16x32xf32>
    %302 = arith.mulf %300, %301 : vector<16x32xf32>
    %303 = vector.broadcast %282 : vector<1x32xf32> to vector<16x32xf32>
    %304 = arith.addf %302, %303 : vector<16x32xf32>
    %c1 = arith.constant 1 : index
    %c0_135 = arith.constant 0 : index
    %c0_136 = arith.constant 0 : index
    %305 = vector.load %arg4[%c1, %c0_135, %c0_136] : memref<2x32x96xf32, #tpu.memory_space<vmem>>, vector<1x32x96xf32>
    %306 = vector.shape_cast %305 : vector<1x32x96xf32> to vector<32x96xf32>
    %cst_137 = arith.constant dense<0.000000e+00> : vector<16x96xf32>
    %307 = tpu.matmul %304, %306, %cst_137 {dimension_numbers = #tpu.dot_dimension_numbers<[1], [0], [0], [1], [0, 0, 1, 1], [], []>} : vector<16x32xf32>, vector<32x96xf32>, vector<16x96xf32> -> vector<16x96xf32>
    %c1_138 = arith.constant 1 : index
    %c0_139 = arith.constant 0 : index
    %c0_140 = arith.constant 0 : index
    %308 = vector.load %arg5[%c1_138, %c0_139, %c0_140] : memref<2x1x96xf32, #tpu.memory_space<vmem>>, vector<1x1x96xf32>
    %309 = vector.shape_cast %308 : vector<1x1x96xf32> to vector<1x96xf32>
    %310 = vector.broadcast %309 : vector<1x96xf32> to vector<16x96xf32>
    %311 = arith.addf %307, %310 : vector<16x96xf32>
    %312 = vector.extract_strided_slice %311 {offsets = [0, 0], sizes = [16, 32], strides = [1, 1]} : vector<16x96xf32> to vector<16x32xf32>
    %313 = vector.extract_strided_slice %311 {offsets = [0, 32], sizes = [16, 32], strides = [1, 1]} : vector<16x96xf32> to vector<16x32xf32>
    %314 = vector.extract_strided_slice %311 {offsets = [0, 64], sizes = [16, 32], strides = [1, 1]} : vector<16x96xf32> to vector<16x32xf32>
    %c1_141 = arith.constant 1 : index
    %c0_142 = arith.constant 0 : index
    %c0_143 = arith.constant 0 : index
    %315 = vector.load %arg6[%c1_141, %c0_142, %c0_143] : memref<2x32x32xf32, #tpu.memory_space<vmem>>, vector<1x32x32xf32>
    %316 = vector.shape_cast %315 : vector<1x32x32xf32> to vector<32x32xf32>
    %c1_144 = arith.constant 1 : index
    %c0_145 = arith.constant 0 : index
    %c0_146 = arith.constant 0 : index
    %317 = vector.load %arg7[%c1_144, %c0_145, %c0_146] : memref<2x1x32xf32, #tpu.memory_space<vmem>>, vector<1x1x32xf32>
    %318 = vector.shape_cast %317 : vector<1x1x32xf32> to vector<1x32xf32>
    %319 = vector.extract_strided_slice %312 {offsets = [0, 0], sizes = [16, 8], strides = [1, 1]} : vector<16x32xf32> to vector<16x8xf32>
    %320 = vector.extract_strided_slice %313 {offsets = [0, 0], sizes = [16, 8], strides = [1, 1]} : vector<16x32xf32> to vector<16x8xf32>
    %cst_147 = arith.constant dense<0.000000e+00> : vector<16x16xf32>
    %321 = tpu.matmul %319, %320, %cst_147 {dimension_numbers = #tpu.dot_dimension_numbers<[1], [1], [0], [0], [0, 0, 1, 0], [], []>} : vector<16x8xf32>, vector<16x8xf32>, vector<16x16xf32> -> vector<16x16xf32>
    %cst_148 = arith.constant 0.353553385 : f32
    %322 = vector.broadcast %cst_148 : f32 to vector<16x16xf32>
    %323 = arith.mulf %321, %322 : vector<16x16xf32>
    %324 = arith.addf %323, %0 : vector<16x16xf32>
    %cst_149 = arith.constant dense<0xFF800000> : vector<16xf32>
    %325 = vector.multi_reduction <maximumf>, %324, %cst_149 [1] : vector<16x16xf32> to vector<16xf32>
    %326 = vector.shape_cast %325 : vector<16xf32> to vector<16x1xf32>
    %327 = vector.broadcast %326 : vector<16x1xf32> to vector<16x16xf32>
    %328 = arith.subf %324, %327 : vector<16x16xf32>
    %329 = math.exp %328 : vector<16x16xf32>
    %cst_150 = arith.constant dense<0.000000e+00> : vector<16xf32>
    %330 = vector.multi_reduction <add>, %329, %cst_150 [1] : vector<16x16xf32> to vector<16xf32>
    %331 = vector.shape_cast %330 : vector<16xf32> to vector<16x1xf32>
    %332 = tpu.reciprocal %331 {approx = true} : vector<16x1xf32> -> vector<16x1xf32>
    %333 = vector.broadcast %332 : vector<16x1xf32> to vector<16x16xf32>
    %334 = arith.mulf %329, %333 : vector<16x16xf32>
    %335 = vector.extract_strided_slice %314 {offsets = [0, 0], sizes = [16, 8], strides = [1, 1]} : vector<16x32xf32> to vector<16x8xf32>
    %cst_151 = arith.constant dense<0.000000e+00> : vector<16x8xf32>
    %336 = tpu.matmul %334, %335, %cst_151 {dimension_numbers = #tpu.dot_dimension_numbers<[1], [0], [0], [1], [0, 0, 1, 1], [], []>} : vector<16x16xf32>, vector<16x8xf32>, vector<16x8xf32> -> vector<16x8xf32>
    %337 = vector.extract_strided_slice %316 {offsets = [0, 0], sizes = [8, 32], strides = [1, 1]} : vector<32x32xf32> to vector<8x32xf32>
    %cst_152 = arith.constant dense<0.000000e+00> : vector<16x32xf32>
    %338 = tpu.matmul %336, %337, %cst_152 {dimension_numbers = #tpu.dot_dimension_numbers<[1], [0], [0], [1], [0, 0, 1, 1], [], []>} : vector<16x8xf32>, vector<8x32xf32>, vector<16x32xf32> -> vector<16x32xf32>
    %339 = vector.extract_strided_slice %312 {offsets = [0, 8], sizes = [16, 8], strides = [1, 1]} : vector<16x32xf32> to vector<16x8xf32>
    %340 = vector.extract_strided_slice %313 {offsets = [0, 8], sizes = [16, 8], strides = [1, 1]} : vector<16x32xf32> to vector<16x8xf32>
    %cst_153 = arith.constant dense<0.000000e+00> : vector<16x16xf32>
    %341 = tpu.matmul %339, %340, %cst_153 {dimension_numbers = #tpu.dot_dimension_numbers<[1], [1], [0], [0], [0, 0, 1, 0], [], []>} : vector<16x8xf32>, vector<16x8xf32>, vector<16x16xf32> -> vector<16x16xf32>
    %cst_154 = arith.constant 0.353553385 : f32
    %342 = vector.broadcast %cst_154 : f32 to vector<16x16xf32>
    %343 = arith.mulf %341, %342 : vector<16x16xf32>
    %344 = arith.addf %343, %0 : vector<16x16xf32>
    %cst_155 = arith.constant dense<0xFF800000> : vector<16xf32>
    %345 = vector.multi_reduction <maximumf>, %344, %cst_155 [1] : vector<16x16xf32> to vector<16xf32>
    %346 = vector.shape_cast %345 : vector<16xf32> to vector<16x1xf32>
    %347 = vector.broadcast %346 : vector<16x1xf32> to vector<16x16xf32>
    %348 = arith.subf %344, %347 : vector<16x16xf32>
    %349 = math.exp %348 : vector<16x16xf32>
    %cst_156 = arith.constant dense<0.000000e+00> : vector<16xf32>
    %350 = vector.multi_reduction <add>, %349, %cst_156 [1] : vector<16x16xf32> to vector<16xf32>
    %351 = vector.shape_cast %350 : vector<16xf32> to vector<16x1xf32>
    %352 = tpu.reciprocal %351 {approx = true} : vector<16x1xf32> -> vector<16x1xf32>
    %353 = vector.broadcast %352 : vector<16x1xf32> to vector<16x16xf32>
    %354 = arith.mulf %349, %353 : vector<16x16xf32>
    %355 = vector.extract_strided_slice %314 {offsets = [0, 8], sizes = [16, 8], strides = [1, 1]} : vector<16x32xf32> to vector<16x8xf32>
    %cst_157 = arith.constant dense<0.000000e+00> : vector<16x8xf32>
    %356 = tpu.matmul %354, %355, %cst_157 {dimension_numbers = #tpu.dot_dimension_numbers<[1], [0], [0], [1], [0, 0, 1, 1], [], []>} : vector<16x16xf32>, vector<16x8xf32>, vector<16x8xf32> -> vector<16x8xf32>
    %357 = vector.extract_strided_slice %316 {offsets = [8, 0], sizes = [8, 32], strides = [1, 1]} : vector<32x32xf32> to vector<8x32xf32>
    %cst_158 = arith.constant dense<0.000000e+00> : vector<16x32xf32>
    %358 = tpu.matmul %356, %357, %cst_158 {dimension_numbers = #tpu.dot_dimension_numbers<[1], [0], [0], [1], [0, 0, 1, 1], [], []>} : vector<16x8xf32>, vector<8x32xf32>, vector<16x32xf32> -> vector<16x32xf32>
    %359 = arith.addf %338, %358 : vector<16x32xf32>
    %360 = vector.extract_strided_slice %312 {offsets = [0, 16], sizes = [16, 8], strides = [1, 1]} : vector<16x32xf32> to vector<16x8xf32>
    %361 = vector.extract_strided_slice %313 {offsets = [0, 16], sizes = [16, 8], strides = [1, 1]} : vector<16x32xf32> to vector<16x8xf32>
    %cst_159 = arith.constant dense<0.000000e+00> : vector<16x16xf32>
    %362 = tpu.matmul %360, %361, %cst_159 {dimension_numbers = #tpu.dot_dimension_numbers<[1], [1], [0], [0], [0, 0, 1, 0], [], []>} : vector<16x8xf32>, vector<16x8xf32>, vector<16x16xf32> -> vector<16x16xf32>
    %cst_160 = arith.constant 0.353553385 : f32
    %363 = vector.broadcast %cst_160 : f32 to vector<16x16xf32>
    %364 = arith.mulf %362, %363 : vector<16x16xf32>
    %365 = arith.addf %364, %0 : vector<16x16xf32>
    %cst_161 = arith.constant dense<0xFF800000> : vector<16xf32>
    %366 = vector.multi_reduction <maximumf>, %365, %cst_161 [1] : vector<16x16xf32> to vector<16xf32>
    %367 = vector.shape_cast %366 : vector<16xf32> to vector<16x1xf32>
    %368 = vector.broadcast %367 : vector<16x1xf32> to vector<16x16xf32>
    %369 = arith.subf %365, %368 : vector<16x16xf32>
    %370 = math.exp %369 : vector<16x16xf32>
    %cst_162 = arith.constant dense<0.000000e+00> : vector<16xf32>
    %371 = vector.multi_reduction <add>, %370, %cst_162 [1] : vector<16x16xf32> to vector<16xf32>
    %372 = vector.shape_cast %371 : vector<16xf32> to vector<16x1xf32>
    %373 = tpu.reciprocal %372 {approx = true} : vector<16x1xf32> -> vector<16x1xf32>
    %374 = vector.broadcast %373 : vector<16x1xf32> to vector<16x16xf32>
    %375 = arith.mulf %370, %374 : vector<16x16xf32>
    %376 = vector.extract_strided_slice %314 {offsets = [0, 16], sizes = [16, 8], strides = [1, 1]} : vector<16x32xf32> to vector<16x8xf32>
    %cst_163 = arith.constant dense<0.000000e+00> : vector<16x8xf32>
    %377 = tpu.matmul %375, %376, %cst_163 {dimension_numbers = #tpu.dot_dimension_numbers<[1], [0], [0], [1], [0, 0, 1, 1], [], []>} : vector<16x16xf32>, vector<16x8xf32>, vector<16x8xf32> -> vector<16x8xf32>
    %378 = vector.extract_strided_slice %316 {offsets = [16, 0], sizes = [8, 32], strides = [1, 1]} : vector<32x32xf32> to vector<8x32xf32>
    %cst_164 = arith.constant dense<0.000000e+00> : vector<16x32xf32>
    %379 = tpu.matmul %377, %378, %cst_164 {dimension_numbers = #tpu.dot_dimension_numbers<[1], [0], [0], [1], [0, 0, 1, 1], [], []>} : vector<16x8xf32>, vector<8x32xf32>, vector<16x32xf32> -> vector<16x32xf32>
    %380 = arith.addf %359, %379 : vector<16x32xf32>
    %381 = vector.extract_strided_slice %312 {offsets = [0, 24], sizes = [16, 8], strides = [1, 1]} : vector<16x32xf32> to vector<16x8xf32>
    %382 = vector.extract_strided_slice %313 {offsets = [0, 24], sizes = [16, 8], strides = [1, 1]} : vector<16x32xf32> to vector<16x8xf32>
    %cst_165 = arith.constant dense<0.000000e+00> : vector<16x16xf32>
    %383 = tpu.matmul %381, %382, %cst_165 {dimension_numbers = #tpu.dot_dimension_numbers<[1], [1], [0], [0], [0, 0, 1, 0], [], []>} : vector<16x8xf32>, vector<16x8xf32>, vector<16x16xf32> -> vector<16x16xf32>
    %cst_166 = arith.constant 0.353553385 : f32
    %384 = vector.broadcast %cst_166 : f32 to vector<16x16xf32>
    %385 = arith.mulf %383, %384 : vector<16x16xf32>
    %386 = arith.addf %385, %0 : vector<16x16xf32>
    %cst_167 = arith.constant dense<0xFF800000> : vector<16xf32>
    %387 = vector.multi_reduction <maximumf>, %386, %cst_167 [1] : vector<16x16xf32> to vector<16xf32>
    %388 = vector.shape_cast %387 : vector<16xf32> to vector<16x1xf32>
    %389 = vector.broadcast %388 : vector<16x1xf32> to vector<16x16xf32>
    %390 = arith.subf %386, %389 : vector<16x16xf32>
    %391 = math.exp %390 : vector<16x16xf32>
    %cst_168 = arith.constant dense<0.000000e+00> : vector<16xf32>
    %392 = vector.multi_reduction <add>, %391, %cst_168 [1] : vector<16x16xf32> to vector<16xf32>
    %393 = vector.shape_cast %392 : vector<16xf32> to vector<16x1xf32>
    %394 = tpu.reciprocal %393 {approx = true} : vector<16x1xf32> -> vector<16x1xf32>
    %395 = vector.broadcast %394 : vector<16x1xf32> to vector<16x16xf32>
    %396 = arith.mulf %391, %395 : vector<16x16xf32>
    %397 = vector.extract_strided_slice %314 {offsets = [0, 24], sizes = [16, 8], strides = [1, 1]} : vector<16x32xf32> to vector<16x8xf32>
    %cst_169 = arith.constant dense<0.000000e+00> : vector<16x8xf32>
    %398 = tpu.matmul %396, %397, %cst_169 {dimension_numbers = #tpu.dot_dimension_numbers<[1], [0], [0], [1], [0, 0, 1, 1], [], []>} : vector<16x16xf32>, vector<16x8xf32>, vector<16x8xf32> -> vector<16x8xf32>
    %399 = vector.extract_strided_slice %316 {offsets = [24, 0], sizes = [8, 32], strides = [1, 1]} : vector<32x32xf32> to vector<8x32xf32>
    %cst_170 = arith.constant dense<0.000000e+00> : vector<16x32xf32>
    %400 = tpu.matmul %398, %399, %cst_170 {dimension_numbers = #tpu.dot_dimension_numbers<[1], [0], [0], [1], [0, 0, 1, 1], [], []>} : vector<16x8xf32>, vector<8x32xf32>, vector<16x32xf32> -> vector<16x32xf32>
    %401 = arith.addf %380, %400 : vector<16x32xf32>
    %402 = vector.broadcast %318 : vector<1x32xf32> to vector<16x32xf32>
    %403 = arith.addf %401, %402 : vector<16x32xf32>
    %404 = arith.addf %304, %403 : vector<16x32xf32>
    %c1_171 = arith.constant 1 : index
    %c0_172 = arith.constant 0 : index
    %c0_173 = arith.constant 0 : index
    %405 = vector.load %arg14[%c1_171, %c0_172, %c0_173] : memref<2x1x32xf32, #tpu.memory_space<vmem>>, vector<1x1x32xf32>
    %406 = vector.shape_cast %405 : vector<1x1x32xf32> to vector<1x32xf32>
    %c1_174 = arith.constant 1 : index
    %c0_175 = arith.constant 0 : index
    %c0_176 = arith.constant 0 : index
    %407 = vector.load %arg15[%c1_174, %c0_175, %c0_176] : memref<2x1x32xf32, #tpu.memory_space<vmem>>, vector<1x1x32xf32>
    %408 = vector.shape_cast %407 : vector<1x1x32xf32> to vector<1x32xf32>
    %cst_177 = arith.constant dense<0.000000e+00> : vector<16xf32>
    %409 = vector.multi_reduction <add>, %404, %cst_177 [1] : vector<16x32xf32> to vector<16xf32>
    %410 = vector.shape_cast %409 : vector<16xf32> to vector<16x1xf32>
    %cst_178 = arith.constant 3.200000e+01 : f32
    %411 = vector.broadcast %cst_178 : f32 to vector<16x1xf32>
    %412 = arith.divf %410, %411 : vector<16x1xf32>
    %413 = vector.broadcast %412 : vector<16x1xf32> to vector<16x32xf32>
    %414 = arith.subf %404, %413 : vector<16x32xf32>
    %415 = arith.mulf %414, %414 : vector<16x32xf32>
    %cst_179 = arith.constant dense<0.000000e+00> : vector<16xf32>
    %416 = vector.multi_reduction <add>, %415, %cst_179 [1] : vector<16x32xf32> to vector<16xf32>
    %417 = vector.shape_cast %416 : vector<16xf32> to vector<16x1xf32>
    %cst_180 = arith.constant 3.200000e+01 : f32
    %418 = vector.broadcast %cst_180 : f32 to vector<16x1xf32>
    %419 = arith.divf %417, %418 : vector<16x1xf32>
    %420 = vector.broadcast %412 : vector<16x1xf32> to vector<16x32xf32>
    %421 = arith.subf %404, %420 : vector<16x32xf32>
    %cst_181 = arith.constant 9.99999974E-6 : f32
    %422 = vector.broadcast %cst_181 : f32 to vector<16x1xf32>
    %423 = arith.addf %419, %422 : vector<16x1xf32>
    %424 = math.rsqrt %423 : vector<16x1xf32>
    %425 = vector.broadcast %424 : vector<16x1xf32> to vector<16x32xf32>
    %426 = arith.mulf %421, %425 : vector<16x32xf32>
    %427 = vector.broadcast %406 : vector<1x32xf32> to vector<16x32xf32>
    %428 = arith.mulf %426, %427 : vector<16x32xf32>
    %429 = vector.broadcast %408 : vector<1x32xf32> to vector<16x32xf32>
    %430 = arith.addf %428, %429 : vector<16x32xf32>
    %c1_182 = arith.constant 1 : index
    %c0_183 = arith.constant 0 : index
    %c0_184 = arith.constant 0 : index
    %431 = vector.load %arg8[%c1_182, %c0_183, %c0_184] : memref<2x32x32xf32, #tpu.memory_space<vmem>>, vector<1x32x32xf32>
    %432 = vector.shape_cast %431 : vector<1x32x32xf32> to vector<32x32xf32>
    %cst_185 = arith.constant dense<0.000000e+00> : vector<16x32xf32>
    %433 = tpu.matmul %430, %432, %cst_185 {dimension_numbers = #tpu.dot_dimension_numbers<[1], [0], [0], [1], [0, 0, 1, 1], [], []>} : vector<16x32xf32>, vector<32x32xf32>, vector<16x32xf32> -> vector<16x32xf32>
    %c1_186 = arith.constant 1 : index
    %c0_187 = arith.constant 0 : index
    %c0_188 = arith.constant 0 : index
    %434 = vector.load %arg9[%c1_186, %c0_187, %c0_188] : memref<2x1x32xf32, #tpu.memory_space<vmem>>, vector<1x1x32xf32>
    %435 = vector.shape_cast %434 : vector<1x1x32xf32> to vector<1x32xf32>
    %436 = vector.broadcast %435 : vector<1x32xf32> to vector<16x32xf32>
    %437 = arith.addf %433, %436 : vector<16x32xf32>
    %c1_189 = arith.constant 1 : index
    %c0_190 = arith.constant 0 : index
    %c0_191 = arith.constant 0 : index
    %438 = vector.load %arg10[%c1_189, %c0_190, %c0_191] : memref<2x32x64xf32, #tpu.memory_space<vmem>>, vector<1x32x64xf32>
    %439 = vector.shape_cast %438 : vector<1x32x64xf32> to vector<32x64xf32>
    %cst_192 = arith.constant dense<0.000000e+00> : vector<16x64xf32>
    %440 = tpu.matmul %3, %439, %cst_192 {dimension_numbers = #tpu.dot_dimension_numbers<[1], [0], [0], [1], [0, 0, 1, 1], [], []>} : vector<16x32xf32>, vector<32x64xf32>, vector<16x64xf32> -> vector<16x64xf32>
    %c1_193 = arith.constant 1 : index
    %c0_194 = arith.constant 0 : index
    %c0_195 = arith.constant 0 : index
    %441 = vector.load %arg11[%c1_193, %c0_194, %c0_195] : memref<2x1x64xf32, #tpu.memory_space<vmem>>, vector<1x1x64xf32>
    %442 = vector.shape_cast %441 : vector<1x1x64xf32> to vector<1x64xf32>
    %443 = vector.broadcast %442 : vector<1x64xf32> to vector<16x64xf32>
    %444 = arith.addf %440, %443 : vector<16x64xf32>
    %445 = vector.extract_strided_slice %444 {offsets = [0, 0], sizes = [16, 32], strides = [1, 1]} : vector<16x64xf32> to vector<16x32xf32>
    %446 = vector.extract_strided_slice %444 {offsets = [0, 32], sizes = [16, 32], strides = [1, 1]} : vector<16x64xf32> to vector<16x32xf32>
    %c1_196 = arith.constant 1 : index
    %c0_197 = arith.constant 0 : index
    %c0_198 = arith.constant 0 : index
    %447 = vector.load %arg12[%c1_196, %c0_197, %c0_198] : memref<2x32x32xf32, #tpu.memory_space<vmem>>, vector<1x32x32xf32>
    %448 = vector.shape_cast %447 : vector<1x32x32xf32> to vector<32x32xf32>
    %c1_199 = arith.constant 1 : index
    %c0_200 = arith.constant 0 : index
    %c0_201 = arith.constant 0 : index
    %449 = vector.load %arg13[%c1_199, %c0_200, %c0_201] : memref<2x1x32xf32, #tpu.memory_space<vmem>>, vector<1x1x32xf32>
    %450 = vector.shape_cast %449 : vector<1x1x32xf32> to vector<1x32xf32>
    %451 = vector.extract_strided_slice %437 {offsets = [0, 0], sizes = [16, 8], strides = [1, 1]} : vector<16x32xf32> to vector<16x8xf32>
    %452 = vector.extract_strided_slice %445 {offsets = [0, 0], sizes = [16, 8], strides = [1, 1]} : vector<16x32xf32> to vector<16x8xf32>
    %cst_202 = arith.constant dense<0.000000e+00> : vector<16x16xf32>
    %453 = tpu.matmul %451, %452, %cst_202 {dimension_numbers = #tpu.dot_dimension_numbers<[1], [1], [0], [0], [0, 0, 1, 0], [], []>} : vector<16x8xf32>, vector<16x8xf32>, vector<16x16xf32> -> vector<16x16xf32>
    %cst_203 = arith.constant 0.353553385 : f32
    %454 = vector.broadcast %cst_203 : f32 to vector<16x16xf32>
    %455 = arith.mulf %453, %454 : vector<16x16xf32>
    %456 = arith.addf %455, %1 : vector<16x16xf32>
    %cst_204 = arith.constant dense<0xFF800000> : vector<16xf32>
    %457 = vector.multi_reduction <maximumf>, %456, %cst_204 [1] : vector<16x16xf32> to vector<16xf32>
    %458 = vector.shape_cast %457 : vector<16xf32> to vector<16x1xf32>
    %459 = vector.broadcast %458 : vector<16x1xf32> to vector<16x16xf32>
    %460 = arith.subf %456, %459 : vector<16x16xf32>
    %461 = math.exp %460 : vector<16x16xf32>
    %cst_205 = arith.constant dense<0.000000e+00> : vector<16xf32>
    %462 = vector.multi_reduction <add>, %461, %cst_205 [1] : vector<16x16xf32> to vector<16xf32>
    %463 = vector.shape_cast %462 : vector<16xf32> to vector<16x1xf32>
    %464 = tpu.reciprocal %463 {approx = true} : vector<16x1xf32> -> vector<16x1xf32>
    %465 = vector.broadcast %464 : vector<16x1xf32> to vector<16x16xf32>
    %466 = arith.mulf %461, %465 : vector<16x16xf32>
    %467 = vector.extract_strided_slice %446 {offsets = [0, 0], sizes = [16, 8], strides = [1, 1]} : vector<16x32xf32> to vector<16x8xf32>
    %cst_206 = arith.constant dense<0.000000e+00> : vector<16x8xf32>
    %468 = tpu.matmul %466, %467, %cst_206 {dimension_numbers = #tpu.dot_dimension_numbers<[1], [0], [0], [1], [0, 0, 1, 1], [], []>} : vector<16x16xf32>, vector<16x8xf32>, vector<16x8xf32> -> vector<16x8xf32>
    %469 = vector.extract_strided_slice %448 {offsets = [0, 0], sizes = [8, 32], strides = [1, 1]} : vector<32x32xf32> to vector<8x32xf32>
    %cst_207 = arith.constant dense<0.000000e+00> : vector<16x32xf32>
    %470 = tpu.matmul %468, %469, %cst_207 {dimension_numbers = #tpu.dot_dimension_numbers<[1], [0], [0], [1], [0, 0, 1, 1], [], []>} : vector<16x8xf32>, vector<8x32xf32>, vector<16x32xf32> -> vector<16x32xf32>
    %471 = vector.extract_strided_slice %437 {offsets = [0, 8], sizes = [16, 8], strides = [1, 1]} : vector<16x32xf32> to vector<16x8xf32>
    %472 = vector.extract_strided_slice %445 {offsets = [0, 8], sizes = [16, 8], strides = [1, 1]} : vector<16x32xf32> to vector<16x8xf32>
    %cst_208 = arith.constant dense<0.000000e+00> : vector<16x16xf32>
    %473 = tpu.matmul %471, %472, %cst_208 {dimension_numbers = #tpu.dot_dimension_numbers<[1], [1], [0], [0], [0, 0, 1, 0], [], []>} : vector<16x8xf32>, vector<16x8xf32>, vector<16x16xf32> -> vector<16x16xf32>
    %cst_209 = arith.constant 0.353553385 : f32
    %474 = vector.broadcast %cst_209 : f32 to vector<16x16xf32>
    %475 = arith.mulf %473, %474 : vector<16x16xf32>
    %476 = arith.addf %475, %1 : vector<16x16xf32>
    %cst_210 = arith.constant dense<0xFF800000> : vector<16xf32>
    %477 = vector.multi_reduction <maximumf>, %476, %cst_210 [1] : vector<16x16xf32> to vector<16xf32>
    %478 = vector.shape_cast %477 : vector<16xf32> to vector<16x1xf32>
    %479 = vector.broadcast %478 : vector<16x1xf32> to vector<16x16xf32>
    %480 = arith.subf %476, %479 : vector<16x16xf32>
    %481 = math.exp %480 : vector<16x16xf32>
    %cst_211 = arith.constant dense<0.000000e+00> : vector<16xf32>
    %482 = vector.multi_reduction <add>, %481, %cst_211 [1] : vector<16x16xf32> to vector<16xf32>
    %483 = vector.shape_cast %482 : vector<16xf32> to vector<16x1xf32>
    %484 = tpu.reciprocal %483 {approx = true} : vector<16x1xf32> -> vector<16x1xf32>
    %485 = vector.broadcast %484 : vector<16x1xf32> to vector<16x16xf32>
    %486 = arith.mulf %481, %485 : vector<16x16xf32>
    %487 = vector.extract_strided_slice %446 {offsets = [0, 8], sizes = [16, 8], strides = [1, 1]} : vector<16x32xf32> to vector<16x8xf32>
    %cst_212 = arith.constant dense<0.000000e+00> : vector<16x8xf32>
    %488 = tpu.matmul %486, %487, %cst_212 {dimension_numbers = #tpu.dot_dimension_numbers<[1], [0], [0], [1], [0, 0, 1, 1], [], []>} : vector<16x16xf32>, vector<16x8xf32>, vector<16x8xf32> -> vector<16x8xf32>
    %489 = vector.extract_strided_slice %448 {offsets = [8, 0], sizes = [8, 32], strides = [1, 1]} : vector<32x32xf32> to vector<8x32xf32>
    %cst_213 = arith.constant dense<0.000000e+00> : vector<16x32xf32>
    %490 = tpu.matmul %488, %489, %cst_213 {dimension_numbers = #tpu.dot_dimension_numbers<[1], [0], [0], [1], [0, 0, 1, 1], [], []>} : vector<16x8xf32>, vector<8x32xf32>, vector<16x32xf32> -> vector<16x32xf32>
    %491 = arith.addf %470, %490 : vector<16x32xf32>
    %492 = vector.extract_strided_slice %437 {offsets = [0, 16], sizes = [16, 8], strides = [1, 1]} : vector<16x32xf32> to vector<16x8xf32>
    %493 = vector.extract_strided_slice %445 {offsets = [0, 16], sizes = [16, 8], strides = [1, 1]} : vector<16x32xf32> to vector<16x8xf32>
    %cst_214 = arith.constant dense<0.000000e+00> : vector<16x16xf32>
    %494 = tpu.matmul %492, %493, %cst_214 {dimension_numbers = #tpu.dot_dimension_numbers<[1], [1], [0], [0], [0, 0, 1, 0], [], []>} : vector<16x8xf32>, vector<16x8xf32>, vector<16x16xf32> -> vector<16x16xf32>
    %cst_215 = arith.constant 0.353553385 : f32
    %495 = vector.broadcast %cst_215 : f32 to vector<16x16xf32>
    %496 = arith.mulf %494, %495 : vector<16x16xf32>
    %497 = arith.addf %496, %1 : vector<16x16xf32>
    %cst_216 = arith.constant dense<0xFF800000> : vector<16xf32>
    %498 = vector.multi_reduction <maximumf>, %497, %cst_216 [1] : vector<16x16xf32> to vector<16xf32>
    %499 = vector.shape_cast %498 : vector<16xf32> to vector<16x1xf32>
    %500 = vector.broadcast %499 : vector<16x1xf32> to vector<16x16xf32>
    %501 = arith.subf %497, %500 : vector<16x16xf32>
    %502 = math.exp %501 : vector<16x16xf32>
    %cst_217 = arith.constant dense<0.000000e+00> : vector<16xf32>
    %503 = vector.multi_reduction <add>, %502, %cst_217 [1] : vector<16x16xf32> to vector<16xf32>
    %504 = vector.shape_cast %503 : vector<16xf32> to vector<16x1xf32>
    %505 = tpu.reciprocal %504 {approx = true} : vector<16x1xf32> -> vector<16x1xf32>
    %506 = vector.broadcast %505 : vector<16x1xf32> to vector<16x16xf32>
    %507 = arith.mulf %502, %506 : vector<16x16xf32>
    %508 = vector.extract_strided_slice %446 {offsets = [0, 16], sizes = [16, 8], strides = [1, 1]} : vector<16x32xf32> to vector<16x8xf32>
    %cst_218 = arith.constant dense<0.000000e+00> : vector<16x8xf32>
    %509 = tpu.matmul %507, %508, %cst_218 {dimension_numbers = #tpu.dot_dimension_numbers<[1], [0], [0], [1], [0, 0, 1, 1], [], []>} : vector<16x16xf32>, vector<16x8xf32>, vector<16x8xf32> -> vector<16x8xf32>
    %510 = vector.extract_strided_slice %448 {offsets = [16, 0], sizes = [8, 32], strides = [1, 1]} : vector<32x32xf32> to vector<8x32xf32>
    %cst_219 = arith.constant dense<0.000000e+00> : vector<16x32xf32>
    %511 = tpu.matmul %509, %510, %cst_219 {dimension_numbers = #tpu.dot_dimension_numbers<[1], [0], [0], [1], [0, 0, 1, 1], [], []>} : vector<16x8xf32>, vector<8x32xf32>, vector<16x32xf32> -> vector<16x32xf32>
    %512 = arith.addf %491, %511 : vector<16x32xf32>
    %513 = vector.extract_strided_slice %437 {offsets = [0, 24], sizes = [16, 8], strides = [1, 1]} : vector<16x32xf32> to vector<16x8xf32>
    %514 = vector.extract_strided_slice %445 {offsets = [0, 24], sizes = [16, 8], strides = [1, 1]} : vector<16x32xf32> to vector<16x8xf32>
    %cst_220 = arith.constant dense<0.000000e+00> : vector<16x16xf32>
    %515 = tpu.matmul %513, %514, %cst_220 {dimension_numbers = #tpu.dot_dimension_numbers<[1], [1], [0], [0], [0, 0, 1, 0], [], []>} : vector<16x8xf32>, vector<16x8xf32>, vector<16x16xf32> -> vector<16x16xf32>
    %cst_221 = arith.constant 0.353553385 : f32
    %516 = vector.broadcast %cst_221 : f32 to vector<16x16xf32>
    %517 = arith.mulf %515, %516 : vector<16x16xf32>
    %518 = arith.addf %517, %1 : vector<16x16xf32>
    %cst_222 = arith.constant dense<0xFF800000> : vector<16xf32>
    %519 = vector.multi_reduction <maximumf>, %518, %cst_222 [1] : vector<16x16xf32> to vector<16xf32>
    %520 = vector.shape_cast %519 : vector<16xf32> to vector<16x1xf32>
    %521 = vector.broadcast %520 : vector<16x1xf32> to vector<16x16xf32>
    %522 = arith.subf %518, %521 : vector<16x16xf32>
    %523 = math.exp %522 : vector<16x16xf32>
    %cst_223 = arith.constant dense<0.000000e+00> : vector<16xf32>
    %524 = vector.multi_reduction <add>, %523, %cst_223 [1] : vector<16x16xf32> to vector<16xf32>
    %525 = vector.shape_cast %524 : vector<16xf32> to vector<16x1xf32>
    %526 = tpu.reciprocal %525 {approx = true} : vector<16x1xf32> -> vector<16x1xf32>
    %527 = vector.broadcast %526 : vector<16x1xf32> to vector<16x16xf32>
    %528 = arith.mulf %523, %527 : vector<16x16xf32>
    %529 = vector.extract_strided_slice %446 {offsets = [0, 24], sizes = [16, 8], strides = [1, 1]} : vector<16x32xf32> to vector<16x8xf32>
    %cst_224 = arith.constant dense<0.000000e+00> : vector<16x8xf32>
    %530 = tpu.matmul %528, %529, %cst_224 {dimension_numbers = #tpu.dot_dimension_numbers<[1], [0], [0], [1], [0, 0, 1, 1], [], []>} : vector<16x16xf32>, vector<16x8xf32>, vector<16x8xf32> -> vector<16x8xf32>
    %531 = vector.extract_strided_slice %448 {offsets = [24, 0], sizes = [8, 32], strides = [1, 1]} : vector<32x32xf32> to vector<8x32xf32>
    %cst_225 = arith.constant dense<0.000000e+00> : vector<16x32xf32>
    %532 = tpu.matmul %530, %531, %cst_225 {dimension_numbers = #tpu.dot_dimension_numbers<[1], [0], [0], [1], [0, 0, 1, 1], [], []>} : vector<16x8xf32>, vector<8x32xf32>, vector<16x32xf32> -> vector<16x32xf32>
    %533 = arith.addf %512, %532 : vector<16x32xf32>
    %534 = vector.broadcast %450 : vector<1x32xf32> to vector<16x32xf32>
    %535 = arith.addf %533, %534 : vector<16x32xf32>
    %536 = arith.addf %430, %535 : vector<16x32xf32>
    %c1_226 = arith.constant 1 : index
    %c0_227 = arith.constant 0 : index
    %c0_228 = arith.constant 0 : index
    %537 = vector.load %arg16[%c1_226, %c0_227, %c0_228] : memref<2x1x32xf32, #tpu.memory_space<vmem>>, vector<1x1x32xf32>
    %538 = vector.shape_cast %537 : vector<1x1x32xf32> to vector<1x32xf32>
    %c1_229 = arith.constant 1 : index
    %c0_230 = arith.constant 0 : index
    %c0_231 = arith.constant 0 : index
    %539 = vector.load %arg17[%c1_229, %c0_230, %c0_231] : memref<2x1x32xf32, #tpu.memory_space<vmem>>, vector<1x1x32xf32>
    %540 = vector.shape_cast %539 : vector<1x1x32xf32> to vector<1x32xf32>
    %cst_232 = arith.constant dense<0.000000e+00> : vector<16xf32>
    %541 = vector.multi_reduction <add>, %536, %cst_232 [1] : vector<16x32xf32> to vector<16xf32>
    %542 = vector.shape_cast %541 : vector<16xf32> to vector<16x1xf32>
    %cst_233 = arith.constant 3.200000e+01 : f32
    %543 = vector.broadcast %cst_233 : f32 to vector<16x1xf32>
    %544 = arith.divf %542, %543 : vector<16x1xf32>
    %545 = vector.broadcast %544 : vector<16x1xf32> to vector<16x32xf32>
    %546 = arith.subf %536, %545 : vector<16x32xf32>
    %547 = arith.mulf %546, %546 : vector<16x32xf32>
    %cst_234 = arith.constant dense<0.000000e+00> : vector<16xf32>
    %548 = vector.multi_reduction <add>, %547, %cst_234 [1] : vector<16x32xf32> to vector<16xf32>
    %549 = vector.shape_cast %548 : vector<16xf32> to vector<16x1xf32>
    %cst_235 = arith.constant 3.200000e+01 : f32
    %550 = vector.broadcast %cst_235 : f32 to vector<16x1xf32>
    %551 = arith.divf %549, %550 : vector<16x1xf32>
    %552 = vector.broadcast %544 : vector<16x1xf32> to vector<16x32xf32>
    %553 = arith.subf %536, %552 : vector<16x32xf32>
    %cst_236 = arith.constant 9.99999974E-6 : f32
    %554 = vector.broadcast %cst_236 : f32 to vector<16x1xf32>
    %555 = arith.addf %551, %554 : vector<16x1xf32>
    %556 = math.rsqrt %555 : vector<16x1xf32>
    %557 = vector.broadcast %556 : vector<16x1xf32> to vector<16x32xf32>
    %558 = arith.mulf %553, %557 : vector<16x32xf32>
    %559 = vector.broadcast %538 : vector<1x32xf32> to vector<16x32xf32>
    %560 = arith.mulf %558, %559 : vector<16x32xf32>
    %561 = vector.broadcast %540 : vector<1x32xf32> to vector<16x32xf32>
    %562 = arith.addf %560, %561 : vector<16x32xf32>
    %c1_237 = arith.constant 1 : index
    %c0_238 = arith.constant 0 : index
    %c0_239 = arith.constant 0 : index
    %563 = vector.load %arg20[%c1_237, %c0_238, %c0_239] : memref<2x32x64xf32, #tpu.memory_space<vmem>>, vector<1x32x64xf32>
    %564 = vector.shape_cast %563 : vector<1x32x64xf32> to vector<32x64xf32>
    %cst_240 = arith.constant dense<0.000000e+00> : vector<16x64xf32>
    %565 = tpu.matmul %562, %564, %cst_240 {dimension_numbers = #tpu.dot_dimension_numbers<[1], [0], [0], [1], [0, 0, 1, 1], [], []>} : vector<16x32xf32>, vector<32x64xf32>, vector<16x64xf32> -> vector<16x64xf32>
    %c1_241 = arith.constant 1 : index
    %c0_242 = arith.constant 0 : index
    %c0_243 = arith.constant 0 : index
    %566 = vector.load %arg21[%c1_241, %c0_242, %c0_243] : memref<2x1x64xf32, #tpu.memory_space<vmem>>, vector<1x1x64xf32>
    %567 = vector.shape_cast %566 : vector<1x1x64xf32> to vector<1x64xf32>
    %568 = vector.broadcast %567 : vector<1x64xf32> to vector<16x64xf32>
    %569 = arith.addf %565, %568 : vector<16x64xf32>
    %cst_244 = arith.constant 0.000000e+00 : f32
    %570 = vector.broadcast %cst_244 : f32 to vector<16x64xf32>
    %571 = arith.maximumf %569, %570 : vector<16x64xf32>
    %c1_245 = arith.constant 1 : index
    %c0_246 = arith.constant 0 : index
    %c0_247 = arith.constant 0 : index
    %572 = vector.load %arg22[%c1_245, %c0_246, %c0_247] : memref<2x64x32xf32, #tpu.memory_space<vmem>>, vector<1x64x32xf32>
    %573 = vector.shape_cast %572 : vector<1x64x32xf32> to vector<64x32xf32>
    %cst_248 = arith.constant dense<0.000000e+00> : vector<16x32xf32>
    %574 = tpu.matmul %571, %573, %cst_248 {dimension_numbers = #tpu.dot_dimension_numbers<[1], [0], [0], [1], [0, 0, 1, 1], [], []>} : vector<16x64xf32>, vector<64x32xf32>, vector<16x32xf32> -> vector<16x32xf32>
    %c1_249 = arith.constant 1 : index
    %c0_250 = arith.constant 0 : index
    %c0_251 = arith.constant 0 : index
    %575 = vector.load %arg23[%c1_249, %c0_250, %c0_251] : memref<2x1x32xf32, #tpu.memory_space<vmem>>, vector<1x1x32xf32>
    %576 = vector.shape_cast %575 : vector<1x1x32xf32> to vector<1x32xf32>
    %577 = vector.broadcast %576 : vector<1x32xf32> to vector<16x32xf32>
    %578 = arith.addf %574, %577 : vector<16x32xf32>
    %579 = arith.addf %562, %578 : vector<16x32xf32>
    %c1_252 = arith.constant 1 : index
    %c0_253 = arith.constant 0 : index
    %c0_254 = arith.constant 0 : index
    %580 = vector.load %arg18[%c1_252, %c0_253, %c0_254] : memref<2x1x32xf32, #tpu.memory_space<vmem>>, vector<1x1x32xf32>
    %581 = vector.shape_cast %580 : vector<1x1x32xf32> to vector<1x32xf32>
    %c1_255 = arith.constant 1 : index
    %c0_256 = arith.constant 0 : index
    %c0_257 = arith.constant 0 : index
    %582 = vector.load %arg19[%c1_255, %c0_256, %c0_257] : memref<2x1x32xf32, #tpu.memory_space<vmem>>, vector<1x1x32xf32>
    %583 = vector.shape_cast %582 : vector<1x1x32xf32> to vector<1x32xf32>
    %cst_258 = arith.constant dense<0.000000e+00> : vector<16xf32>
    %584 = vector.multi_reduction <add>, %579, %cst_258 [1] : vector<16x32xf32> to vector<16xf32>
    %585 = vector.shape_cast %584 : vector<16xf32> to vector<16x1xf32>
    %cst_259 = arith.constant 3.200000e+01 : f32
    %586 = vector.broadcast %cst_259 : f32 to vector<16x1xf32>
    %587 = arith.divf %585, %586 : vector<16x1xf32>
    %588 = vector.broadcast %587 : vector<16x1xf32> to vector<16x32xf32>
    %589 = arith.subf %579, %588 : vector<16x32xf32>
    %590 = arith.mulf %589, %589 : vector<16x32xf32>
    %cst_260 = arith.constant dense<0.000000e+00> : vector<16xf32>
    %591 = vector.multi_reduction <add>, %590, %cst_260 [1] : vector<16x32xf32> to vector<16xf32>
    %592 = vector.shape_cast %591 : vector<16xf32> to vector<16x1xf32>
    %cst_261 = arith.constant 3.200000e+01 : f32
    %593 = vector.broadcast %cst_261 : f32 to vector<16x1xf32>
    %594 = arith.divf %592, %593 : vector<16x1xf32>
    %595 = vector.broadcast %587 : vector<16x1xf32> to vector<16x32xf32>
    %596 = arith.subf %579, %595 : vector<16x32xf32>
    %cst_262 = arith.constant 9.99999974E-6 : f32
    %597 = vector.broadcast %cst_262 : f32 to vector<16x1xf32>
    %598 = arith.addf %594, %597 : vector<16x1xf32>
    %599 = math.rsqrt %598 : vector<16x1xf32>
    %600 = vector.broadcast %599 : vector<16x1xf32> to vector<16x32xf32>
    %601 = arith.mulf %596, %600 : vector<16x32xf32>
    %602 = vector.broadcast %581 : vector<1x32xf32> to vector<16x32xf32>
    %603 = arith.mulf %601, %602 : vector<16x32xf32>
    %604 = vector.broadcast %583 : vector<1x32xf32> to vector<16x32xf32>
    %605 = arith.addf %603, %604 : vector<16x32xf32>
    %c0_263 = arith.constant 0 : index
    %c0_264 = arith.constant 0 : index
    %606 = vector.load %arg24[%c0_263, %c0_264] : memref<16x32xf32, #tpu.memory_space<vmem>>, vector<16x32xf32>
    tpu.vector_store %arg24[%c0_263, %c0_264], %605 {strides = array<i32>} : memref<16x32xf32, #tpu.memory_space<vmem>>, vector<16x32xf32>,
    return
  }
}

</mosaic_0001>

<bundles_post_ra>
// kernel: tpu_custom_call.1
= control target key start
LH: loop header
LB: loop body
LE: loop exit
PB: predicated region body
PF: predicated region fallthrough
CT: control target
= control target key end

     0   :  { %s8852_s0 = inlined_call_operand.hbm [shape: f32[16,32], index: 0, kind: input, shape index: {}]   ;;  %s8853_s1 = inlined_call_operand.hbm [shape: f32[16,32], index: 1, kind: input, shape index: {}]   ;;  %s8854_s2 = inlined_call_operand.hbm [shape: f32[16,16], index: 2, kind: input, shape index: {}]   ;;  %s8855_s3 = inlined_call_operand.hbm [shape: f32[16,16], index: 3, kind: input, shape index: {}]   ;;  %s8856_s4 = inlined_call_operand.vmem [shape: f32[2,32,96], index: 4, kind: input, shape index: {}]   ;;  %s8857_s5 = inlined_call_operand.vmem [shape: f32[2,1,96], index: 5, kind: input, shape index: {}]   ;;  %s8858_s6 = inlined_call_operand.vmem [shape: f32[2,32,32], index: 6, kind: input, shape index: {}]   ;;  %s8859_s7 = inlined_call_operand.vmem [shape: f32[2,1,32], index: 7, kind: input, shape index: {}]   ;;  %s8860_s8 = inlined_call_operand.vmem [shape: f32[2,32,32], index: 8, kind: input, shape index: {}]   ;;  %s8861_s9 = inlined_call_operand.vmem [shape: f32[2,1,32], index: 9, kind: input, shape index: {}]   ;;  %s8862_s10 = inlined_call_operand.hbm [shape: f32[2,32,64], index: 10, kind: input, shape index: {}]   ;;  %s8863_s11 = inlined_call_operand.vmem [shape: f32[2,1,64], index: 11, kind: input, shape index: {}]   ;;  %s8864_s12 = inlined_call_operand.hbm [shape: f32[2,32,32], index: 12, kind: input, shape index: {}]   ;;  %s8865_s13 = inlined_call_operand.vmem [shape: f32[2,1,32], index: 13, kind: input, shape index: {}]   ;;  %s8866_s14 = inlined_call_operand.vmem [shape: f32[2,1,32], index: 14, kind: input, shape index: {}]   ;;  %s8867_s15 = inlined_call_operand.vmem [shape: f32[2,1,32], index: 15, kind: input, shape index: {}]   ;;  %s8868_s16 = inlined_call_operand.vmem [shape: f32[2,1,32], index: 16, kind: input, shape index: {}]   ;;  %s8869_s17 = inlined_call_operand.vmem [shape: f32[2,1,32], index: 17, kind: input, shape index: {}]   ;;  %s8870_s18 = inlined_call_operand.hbm [shape: f32[2,1,32], index: 18, kind: input, shape index: {}]   ;;  %s8871_s19 = inlined_call_operand.hbm [shape: f32[2,1,32], index: 19, kind: input, shape index: {}]   ;;  %s8872_s20 = inlined_call_operand.hbm [shape: f32[2,32,64], index: 20, kind: input, shape index: {}]   ;;  %s8873_s21 = inlined_call_operand.hbm [shape: f32[2,1,64], index: 21, kind: input, shape index: {}]   ;;  %s8874_s22 = inlined_call_operand.vmem [shape: f32[2,64,32], index: 22, kind: input, shape index: {}]   ;;  %s8875_s23 = inlined_call_operand.vmem [shape: f32[2,1,32], index: 23, kind: input, shape index: {}]   ;;  %s8876_s24 = inlined_call_operand.hbm [shape: f32[16,32], index: 24, kind: output, shape index: {}]  }
   0x1   :  { %8898 = sst [smem:[#allocation27_spill]] %s8852_s0 }
   0x2   :  { %8899 = sst [smem:[#allocation28_spill]] %s8853_s1 }
   0x3   :  { %8900 = sst [smem:[#allocation29_spill]] %s8854_s2 }
   0x4   :  { %8901 = sst [smem:[#allocation30_spill]] %s8855_s3 }
   0x5   :  { %8902 = sst [smem:[#allocation31_spill]] %s8856_s4 }
   0x6   :  { %8903 = sst [smem:[#allocation32_spill]] %s8857_s5 }
   0x7   :  { %8904 = sst [smem:[#allocation33_spill]] %s8858_s6 }
   0x8   :  { %8905 = sst [smem:[#allocation34_spill]] %s8859_s7 }
   0x9   :  { %8906 = sst [smem:[#allocation35_spill]] %s8860_s8 }
   0xa   :  { %8907 = sst [smem:[#allocation36_spill]] %s8876_s24 }
   0xb   :  { %29 = vsyncpa [#allocation3], 0 }
   0xc   :  { %30 = vsyncpa [#allocation6], 0 }
   0xd   :  { %31 = vsyncpa [#allocation9], 0 }
   0xe   :  { %32 = vsyncpa [#allocation12], 0 }
   0xf   :  { %33 = vsyncpa [#allocation15], 0 }
  0x10   :  { %34 = vsyncpa [#allocation18], 0 }
  0x11   :  { %35 = vsyncpa [#allocation4], 0  ;;  %s7837_s5 = smov [#allocation5]   ;;  %s7838_s27 = smov [#allocation8]  }
  0x12   :  { %s53_s26 = sshll.u32 %s7837_s5, 4  ;;  %s77_s28 = sshll.u32 %s7838_s27, 4  ;;  %s54_s26 = int_to_ptr.vmem [resolvable:$true] %s53_s26  ;;  %s7988_s28 = int_to_ptr.vmem [resolvable:$true] %s77_s28 }
  0x13   :  { %s8908_s29 = sld [smem:[#allocation28_spill]] }
  0x19   :  { %s7581_s0 = scalar_lea.hbm %s8908_s29, 256 }
  0x1a   :  { %p7582_p0 = scmp.ne.s32.totalorder %s8908_s29, %s7581_s0  ;;  %p7585_p1 = scmp.lt.u32.totalorder %s7581_s0, %s8908_s29 }
  0x1c   :  { %p7587_p2 = pnand %p7585_p1, %p7582_p0 }
  0x1e   :  { %7590 = shalt.err (!%p7587_p2)
}
  0x1f   :  { %s7591_s8 = scalar_lea.vmem %s54_s26, 256  ;;  %p7596_p4 = scmp.lt.s32.totalorder %s54_s26, %s54_s26 }
  0x20   :  { %p7592_p3 = scmp.ne.s32.totalorder %s54_s26, %s7591_s8  ;;  %p7597_p5 = scmp.lt.s32.totalorder %s7591_s8, %s7591_s8 }
  0x22   :  { %p7598_p6 = por %p7597_p5, %p7596_p4 }
  0x24   :  { %p7599_p7 = pnand %p7598_p6, %p7592_p3 }
  0x26   :  { %7602 = shalt.err (!%p7599_p7)
}
  0x27   :  { %s8891_s4 = smov 128   ;;  %s8892_s1 = smov 8  }
  0x28   :  { %59 = dma.hbm_to_vmem [thread:$0]  %s8908_s29, 256, %s54_s26, [#allocation6], %s8891_s4, %s8891_s4, %s8892_s1  }
  0x29   :  { %s8909_s0 = sld [smem:[#allocation30_spill]] }
  0x2f   :  { %s7603_s7 = scalar_lea.hbm %s8909_s0, 256 }
  0x30   :  { %p7604_p8 = scmp.ne.s32.totalorder %s8909_s0, %s7603_s7  ;;  %p7607_p9 = scmp.lt.u32.totalorder %s7603_s7, %s8909_s0 }
  0x32   :  { %p7609_p10 = pnand %p7607_p9, %p7604_p8 }
  0x34   :  { %7612 = shalt.err (!%p7609_p10)
}
  0x35   :  { %s7613_s24 = scalar_lea.vmem %s7988_s28, 256  ;;  %p7618_p12 = scmp.lt.s32.totalorder %s7988_s28, %s7988_s28 }
  0x36   :  { %p7614_p11 = scmp.ne.s32.totalorder %s7988_s28, %s7613_s24  ;;  %p7619_p13 = scmp.lt.s32.totalorder %s7613_s24, %s7613_s24 }
  0x38   :  { %p7620_p0 = por %p7619_p13, %p7618_p12 }
  0x3a   :  { %p7621_p1 = pnand %p7620_p0, %p7614_p11 }
  0x3c   :  { %7624 = shalt.err (!%p7621_p1)
}
  0x3d   :  { %83 = dma.hbm_to_vmem [thread:$0]  %s8909_s0, 256, %s7988_s28, [#allocation9], %s8891_s4, %s8891_s4, %s8892_s1  }
  0x3e   :  { %s7841_s5 = smov [#allocation11]   ;;  %s7625_s7 = scalar_lea.hbm %s8864_s12, 1024 }
  0x3f   :  { %s115_s27 = sshll.u32 %s7841_s5, 4  ;;  %p7626_p2 = scmp.ne.s32.totalorder %s8864_s12, %s7625_s7  ;;  %s116_s27 = int_to_ptr.vmem [resolvable:$true] %s115_s27 }
  0x40   :  { %p7629_p3 = scmp.lt.u32.totalorder %s7625_s7, %s8864_s12 }
  0x42   :  { %p7631_p4 = pnand %p7629_p3, %p7626_p2 }
  0x44   :  { %7634 = shalt.err (!%p7631_p4)
}
  0x45   :  { %s7635_s8 = scalar_lea.vmem %s116_s27, 1024  ;;  %p7640_p6 = scmp.lt.s32.totalorder %s116_s27, %s116_s27 }
  0x46   :  { %p7636_p5 = scmp.ne.s32.totalorder %s116_s27, %s7635_s8  ;;  %p7641_p7 = scmp.lt.s32.totalorder %s7635_s8, %s7635_s8 }
  0x48   :  { %p7642_p8 = por %p7641_p7, %p7640_p6 }
  0x4a   :  { %p7643_p9 = pnand %p7642_p8, %p7636_p5 }
  0x4c   :  { %7646 = shalt.err (!%p7643_p9)
}
  0x4d   :  { %121 = dma.hbm_to_vmem [thread:$0]  %s8864_s12, 1024, %s116_s27, [#allocation12], %s8891_s4, %s8891_s4, %s8892_s1  }
  0x4e   :  { %s7842_s26 = smov [#allocation14]   ;;  %s7843_s5 = smov [#allocation2]  }
  0x4f   :  { %s149_s29 = sshll.u32 %s7842_s26, 4  ;;  %s41_s6 = sshll.u32 %s7843_s5, 4  ;;  %s150_s29 = int_to_ptr.vmem [resolvable:$true] %s149_s29  ;;  %s42_s6 = int_to_ptr.vmem [resolvable:$true] %s41_s6 }
  0x50   :  { %s7647_s30 = scalar_lea.hbm %s8871_s19, 32 }
  0x51   :  { %p7648_p10 = scmp.ne.s32.totalorder %s8871_s19, %s7647_s30  ;;  %p7651_p11 = scmp.lt.u32.totalorder %s7647_s30, %s8871_s19 }
  0x53   :  { %p7653_p12 = pnand %p7651_p11, %p7648_p10 }
  0x55   :  { %7656 = shalt.err (!%p7653_p12)
}
  0x56   :  { %s7657_s12 = scalar_lea.vmem %s150_s29, 32  ;;  %p7662_p0 = scmp.lt.s32.totalorder %s150_s29, %s150_s29 }
  0x57   :  { %p7658_p13 = scmp.ne.s32.totalorder %s150_s29, %s7657_s12  ;;  %p7663_p1 = scmp.lt.s32.totalorder %s7657_s12, %s7657_s12 }
  0x59   :  { %p7664_p2 = por %p7663_p1, %p7662_p0 }
  0x5b   :  { %p7665_p3 = pnand %p7664_p2, %p7658_p13 }
  0x5d   :  { %7668 = shalt.err (!%p7665_p3)
}
  0x5e   :  { %s8887_s27 = smov 16   ;;  %s8889_s28 = smov 1  }
  0x5f   :  { %155 = dma.hbm_to_vmem [thread:$0]  %s8871_s19, 32, %s150_s29, [#allocation15], %s8887_s27, %s8887_s27, %s8889_s28  }
  0x60   :  { %s8910_s7 = sld [smem:[#allocation27_spill]] }
  0x66   :  { %s7669_s30 = scalar_lea.hbm %s8910_s7, 256 }
  0x67   :  { %p7670_p4 = scmp.ne.s32.totalorder %s8910_s7, %s7669_s30  ;;  %p7673_p5 = scmp.lt.u32.totalorder %s7669_s30, %s8910_s7 }
  0x69   :  { %p7675_p6 = pnand %p7673_p5, %p7670_p4 }
  0x6b   :  { %7678 = shalt.err (!%p7675_p6)
}
  0x6c   :  { %s7679_s12 = scalar_lea.vmem %s42_s6, 256  ;;  %p7684_p8 = scmp.lt.s32.totalorder %s42_s6, %s42_s6 }
  0x6d   :  { %p7680_p7 = scmp.ne.s32.totalorder %s42_s6, %s7679_s12  ;;  %p7685_p9 = scmp.lt.s32.totalorder %s7679_s12, %s7679_s12 }
  0x6f   :  { %p7686_p10 = por %p7685_p9, %p7684_p8 }
  0x71   :  { %p7687_p11 = pnand %p7686_p10, %p7680_p7 }
  0x73   :  { %7690 = shalt.err (!%p7687_p11)
}
  0x74   :  { %47 = dma.hbm_to_vmem [thread:$0]  %s8910_s7, 256, %s42_s6, [#allocation3], %s8891_s4, %s8891_s4, %s8892_s1  }
  0x75   :  { %s7846_s0 = smov [#allocation7]   ;;  %s7847_s5 = smov [#allocation10]  }
  0x76   :  { %s65_s26 = sshll.u32 %s7846_s0, 4  ;;  %s101_s2 = sshll.u32 %s7847_s5, 4  ;;  %s66_s26 = int_to_ptr.vmem [resolvable:$true] %s65_s26  ;;  %s102_s2 = int_to_ptr.vmem [resolvable:$true] %s101_s2 }
  0x77   :  { %s8911_s3 = sld [smem:[#allocation29_spill]] }
  0x7d   :  { %s7691_s25 = scalar_lea.hbm %s8911_s3, 256 }
  0x7e   :  { %p7692_p12 = scmp.ne.s32.totalorder %s8911_s3, %s7691_s25  ;;  %p7695_p13 = scmp.lt.u32.totalorder %s7691_s25, %s8911_s3 }
  0x80   :  { %p7697_p0 = pnand %p7695_p13, %p7692_p12 }
  0x82   :  { %7700 = shalt.err (!%p7697_p0)
}
  0x83   :  { %s7701_s6 = scalar_lea.vmem %s66_s26, 256  ;;  %p7706_p2 = scmp.lt.s32.totalorder %s66_s26, %s66_s26 }
  0x84   :  { %p7702_p1 = scmp.ne.s32.totalorder %s66_s26, %s7701_s6  ;;  %p7707_p3 = scmp.lt.s32.totalorder %s7701_s6, %s7701_s6 }
  0x86   :  { %p7708_p4 = por %p7707_p3, %p7706_p2 }
  0x88   :  { %p7709_p5 = pnand %p7708_p4, %p7702_p1 }
  0x8a   :  { %7712 = shalt.err (!%p7709_p5)
}
  0x8b   :  { %71 = dma.hbm_to_vmem [thread:$0]  %s8911_s3, 256, %s66_s26, [#allocation6], %s8891_s4, %s8891_s4, %s8892_s1  }
  0x8c   :  { %s7713_s28 = scalar_lea.hbm %s8862_s10, 1024 }
  0x8d   :  { %p7714_p6 = scmp.ne.s32.totalorder %s8862_s10, %s7713_s28  ;;  %p7717_p7 = scmp.lt.u32.totalorder %s7713_s28, %s8862_s10 }
  0x8f   :  { %p7719_p8 = pnand %p7717_p7, %p7714_p6 }
  0x91   :  { %7722 = shalt.err (!%p7719_p8)
}
  0x92   :  { %s7723_s25 = scalar_lea.vmem %s102_s2, 1024  ;;  %p7728_p10 = scmp.lt.s32.totalorder %s102_s2, %s102_s2 }
  0x93   :  { %p7724_p9 = scmp.ne.s32.totalorder %s102_s2, %s7723_s25  ;;  %p7729_p11 = scmp.lt.s32.totalorder %s7723_s25, %s7723_s25 }
  0x95   :  { %p7730_p12 = por %p7729_p11, %p7728_p10 }
  0x97   :  { %p7731_p13 = pnand %p7730_p12, %p7724_p9 }
  0x99   :  { %7734 = shalt.err (!%p7731_p13)
}
  0x9a   :  { %107 = dma.hbm_to_vmem [thread:$0]  %s8862_s10, 1024, %s102_s2, [#allocation9], %s8891_s4, %s8891_s4, %s8892_s1  }
  0x9b   :  { %s7848_s8 = smov [#allocation13]   ;;  %s7849_s6 = smov [#allocation16]  }
  0x9c   :  { %s137_s12 = sshll.u32 %s7848_s8, 4  ;;  %s161_s7 = sshll.u32 %s7849_s6, 4  ;;  %s138_s12 = int_to_ptr.vmem [resolvable:$true] %s137_s12  ;;  %s162_s7 = int_to_ptr.vmem [resolvable:$true] %s161_s7 }
  0x9d   :  { %s7735_s27 = scalar_lea.hbm %s8870_s18, 32 }
  0x9e   :  { %p7736_p0 = scmp.ne.s32.totalorder %s8870_s18, %s7735_s27  ;;  %p7739_p1 = scmp.lt.u32.totalorder %s7735_s27, %s8870_s18 }
  0xa0   :  { %p7741_p2 = pnand %p7739_p1, %p7736_p0 }
  0xa2   :  { %7744 = shalt.err (!%p7741_p2)
}
  0xa3   :  { %s7745_s10 = scalar_lea.vmem %s138_s12, 32  ;;  %p7750_p4 = scmp.lt.s32.totalorder %s138_s12, %s138_s12 }
  0xa4   :  { %p7746_p3 = scmp.ne.s32.totalorder %s138_s12, %s7745_s10  ;;  %p7751_p5 = scmp.lt.s32.totalorder %s7745_s10, %s7745_s10 }
  0xa6   :  { %p7752_p6 = por %p7751_p5, %p7750_p4 }
  0xa8   :  { %p7753_p7 = pnand %p7752_p6, %p7746_p3 }
  0xaa   :  { %7756 = shalt.err (!%p7753_p7)
}
  0xab   :  { %s8912_s2 = smov 1   ;;  %s8913_s24 = smov 16  }
  0xac   :  { %143 = dma.hbm_to_vmem [thread:$0]  %s8870_s18, 32, %s138_s12, [#allocation12], %s8913_s24, %s8913_s24, %s8912_s2  }
  0xad   :  { %s7757_s6 = scalar_lea.hbm %s8872_s20, 1024 }
  0xae   :  { %p7758_p8 = scmp.ne.s32.totalorder %s8872_s20, %s7757_s6  ;;  %p7761_p9 = scmp.lt.u32.totalorder %s7757_s6, %s8872_s20 }
  0xb0   :  { %p7763_p10 = pnand %p7761_p9, %p7758_p8 }
  0xb2   :  { %7766 = shalt.err (!%p7763_p10)
}
  0xb3   :  { %s7767_s0 = scalar_lea.vmem %s162_s7, 1024  ;;  %p7772_p12 = scmp.lt.s32.totalorder %s162_s7, %s162_s7 }
  0xb4   :  { %p7768_p11 = scmp.ne.s32.totalorder %s162_s7, %s7767_s0  ;;  %p7773_p13 = scmp.lt.s32.totalorder %s7767_s0, %s7767_s0 }
  0xb6   :  { %p7774_p0 = por %p7773_p13, %p7772_p12 }
  0xb8   :  { %p7775_p1 = pnand %p7774_p0, %p7768_p11 }
  0xba   :  { %7778 = shalt.err (!%p7775_p1)
}
  0xbb   :  { %167 = dma.hbm_to_vmem [thread:$0]  %s8872_s20, 1024, %s162_s7, [#allocation15], %s8891_s4, %s8891_s4, %s8892_s1  }
  0xbc   :  { %s7850_s5 = smov [#allocation17]   ;;  %s7779_s26 = scalar_lea.hbm %s8873_s21, 32 }
  0xbd   :  { %s173_s30 = sshll.u32 %s7850_s5, 4  ;;  %p7780_p2 = scmp.ne.s32.totalorder %s8873_s21, %s7779_s26  ;;  %s174_s30 = int_to_ptr.vmem [resolvable:$true] %s173_s30 }
  0xbe   :  { %p7783_p3 = scmp.lt.u32.totalorder %s7779_s26, %s8873_s21 }
  0xc0   :  { %p7785_p4 = pnand %p7783_p3, %p7780_p2 }
  0xc2   :  { %7788 = shalt.err (!%p7785_p4)
}
  0xc3   :  { %s7789_s29 = scalar_lea.vmem %s174_s30, 32  ;;  %p7794_p6 = scmp.lt.s32.totalorder %s174_s30, %s174_s30 }
  0xc4   :  { %p7790_p5 = scmp.ne.s32.totalorder %s174_s30, %s7789_s29  ;;  %p7795_p7 = scmp.lt.s32.totalorder %s7789_s29, %s7789_s29 }
  0xc6   :  { %p7796_p8 = por %p7795_p7, %p7794_p6 }
  0xc8   :  { %p7797_p9 = pnand %p7796_p8, %p7790_p5 }
  0xca   :  { %7800 = shalt.err (!%p7797_p9)
}
  0xcb   :  { %179 = dma.hbm_to_vmem [thread:$0]  %s8873_s21, 32, %s174_s30, [#allocation18], %s8913_s24, %s8913_s24, %s8912_s2  }
  0xcc   :  { %7823 = dma.done.wait [#allocation3], 256  }
  0xcd   :  { %7824 = vsyncadd [#allocation3], 4294967040 }
  0xce   :  { %7825 = dma.done.wait [#allocation6], 512  }
  0xcf   :  { %7826 = vsyncadd [#allocation6], 4294966784 }
  0xd0   :  { %7827 = dma.done.wait [#allocation9], 1280  }
  0xd1   :  { %7828 = vsyncadd [#allocation9], 4294966016 }
  0xd2   :  { %7829 = dma.done.wait [#allocation12], 1056  }
  0xd3   :  { %7830 = vsyncadd [#allocation12], 4294966240 }
  0xd4   :  { %7831 = dma.done.wait [#allocation15], 1056  }
  0xd5   :  { %7832 = vsyncadd [#allocation15], 4294966240 }
  0xd6   :  { %7833 = dma.done.wait [#allocation18], 32  }
  0xd7   :  { %7834 = vsyncadd [#allocation18], 4294967264  ;;  %vm233_vm0 = vcmask 261120   ;;  %s8914_s0 = sld [smem:[#allocation31_spill]]  ;;  %v8157_v5 = vld [vmem:[#allocation2] sm:$0xff]  ;;  %v8161_v7 = vld [vmem:[#allocation2 + $0x8] sm:$0xff] }
  0xd8   :  { %6545 = vmatprep.mubr.msk.f32.mxu1 %vm233_vm0, %v8157_v5  ;;  %s8915_s25 = sld [smem:[#allocation32_spill]]  ;;  %vm326_vm1 = vcmask 64512   ;;  %s7851_s26 = smov 120   ;;  %v8216_v32 = vld [vmem:[#allocation7 + $0x8] sm:$0xff]  ;;  %v8218_v35 = vld [vmem:[#allocation7] sm:$0xff]  ;;  %vm414_vm3 = vcmask 130048  }
  0xd9   :  { %s7852_s3 = smov 96   ;;  %s7853_s8 = smov 88   ;;  %vm8194_vm2 = vmpackc.low %vm326_vm1, %vm326_vm1  ;;  %vm3011_vm4 = vcmask 523264  }
  0xda   :  { %s7854_s6 = smov 112   ;;  %s7855_s19 = smov 80  }
  0xdb   :  { %s8895_s29 = smov 56   ;;  %s7857_s20 = smov 72  }
  0xdc   :  { %s7858_s7 = smov 64   ;;  %s8896_s27 = smov 104  }
  0xdd   :  { %v222_v0 = vld [vmem:[%s8914_s0] sm:$0xff]  ;;  %v223_v1 = vld [vmem:[%s8914_s0 + $0x8] sm:$0xff]  ;;  %v224_v2 = vld [vmem:[%s8914_s0 + $0x10] sm:$0xff]  ;;  %s8894_s28 = smov 48   ;;  %s8893_s18 = smov 40  }
  0xde   :  { %v6967_v3 = vpack.c.bf16 %v223_v1, %v222_v0  ;;  %v225_v4 = vld [vmem:[%s8914_s0 + $0x18] sm:$0xff]  ;;  %v6089_v8 = vld [vmem:[%s8915_s25] ss:$0 sm:$0xff]  ;;  %s8918_s2 = sld [smem:[#allocation33_spill]]  ;;  %s8919_s30 = sld [smem:[#allocation34_spill]] }
  0xdf   :  { %v6971_v6 = vpack.c.bf16 %v225_v4, %v224_v2  ;;  %s8920_s21 = sld [smem:[#allocation35_spill]]  ;;  %s8924_s4 = smov 40  }
  0xe0   :  { %6968 = vmatprep.subr.bf16.mxu1 %v6967_v3 }
  0xe1   :  { %6970 = vmatpush3.bf16.msra.mxu1 %v6967_v3 }
  0xe2   :  { %6972 = vmatprep.subr.bf16.mxu1 %v6971_v6 }
  0xe5   :  { %6974 = vmatpush3.bf16.msra.mxu1 %v6971_v6 }
  0xe8   :  { %6546 = vmatmul.mubr.msk.f32.vlgmr.msra.gmra.mrb[0].mxu1 %vm233_vm0, %v8161_v7 }
 0x1bb   :  { %v6547_v9 = vpop.f32.mrb[0].mxu1 }
 0x1bc   :  { %v8168_v10 = vadd.f32 %v6547_v9, %v6089_v8  ;;  %v306_v11 = vpop.f32.mrb[1].mxu1 }
 0x1bd   :  { %v8170_v12 = vadd.f32 %v6089_v8, %v306_v11 }
 0x1bf   :  { %524 = vrot.lane.b32.xlu1 %v8170_v12, %s7851_s26  ;;  %6552 = vmatprep.mubr.msk.f32.mxu1 %vm326_vm1, %v8170_v12  ;;  %v8178_v13 = vpack.i.bf16 %v8168_v10, %v8170_v12 }
 0x1c1   :  { %7274 = vrot.lane.b32.xlu0 %v8178_v13, %s7852_s3 }
 0x1c3   :  { %526 = vrot.lane.b32.xlu1 %v8168_v10, %s7851_s26 }
 0x1c5   :  { %7279 = vrot.lane.b32.xlu0 %v8178_v13, %s7853_s8 }
 0x1c7   :  { %890 = vrot.lane.b32.xlu1 %v8170_v12, %s7854_s6 }
 0x1c9   :  { %7284 = vrot.lane.b32.xlu0 %v8178_v13, %s7855_s19 }
 0x1cd   :  { %892 = vrot.lane.b32.xlu0 %v8168_v10, %s7854_s6 }
 0x231   :  { %v525_v24 = vpop.permute.xlu1 %524 }
 0x233   :  { %v7275_v14 = vpop.permute.xlu0 %7274 }
 0x234   :  { %v7277_v15 = vunpack.i.h.bf16 %v7275_v14  ;;  %v7276_v16 = vunpack.i.l.bf16 %v7275_v14 }
 0x235   :  { %v527_v28 = vpop.permute.xlu1 %526 }
 0x236   :  { %v6975_v18 = vpack.c.bf16 %v7277_v15, %v7276_v16 }
 0x237   :  { %v7280_v19 = vpop.permute.xlu0 %7279 }
 0x238   :  { %v7282_v20 = vunpack.i.h.bf16 %v7280_v19  ;;  %v7281_v21 = vunpack.i.l.bf16 %v7280_v19  ;;  %6977 = vmatprep.subr.msk.bf16.mxu1 %vm8194_vm2, %v6975_v18 }
 0x239   :  { %6980 = vmatpush3.bf16.xpose.msk.msra.mxu1 %vm8194_vm2, %v6975_v18  ;;  %v891_v29 = vpop.permute.xlu1 %890 }
 0x23a   :  { %v6985_v22 = vpack.c.bf16 %v7282_v20, %v7281_v21 }
 0x23b   :  { %v7285_v23 = vpop.permute.xlu0 %7284 }
 0x23c   :  { %v7287_v25 = vunpack.i.h.bf16 %v7285_v23  ;;  %v7286_v26 = vunpack.i.l.bf16 %v7285_v23  ;;  %6987 = vmatprep.subr.msk.bf16.mxu1 %vm8194_vm2, %v6985_v22 }
 0x23e   :  { %v6995_v27 = vpack.c.bf16 %v7287_v25, %v7286_v26 }
 0x23f   :  { %v893_v30 = vpop.permute.xlu0 %892 }
 0x240   :  { %6553 = vmatmul.mubr.msk.f32.vlgmr.msra.gmra.mrb[2].mxu1 %vm326_vm1, %v8168_v10 }
 0x241   :  { %6990 = vmatpush3.bf16.xpose.msk.msra.mxu1 %vm8194_vm2, %v6985_v22  ;;  %6566 = vmatprep.mubr.msk.f32.mxu1 %vm326_vm1, %v525_v24 }
 0x242   :  { %6997 = vmatprep.subr.msk.bf16.mxu1 %vm8194_vm2, %v6995_v27 }
 0x248   :  { %6567 = vmatmul.mubr.msk.f32.vlgmr.msra.gmra.mrb[4].mxu1 %vm326_vm1, %v527_v28 }
 0x249   :  { %7000 = vmatpush3.bf16.xpose.msk.msra.mxu1 %vm8194_vm2, %v6995_v27  ;;  %6590 = vmatprep.mubr.msk.f32.mxu1 %vm326_vm1, %v891_v29 }
 0x250   :  { %6591 = vmatmul.mubr.msk.f32.vlgmr.msra.gmra.mrb[6].mxu1 %vm326_vm1, %v893_v30 }
 0x313   :  { %v6554_v31 = vpop.f32.mrb[2].mxu1 }
 0x314   :  { %v411_v33 = vmul.f32 0.35355338, %v6554_v31  ;;  %v401_v34 = vpop.f32.mrb[3].mxu1 }
 0x315   :  { %v410_v36 = vmul.f32 0.35355338, %v401_v34 }
 0x316   :  { %v413_v37 = vadd.f32 %v411_v33, %v8216_v32 }
 0x317   :  { %v412_v38 = vadd.f32 %v410_v36, %v8218_v35 }
 0x318   :  { %v418_v39 = vsel %vm414_vm3, %v413_v37, -inf }
 0x319   :  { %419 = vmax.xlane.f32.xlu0 %v418_v39  ;;  %v415_v40 = vsel %vm414_vm3, %v412_v38, -inf }
 0x31a   :  { %416 = vmax.xlane.f32.xlu1 %v415_v40 }
 0x31b   :  { %v6568_v41 = vpop.f32.mrb[4].mxu1 }
 0x31c   :  { %v616_v42 = vmul.f32 0.35355338, %v6568_v41  ;;  %v606_v43 = vpop.f32.mrb[5].mxu1 }
 0x31d   :  { %v615_v44 = vmul.f32 0.35355338, %v606_v43 }
 0x31e   :  { %v618_v45 = vadd.f32 %v616_v42, %v8216_v32 }
 0x31f   :  { %v617_v46 = vadd.f32 %v615_v44, %v8218_v35 }
 0x320   :  { %v622_v47 = vsel %vm414_vm3, %v618_v45, -inf }
 0x321   :  { %623 = vmax.xlane.f32.xlu1 %v622_v47  ;;  %v619_v48 = vsel %vm414_vm3, %v617_v46, -inf }
 0x322   :  { %620 = vmax.xlane.f32.xlu0 %v619_v48 }
 0x323   :  { %v6592_v49 = vpop.f32.mrb[6].mxu1 }
 0x324   :  { %v972_v50 = vpop.f32.mrb[7].mxu1  ;;  %v982_v11 = vmul.f32 0.35355338, %v6592_v49 }
 0x325   :  { %v981_v9 = vmul.f32 0.35355338, %v972_v50 }
 0x326   :  { %v984_v15 = vadd.f32 %v982_v11, %v8216_v32 }
 0x327   :  { %v983_v14 = vadd.f32 %v981_v9, %v8218_v35 }
 0x328   :  { %v988_v18 = vsel %vm414_vm3, %v984_v15, -inf }
 0x329   :  { %v985_v16 = vsel %vm414_vm3, %v983_v14, -inf }
 0x3a6   :  { %v420_v51 = vpop.xlane.xlu0 %419 }
 0x3a7   :  { %v422_v52 = vsub.f32 %v413_v37, %v420_v51  ;;  %v417_v53 = vpop.xlane.xlu1 %416 }
 0x3a8   :  { %v421_v54 = vsub.f32 %v412_v38, %v417_v53 }
 0x3a9   :  { %v425_v55 = vmul.f32 1.442695, %v422_v52 }
 0x3aa   :  { %v423_v56 = vmul.f32 1.442695, %v421_v54  ;;  %v316_v54 = vld [vmem:[%s8918_s2 + $0x8] sm:$0xff] }
 0x3ab   :  { %7423 = vpow2.f32 %v425_v55  ;;  %v315_v55 = vld [vmem:[%s8918_s2] sm:$0xff] }
 0x3ac   :  { %7425 = vpow2.f32 %v423_v56 }
 0x3ae   :  { %v624_v57 = vpop.xlane.xlu1 %623 }
 0x3af   :  { %v626_v58 = vsub.f32 %v618_v45, %v624_v57  ;;  %v621_v59 = vpop.xlane.xlu0 %620 }
 0x3b0   :  { %v625_v60 = vsub.f32 %v617_v46, %v621_v59 }
 0x3b1   :  { %v629_v61 = vmul.f32 1.442695, %v626_v58 }
 0x3b2   :  { %v627_v62 = vmul.f32 1.442695, %v625_v60 }
 0x3b3   :  { %7427 = vpow2.f32 %v629_v61 }
 0x3b4   :  { %7429 = vpow2.f32 %v627_v62 }
 0x3b5   :  { %v8228_v63 = vpop.eup %7423 }
 0x3b6   :  { %v7426_v0 = vpop.eup %7425  ;;  %v430_v1 = vsel %vm414_vm3, %v8228_v63, 0.0 }
 0x3b7   :  { %431 = vadd.xlane.f32.xlu1 %v430_v1  ;;  %v427_v2 = vsel %vm414_vm3, %v7426_v0, 0.0 }
 0x3b8   :  { %428 = vadd.xlane.f32.xlu0 %v427_v2 }
 0x3bd   :  { %v8233_v3 = vpop.eup %7427 }
 0x3be   :  { %v7430_v4 = vpop.eup %7429  ;;  %v634_v6 = vsel %vm414_vm3, %v8233_v3, 0.0 }
 0x3bf   :  { %635 = vadd.xlane.f32.xlu1 %v634_v6  ;;  %v631_v8 = vsel %vm414_vm3, %v7430_v4, 0.0 }
 0x3c0   :  { %632 = vadd.xlane.f32.xlu0 %v631_v8 }
 0x3d0   :  { %7294 = vrot.lane.b32.xlu1 %v8178_v13, %s8895_s29 }
 0x3d4   :  { %7299 = vrot.lane.b32.xlu1 %v8178_v13, %s7857_s20 }
 0x3d6   :  { %7289 = vrot.lane.b32.xlu0 %v8178_v13, %s7858_s7 }
 0x3d8   :  { %1179 = vrot.lane.b32.xlu1 %v8168_v10, %s8896_s27 }
 0x3da   :  { %1177 = vrot.lane.b32.xlu0 %v8170_v12, %s8896_s27 }
 0x3f9   :  { %986 = vmax.xlane.f32.xlu0 %v985_v16 }
 0x3fc   :  { %989 = vmax.xlane.f32.xlu1 %v988_v18 }
 0x40d   :  { %7304 = vrot.lane.b32.xlu1 %v8178_v13, %s8894_s28 }
 0x411   :  { %7309 = vrot.lane.b32.xlu1 %v8178_v13, %s8893_s18  ;;  %s8922_s18 = smov 56  }
 0x444   :  { %v432_v12 = vpop.xlane.xlu1 %431 }
 0x445   :  { %v429_v10 = vpop.xlane.xlu0 %428 }
 0x446   :  { %7431 = vrcp.f32 %v429_v10  ;;  %v317_v10 = vld [vmem:[%s8918_s2 + $0x10] sm:$0xff] }
 0x447   :  { %7433 = vrcp.f32 %v432_v12 }
 0x44c   :  { %v636_v19 = vpop.xlane.xlu1 %635 }
 0x44d   :  { %v633_v20 = vpop.xlane.xlu0 %632 }
 0x44e   :  { %7435 = vrcp.f32 %v633_v20 }
 0x44f   :  { %7437 = vrcp.f32 %v636_v19 }
 0x450   :  { %v7432_v21 = vpop.eup %7431  ;;  %v7295_v22 = vpop.permute.xlu1 %7294 }
 0x451   :  { %v7290_v23 = vpop.permute.xlu0 %7289  ;;  %v435_v24 = vmul.f32 %v7432_v21, %v7426_v0  ;;  %v7297_v25 = vunpack.i.h.bf16 %v7295_v22  ;;  %v7296_v26 = vunpack.i.l.bf16 %v7295_v22  ;;  %v7434_v30 = vpop.eup %7433 }
 0x452   :  { %v7292_v27 = vunpack.i.h.bf16 %v7290_v23  ;;  %v7291_v28 = vunpack.i.l.bf16 %v7290_v23  ;;  %v436_v39 = vmul.f32 %v7434_v30, %v8228_v63 }
 0x453   :  { %6559 = vmatprep.mubr.msk.f32.mxu0 %vm414_vm3, %v435_v24  ;;  %v6991_v36 = vpack.c.bf16 %v7297_v25, %v7296_v26 }
 0x454   :  { %v7300_v29 = vpop.permute.xlu1 %7299  ;;  %v6981_v13 = vpack.c.bf16 %v7292_v27, %v7291_v28 }
 0x455   :  { %v7302_v31 = vunpack.i.h.bf16 %v7300_v29  ;;  %v7301_v33 = vunpack.i.l.bf16 %v7300_v29  ;;  %v1178_v34 = vpop.permute.xlu0 %1177 }
 0x456   :  { %6982 = vmatprep.subr.bf16.mxu0 %v6981_v13  ;;  %6609 = vmatprep.mubr.msk.f32.mxu1 %vm326_vm1, %v1178_v34 }
 0x457   :  { %v7005_v37 = vpack.c.bf16 %v7302_v31, %v7301_v33  ;;  %6984 = vmatpush3.bf16.msra.mxu0 %v6981_v13  ;;  %v318_v33 = vld [vmem:[%s8918_s2 + $0x18] sm:$0xff] }
 0x458   :  { %v7436_v38 = vpop.eup %7435  ;;  %6992 = vmatprep.subr.bf16.mxu0 %v6991_v36  ;;  %v1180_v43 = vpop.permute.xlu1 %1179 }
 0x459   :  { %v7438_v40 = vpop.eup %7437  ;;  %7007 = vmatprep.subr.msk.bf16.mxu1 %vm8194_vm2, %v7005_v37  ;;  %v639_v41 = vmul.f32 %v7436_v38, %v7430_v4 }
 0x45a   :  { %6560 = vmatmul.mubr.msk.f32.vlgmr.msra.gmra.mrb[0].mxu0 %vm414_vm3, %v436_v39  ;;  %7010 = vmatpush3.bf16.xpose.msk.msra.mxu1 %vm8194_vm2, %v7005_v37  ;;  %v640_v42 = vmul.f32 %v7438_v40, %v8233_v3 }
 0x45b   :  { %6994 = vmatpush3.bf16.msra.mxu0 %v6991_v36  ;;  %6573 = vmatprep.mubr.msk.f32.mxu0 %vm414_vm3, %v639_v41 }
 0x45c   :  { %6576 = vmatprep.subr.mxu0 %v316_v54 }
 0x45e   :  { %6574 = vmatmul.mubr.msk.f32.vlgmr.msra.gmra.mrb[2].mxu0 %vm414_vm3, %v640_v42 }
 0x45f   :  { %6577 = vmatpush3.msra.mxu0 %v316_v54 }
 0x460   :  { %6581 = vmatprep.subr.mxu0 %v315_v55 }
 0x461   :  { %6610 = vmatmul.mubr.msk.f32.vlgmr.msra.gmra.mrb[8].mxu1 %vm326_vm1, %v1180_v43  ;;  %v6124_v43 = vld [vmem:[%s8919_s30] ss:$0 sm:$0xff] }
 0x486   :  { %v987_v44 = vpop.xlane.xlu0 %986 }
 0x487   :  { %v991_v45 = vsub.f32 %v983_v14, %v987_v44 }
 0x489   :  { %v993_v46 = vmul.f32 1.442695, %v991_v45  ;;  %v990_v47 = vpop.xlane.xlu1 %989 }
 0x48a   :  { %v992_v48 = vsub.f32 %v984_v15, %v990_v47 }
 0x48b   :  { %7439 = vpow2.f32 %v993_v46 }
 0x48c   :  { %v995_v49 = vmul.f32 1.442695, %v992_v48 }
 0x48d   :  { %v7305_v57 = vpop.permute.xlu1 %7304 }
 0x48e   :  { %7441 = vpow2.f32 %v995_v49  ;;  %v7307_v61 = vunpack.i.h.bf16 %v7305_v57  ;;  %v7306_v62 = vunpack.i.l.bf16 %v7305_v57 }
 0x490   :  { %v7001_v1 = vpack.c.bf16 %v7307_v61, %v7306_v62  ;;  %v1612_v61 = vld [vmem:[#allocation10 + $0x8] sm:$0xff] }
 0x491   :  { %v7310_v11 = vpop.permute.xlu1 %7309 }
 0x492   :  { %v7312_v12 = vunpack.i.h.bf16 %v7310_v11  ;;  %v7311_v19 = vunpack.i.l.bf16 %v7310_v11 }
 0x495   :  { %v7440_v50 = vpop.eup %7439 }
 0x496   :  { %v997_v51 = vsel %vm414_vm3, %v7440_v50, 0.0 }
 0x497   :  { %998 = vadd.xlane.f32.xlu0 %v997_v51 }
 0x498   :  { %v7442_v52 = vpop.eup %7441 }
 0x499   :  { %v1000_v53 = vsel %vm414_vm3, %v7442_v52, 0.0 }
 0x49b   :  { %1001 = vadd.xlane.f32.xlu0 %v1000_v53 }
 0x524   :  { %v999_v56 = vpop.xlane.xlu0 %998 }
 0x525   :  { %7443 = vrcp.f32 %v999_v56 }
 0x528   :  { %v1002_v59 = vpop.xlane.xlu0 %1001 }
 0x529   :  { %7445 = vrcp.f32 %v1002_v59 }
 0x52d   :  { %v6561_v58 = vpop.f32.mrb[0].mxu0 }
 0x52e   :  { %v515_v60 = vpop.f32.mrb[1].mxu0 }
 0x52f   :  { %v7444_v8 = vpop.eup %7443 }
 0x530   :  { %v1005_v18 = vmul.f32 %v7444_v8, %v7440_v50  ;;  %v1522_v8 = vld [vmem:[%s8920_s21 + $0x18] sm:$0xff] }
 0x531   :  { %v6575_v63 = vpop.f32.mrb[2].mxu0 }
 0x532   :  { %v719_v0 = vpop.f32.mrb[3].mxu0 }
 0x533   :  { %6578 = vmatprep.mubr.msk.f32.mxu0 %vm326_vm1, %v719_v0  ;;  %v7446_v16 = vpop.eup %7445  ;;  %v1614_v0 = vld [vmem:[#allocation10 + $0x18] sm:$0xff] }
 0x534   :  { %6579 = vmatmul.mubr.msk.f32.vlgmr.msra.gmra.mrb[4].mxu0 %vm326_vm1, %v6575_v63  ;;  %v6611_v2 = vpop.f32.mrb[8].mxu1  ;;  %v1006_v20 = vmul.f32 %v7446_v16, %v7442_v52  ;;  %v1613_v63 = vld [vmem:[#allocation10 + $0x10] sm:$0xff] }
 0x535   :  { %6582 = vmatpush3.msra.mxu0 %v315_v55  ;;  %6583 = vmatprep.mubr.msk.f32.mxu0 %vm326_vm1, %v515_v60  ;;  %v1259_v3 = vpop.f32.mrb[9].mxu1  ;;  %v1269_v4 = vmul.f32 0.35355338, %v6611_v2  ;;  %v220_v2 = vld [vmem:[#allocation5] sm:$0xff] }
 0x536   :  { %7002 = vmatprep.subr.bf16.mxu0 %v7001_v1  ;;  %v1268_v6 = vmul.f32 0.35355338, %v1259_v3  ;;  %v1519_v3 = vld [vmem:[%s8920_s21] sm:$0xff] }
 0x537   :  { %v1271_v15 = vadd.f32 %v1269_v4, %v8216_v32  ;;  %v7011_v32 = vpack.c.bf16 %v7312_v12, %v7311_v19  ;;  %v1520_v4 = vld [vmem:[%s8920_s21 + $0x8] sm:$0xff] }
 0x538   :  { %v1270_v9 = vadd.f32 %v1268_v6, %v8218_v35  ;;  %v1521_v6 = vld [vmem:[%s8920_s21 + $0x10] sm:$0xff] }
 0x539   :  { %v1275_v35 = vsel %vm414_vm3, %v1271_v15, -inf  ;;  %v7019_v11 = vpack.c.bf16 %v1522_v8, %v1521_v6 }
 0x53a   :  { %v1272_v14 = vsel %vm414_vm3, %v1270_v9, -inf }
 0x53b   :  { %1273 = vmax.xlane.f32.xlu0 %v1272_v14  ;;  %v221_v14 = vld [vmem:[#allocation5 + $0x8] sm:$0xff] }
 0x53c   :  { %6584 = vmatmul.mubr.msk.f32.vlgmr.msra.gmra.mrb[4].mxu0 %vm326_vm1, %v6561_v58 }
 0x53d   :  { %7004 = vmatpush3.bf16.msra.mxu0 %v7001_v1  ;;  %6597 = vmatprep.mubr.msk.f32.mxu0 %vm414_vm3, %v1005_v18  ;;  %v7027_v1 = vpack.c.bf16 %v1614_v0, %v1613_v63 }
 0x53e   :  { %6600 = vmatprep.subr.mxu0 %v317_v10 }
 0x53f   :  { %1276 = vmax.xlane.f32.xlu0 %v1275_v35 }
 0x540   :  { %6598 = vmatmul.mubr.msk.f32.vlgmr.msra.gmra.mrb[6].mxu0 %vm414_vm3, %v1006_v20  ;;  %v6125_v20 = vld [vmem:[%s8866_s14] ss:$0 sm:$0xff] }
 0x541   :  { %6601 = vmatpush3.msra.mxu0 %v317_v10 }
 0x542   :  { %7012 = vmatprep.subr.bf16.mxu0 %v7011_v32 }
 0x5c8   :  { %v1274_v21 = vpop.xlane.xlu0 %1273 }
 0x5c9   :  { %v1278_v22 = vsub.f32 %v1270_v9, %v1274_v21  ;;  %v7015_v9 = vpack.c.bf16 %v1520_v4, %v1519_v3  ;;  %v6126_v21 = vld [vmem:[%s8867_s15] ss:$0 sm:$0xff] }
 0x5cb   :  { %v1280_v23 = vmul.f32 1.442695, %v1278_v22  ;;  %7016 = vmatprep.subr.bf16.mxu1 %v7015_v9 }
 0x5cc   :  { %v1277_v24 = vpop.xlane.xlu0 %1276  ;;  %7018 = vmatpush3.bf16.msra.mxu1 %v7015_v9 }
 0x5cd   :  { %7447 = vpow2.f32 %v1280_v23  ;;  %v1279_v25 = vsub.f32 %v1271_v15, %v1277_v24  ;;  %7020 = vmatprep.subr.bf16.mxu1 %v7019_v11 }
 0x5cf   :  { %v1282_v26 = vmul.f32 1.442695, %v1279_v25 }
 0x5d0   :  { %7022 = vmatpush3.bf16.msra.mxu1 %v7019_v11 }
 0x5d1   :  { %7449 = vpow2.f32 %v1282_v26 }
 0x5d7   :  { %v7448_v27 = vpop.eup %7447 }
 0x5d8   :  { %v1284_v28 = vsel %vm414_vm3, %v7448_v27, 0.0 }
 0x5d9   :  { %1285 = vadd.xlane.f32.xlu0 %v1284_v28  ;;  %v6130_v28 = vld [vmem:[%s8863_s11] ss:$0 sm:$0xff] }
 0x5db   :  { %v7450_v29 = vpop.eup %7449 }
 0x5dc   :  { %v1287_v13 = vsel %vm414_vm3, %v7450_v29, 0.0 }
 0x5dd   :  { %1288 = vadd.xlane.f32.xlu0 %v1287_v13 }
 0x613   :  { %v6599_v30 = vpop.f32.mrb[6].mxu0 }
 0x614   :  { %v1085_v31 = vpop.f32.mrb[7].mxu0 }
 0x615   :  { %6602 = vmatprep.mubr.msk.f32.mxu0 %vm326_vm1, %v1085_v31 }
 0x616   :  { %6603 = vmatmul.mubr.msk.f32.vlgmr.msra.gmra.mrb[4].mxu0 %vm326_vm1, %v6599_v30 }
 0x617   :  { %7014 = vmatpush3.bf16.msra.mxu0 %v7011_v32 }
 0x618   :  { %6619 = vmatprep.subr.mxu0 %v318_v33 }
 0x666   :  { %v1286_v34 = vpop.xlane.xlu0 %1285 }
 0x667   :  { %7451 = vrcp.f32 %v1286_v34 }
 0x66a   :  { %v1289_v36 = vpop.xlane.xlu0 %1288 }
 0x66b   :  { %7453 = vrcp.f32 %v1289_v36 }
 0x671   :  { %v7452_v37 = vpop.eup %7451 }
 0x672   :  { %v1292_v38 = vmul.f32 %v7452_v37, %v7448_v27 }
 0x674   :  { %6616 = vmatprep.mubr.msk.f32.mxu0 %vm414_vm3, %v1292_v38 }
 0x675   :  { %v7454_v39 = vpop.eup %7453 }
 0x676   :  { %v1293_v40 = vmul.f32 %v7454_v39, %v7450_v29 }
 0x678   :  { %6617 = vmatmul.mubr.msk.f32.vlgmr.msra.gmra.mrb[8].mxu0 %vm414_vm3, %v1293_v40 }
 0x679   :  { %6620 = vmatpush3.msra.mxu0 %v318_v33 }
 0x74b   :  { %v6618_v41 = vpop.f32.mrb[8].mxu0 }
 0x74c   :  { %v1372_v42 = vpop.f32.mrb[9].mxu0 }
 0x74d   :  { %6621 = vmatprep.mubr.msk.f32.mxu0 %vm326_vm1, %v1372_v42 }
 0x74e   :  { %6622 = vmatmul.mubr.msk.f32.vlgmr.msra.gmra.mrb[4].mxu0 %vm326_vm1, %v6618_v41  ;;  %v6127_v41 = vld [vmem:[%s8861_s9] ss:$0 sm:$0xff] }
 0x74f   :  { %6643 = vmatprep.mubr.msk.f32.mxu0 %vm233_vm0, %v220_v2 }
 0x821   :  { %v6623_v44 = vpop.f32.mrb[4].mxu0 }
 0x822   :  { %v1471_v45 = vadd.f32 %v6623_v44, %v6124_v43  ;;  %v1453_v46 = vpop.f32.mrb[5].mxu0 }
 0x823   :  { %v1470_v47 = vadd.f32 %v6124_v43, %v1453_v46 }
 0x824   :  { %v1473_v48 = vadd.f32 %v1471_v45, %v8161_v7 }
 0x825   :  { %v1472_v49 = vadd.f32 %v1470_v47, %v8157_v5  ;;  %v1611_v5 = vld [vmem:[#allocation10] sm:$0xff] }
 0x826   :  { %v1479_v50 = vsel %vm233_vm0, %v1473_v48, 0.0  ;;  %v7023_v62 = vpack.c.bf16 %v1612_v61, %v1611_v5 }
 0x827   :  { %1480 = vadd.xlane.f32.xlu1 %v1479_v50  ;;  %v1476_v51 = vsel %vm233_vm0, %v1472_v49, 0.0 }
 0x828   :  { %1477 = vadd.xlane.f32.xlu0 %v1476_v51  ;;  %7024 = vmatprep.subr.bf16.mxu0 %v7023_v62 }
 0x829   :  { %7026 = vmatpush3.bf16.msra.mxu0 %v7023_v62 }
 0x82a   :  { %7028 = vmatprep.subr.bf16.mxu0 %v7027_v1 }
 0x82d   :  { %7030 = vmatpush3.bf16.msra.mxu0 %v7027_v1 }
 0x830   :  { %6644 = vmatmul.mubr.msk.f32.vlgmr.msra.gmra.mrb[10].mxu0 %vm233_vm0, %v221_v14 }
 0x8b4   :  { %v1481_v52 = vpop.xlane.xlu1 %1480 }
 0x8b5   :  { %v1484_v53 = vmul.f32 0.03125, %v1481_v52  ;;  %v1478_v54 = vpop.xlane.xlu0 %1477 }
 0x8b6   :  { %v1483_v55 = vmul.f32 0.03125, %v1478_v54  ;;  %v8381_v54 = vld [vmem:[#allocation8 + $0x8] sm:$0xff] }
 0x8b7   :  { %v1486_v56 = vsub.f32 %v1473_v48, %v1484_v53 }
 0x8b8   :  { %v1485_v57 = vsub.f32 %v1472_v49, %v1483_v55 }
 0x8b9   :  { %v1488_v60 = vmul.f32 %v1486_v56, %v1486_v56 }
 0x8ba   :  { %v1487_v58 = vmul.f32 %v1485_v57, %v1485_v57 }
 0x8bb   :  { %v1492_v7 = vsel %vm233_vm0, %v1488_v60, 0.0 }
 0x8bc   :  { %v1489_v59 = vsel %vm233_vm0, %v1487_v58, 0.0 }
 0x8bd   :  { %1490 = vadd.xlane.f32.xlu0 %v1489_v59 }
 0x8c1   :  { %1493 = vadd.xlane.f32.xlu0 %v1492_v7 }
 0x903   :  { %v6645_v29 = vpop.f32.mrb[10].mxu0 }
 0x904   :  { %v1700_v13 = vadd.f32 %v6645_v29, %v6130_v28  ;;  %v1694_v30 = vpop.f32.mrb[11].mxu0 }
 0x905   :  { %v1695_v31 = vadd.f32 %v6130_v28, %v1694_v30 }
 0x907   :  { %v8340_v33 = vpack.i.bf16 %v1700_v13, %v1695_v31  ;;  %v7031_v34 = vpack.c.bf16 %v1700_v13, %v1695_v31 }
 0x909   :  { %7314 = vrot.lane.b32.xlu0 %v8340_v33, %s7851_s26  ;;  %7033 = vmatprep.subr.msk.bf16.mxu1 %vm8194_vm2, %v7031_v34 }
 0x90a   :  { %7319 = vrot.lane.b32.xlu1 %v8340_v33, %s7854_s6 }
 0x94a   :  { %v1491_v15 = vpop.xlane.xlu0 %1490 }
 0x94b   :  { %v1495_v16 = vmul.f32 0.03125, %v1491_v15 }
 0x94d   :  { %v1497_v18 = vadd.f32 1e-05, %v1495_v16 }
 0x94e   :  { %v1494_v10 = vpop.xlane.xlu0 %1493 }
 0x94f   :  { %7455 = vrsqrt.f32 %v1497_v18  ;;  %v1496_v12 = vmul.f32 0.03125, %v1494_v10 }
 0x951   :  { %v1498_v19 = vadd.f32 1e-05, %v1496_v12 }
 0x953   :  { %7457 = vrsqrt.f32 %v1498_v19 }
 0x959   :  { %v7456_v35 = vpop.eup %7455 }
 0x95a   :  { %v1501_v32 = vmul.f32 %v7456_v35, %v1485_v57  ;;  %v8383_v57 = vld [vmem:[#allocation8] sm:$0xff] }
 0x95c   :  { %v1509_v22 = vmul.f32 %v6125_v20, %v1501_v32 }
 0x95d   :  { %v7458_v23 = vpop.eup %7457 }
 0x95e   :  { %v1502_v24 = vmul.f32 %v7458_v23, %v1486_v56  ;;  %v8329_v25 = vadd.f32 %v6126_v21, %v1509_v22 }
 0x960   :  { %v1510_v26 = vmul.f32 %v6125_v20, %v1502_v24  ;;  %6632 = vmatprep.mubr.msk.f32.mxu1 %vm233_vm0, %v8329_v25 }
 0x962   :  { %v8333_v27 = vadd.f32 %v6126_v21, %v1510_v26 }
 0x964   :  { %6633 = vmatmul.mubr.msk.f32.vlgmr.msra.gmra.mrb[10].mxu1 %vm233_vm0, %v8333_v27 }
 0x965   :  { %7036 = vmatpush3.bf16.xpose.msk.msra.mxu1 %vm8194_vm2, %v7031_v34 }
 0x97b   :  { %v7315_v36 = vpop.permute.xlu0 %7314 }
 0x97c   :  { %v7317_v37 = vunpack.i.h.bf16 %v7315_v36  ;;  %v7316_v38 = vunpack.i.l.bf16 %v7315_v36  ;;  %v7320_v40 = vpop.permute.xlu1 %7319 }
 0x97d   :  { %v7322_v42 = vunpack.i.h.bf16 %v7320_v40  ;;  %v7321_v43 = vunpack.i.l.bf16 %v7320_v40 }
 0x97e   :  { %v7041_v39 = vpack.c.bf16 %v7317_v37, %v7316_v38 }
 0x97f   :  { %v7051_v48 = vpack.c.bf16 %v7322_v42, %v7321_v43 }
 0x980   :  { %7043 = vmatprep.subr.msk.bf16.mxu1 %vm8194_vm2, %v7041_v39 }
 0xa37   :  { %v6634_v44 = vpop.f32.mrb[10].mxu1 }
 0xa38   :  { %v1602_v45 = vpop.f32.mrb[11].mxu1  ;;  %v8357_v47 = vadd.f32 %v6634_v44, %v6127_v41 }
 0xa39   :  { %v8355_v46 = vadd.f32 %v6127_v41, %v1602_v45 }
 0xa3b   :  { %1908 = vrot.lane.b32.xlu0 %v8355_v46, %s7851_s26  ;;  %6650 = vmatprep.mubr.msk.f32.mxu1 %vm326_vm1, %v8355_v46 }
 0xa3c   :  { %6651 = vmatmul.mubr.msk.f32.vlgmr.msra.gmra.mrb[12].mxu1 %vm326_vm1, %v8357_v47 }
 0xa3d   :  { %7046 = vmatpush3.bf16.xpose.msk.msra.mxu1 %vm8194_vm2, %v7041_v39 }
 0xa3e   :  { %7053 = vmatprep.subr.msk.bf16.mxu1 %vm8194_vm2, %v7051_v48 }
 0xa3f   :  { %1910 = vrot.lane.b32.xlu0 %v8357_v47, %s7851_s26 }
 0xa43   :  { %2274 = vrot.lane.b32.xlu0 %v8355_v46, %s7854_s6 }
 0xa47   :  { %2276 = vrot.lane.b32.xlu0 %v8357_v47, %s7854_s6 }
 0xaad   :  { %v1909_v49 = vpop.permute.xlu0 %1908 }
 0xaae   :  { %6664 = vmatprep.mubr.msk.f32.mxu1 %vm326_vm1, %v1909_v49 }
 0xab1   :  { %v1911_v50 = vpop.permute.xlu0 %1910 }
 0xab2   :  { %6665 = vmatmul.mubr.msk.f32.vlgmr.msra.gmra.mrb[14].mxu1 %vm326_vm1, %v1911_v50 }
 0xab3   :  { %7056 = vmatpush3.bf16.xpose.msk.msra.mxu1 %vm8194_vm2, %v7051_v48 }
 0xab5   :  { %v2275_v51 = vpop.permute.xlu0 %2274 }
 0xab6   :  { %6688 = vmatprep.mubr.msk.f32.mxu1 %vm326_vm1, %v2275_v51 }
 0xab9   :  { %v2277_v52 = vpop.permute.xlu0 %2276 }
 0xaba   :  { %6689 = vmatmul.mubr.msk.f32.vlgmr.msra.gmra.mrb[16].mxu1 %vm326_vm1, %v2277_v52 }
 0xb0f   :  { %v6652_v53 = vpop.f32.mrb[12].mxu1 }
 0xb10   :  { %v1796_v55 = vmul.f32 0.35355338, %v6652_v53  ;;  %v1786_v56 = vpop.f32.mrb[13].mxu1 }
 0xb11   :  { %v1795_v58 = vmul.f32 0.35355338, %v1786_v56 }
 0xb12   :  { %v1798_v59 = vadd.f32 %v1796_v55, %v8381_v54 }
 0xb13   :  { %v1797_v60 = vadd.f32 %v1795_v58, %v8383_v57 }
 0xb14   :  { %v1802_v7 = vsel %vm414_vm3, %v1798_v59, -inf }
 0xb15   :  { %1803 = vmax.xlane.f32.xlu1 %v1802_v7  ;;  %v1799_v5 = vsel %vm414_vm3, %v1797_v60, -inf }
 0xb16   :  { %1800 = vmax.xlane.f32.xlu0 %v1799_v5 }
 0xb85   :  { %v6666_v61 = vpop.f32.mrb[14].mxu1 }
 0xb86   :  { %v1990_v62 = vpop.f32.mrb[15].mxu1  ;;  %v2000_v63 = vmul.f32 0.35355338, %v6666_v61 }
 0xb87   :  { %v1999_v0 = vmul.f32 0.35355338, %v1990_v62 }
 0xb88   :  { %v2002_v3 = vadd.f32 %v2000_v63, %v8381_v54 }
 0xb89   :  { %v2001_v1 = vadd.f32 %v1999_v0, %v8383_v57 }
 0xb8a   :  { %v2006_v8 = vsel %vm414_vm3, %v2002_v3, -inf }
 0xb8b   :  { %v2003_v2 = vsel %vm414_vm3, %v2001_v1, -inf }
 0xb8c   :  { %2004 = vmax.xlane.f32.xlu0 %v2003_v2 }
 0xb8d   :  { %v6690_v4 = vpop.f32.mrb[16].mxu1 }
 0xb8e   :  { %v2356_v6 = vpop.f32.mrb[17].mxu1  ;;  %v2366_v38 = vmul.f32 0.35355338, %v6690_v4 }
 0xb8f   :  { %v2365_v36 = vmul.f32 0.35355338, %v2356_v6 }
 0xb90   :  { %2007 = vmax.xlane.f32.xlu0 %v2006_v8  ;;  %v2368_v40 = vadd.f32 %v2366_v38, %v8381_v54 }
 0xb91   :  { %v2367_v37 = vadd.f32 %v2365_v36, %v8383_v57  ;;  %v1705_v36 = vld [vmem:[#allocation11 + $0x10] sm:$0xff] }
 0xb92   :  { %v2372_v41 = vsel %vm414_vm3, %v2368_v40, -inf }
 0xb93   :  { %v2369_v39 = vsel %vm414_vm3, %v2367_v37, -inf }
 0xba2   :  { %v1804_v9 = vpop.xlane.xlu1 %1803 }
 0xba3   :  { %v1806_v11 = vsub.f32 %v1798_v59, %v1804_v9  ;;  %v1801_v14 = vpop.xlane.xlu0 %1800 }
 0xba4   :  { %v1805_v15 = vsub.f32 %v1797_v60, %v1801_v14 }
 0xba5   :  { %v1809_v16 = vmul.f32 1.442695, %v1806_v11 }
 0xba6   :  { %v1807_v18 = vmul.f32 1.442695, %v1805_v15  ;;  %v1704_v15 = vld [vmem:[#allocation11 + $0x8] sm:$0xff] }
 0xba7   :  { %7459 = vpow2.f32 %v1809_v16  ;;  %v1703_v16 = vld [vmem:[#allocation11] sm:$0xff] }
 0xba8   :  { %7461 = vpow2.f32 %v1807_v18 }
 0xbb1   :  { %v7460_v10 = vpop.eup %7459 }
 0xbb2   :  { %v7462_v12 = vpop.eup %7461  ;;  %v1814_v19 = vsel %vm414_vm3, %v7460_v10, 0.0 }
 0xbb3   :  { %1815 = vadd.xlane.f32.xlu1 %v1814_v19  ;;  %v1811_v35 = vsel %vm414_vm3, %v7462_v12, 0.0 }
 0xbb4   :  { %1812 = vadd.xlane.f32.xlu0 %v1811_v35 }
 0xc19   :  { %v2005_v20 = vpop.xlane.xlu0 %2004 }
 0xc1a   :  { %v2009_v32 = vsub.f32 %v2001_v1, %v2005_v20 }
 0xc1c   :  { %v2011_v21 = vmul.f32 1.442695, %v2009_v32 }
 0xc1d   :  { %v2008_v22 = vpop.xlane.xlu0 %2007 }
 0xc1e   :  { %7463 = vpow2.f32 %v2011_v21  ;;  %v2010_v23 = vsub.f32 %v2002_v3, %v2008_v22 }
 0xc20   :  { %v2013_v24 = vmul.f32 1.442695, %v2010_v23 }
 0xc22   :  { %7465 = vpow2.f32 %v2013_v24 }
 0xc28   :  { %v7464_v26 = vpop.eup %7463 }
 0xc29   :  { %v2015_v28 = vsel %vm414_vm3, %v7464_v26, 0.0 }
 0xc2a   :  { %2016 = vadd.xlane.f32.xlu0 %v2015_v28 }
 0xc2c   :  { %v7466_v29 = vpop.eup %7465 }
 0xc2d   :  { %v2018_v13 = vsel %vm414_vm3, %v7466_v29, 0.0 }
 0xc2e   :  { %2019 = vadd.xlane.f32.xlu1 %v2018_v13 }
 0xc3f   :  { %7329 = vrot.lane.b32.xlu1 %v8340_v33, %s7853_s8 }
 0xc40   :  { %7324 = vrot.lane.b32.xlu0 %v8340_v33, %s7852_s3  ;;  %v1816_v42 = vpop.xlane.xlu1 %1815 }
 0xc41   :  { %v1813_v30 = vpop.xlane.xlu0 %1812 }
 0xc42   :  { %7467 = vrcp.f32 %v1813_v30 }
 0xc43   :  { %7334 = vrot.lane.b32.xlu1 %v8340_v33, %s8896_s27  ;;  %7469 = vrcp.f32 %v1816_v42 }
 0xc44   :  { %2561 = vrot.lane.b32.xlu0 %v8355_v46, %s8896_s27 }
 0xc47   :  { %2563 = vrot.lane.b32.xlu1 %v8357_v47, %s8896_s27 }
 0xc4c   :  { %v7468_v31 = vpop.eup %7467 }
 0xc4d   :  { %v1819_v34 = vmul.f32 %v7468_v31, %v7462_v12  ;;  %v7470_v49 = vpop.eup %7469 }
 0xc4e   :  { %v1820_v55 = vmul.f32 %v7470_v49, %v7460_v10 }
 0xc4f   :  { %6657 = vmatprep.mubr.msk.f32.mxu0 %vm414_vm3, %v1819_v34 }
 0xc63   :  { %2370 = vmax.xlane.f32.xlu0 %v2369_v39 }
 0xc6b   :  { %2373 = vmax.xlane.f32.xlu1 %v2372_v41 }
 0xc7c   :  { %7339 = vrot.lane.b32.xlu1 %v8340_v33, %s7855_s19 }
 0xc80   :  { %7344 = vrot.lane.b32.xlu1 %v8340_v33, %s7857_s20 }
 0xcb7   :  { %v2017_v43 = vpop.xlane.xlu0 %2016 }
 0xcb8   :  { %7471 = vrcp.f32 %v2017_v43 }
 0xcbb   :  { %v2020_v44 = vpop.xlane.xlu1 %2019  ;;  %v7325_v45 = vpop.permute.xlu0 %7324 }
 0xcbc   :  { %7473 = vrcp.f32 %v2020_v44  ;;  %v7327_v46 = vunpack.i.h.bf16 %v7325_v45  ;;  %v7326_v47 = vunpack.i.l.bf16 %v7325_v45 }
 0xcbe   :  { %v7037_v48 = vpack.c.bf16 %v7327_v46, %v7326_v47 }
 0xcbf   :  { %v7330_v50 = vpop.permute.xlu1 %7329  ;;  %v2562_v51 = vpop.permute.xlu0 %2561 }
 0xcc0   :  { %v7332_v52 = vunpack.i.h.bf16 %v7330_v50  ;;  %v7331_v53 = vunpack.i.l.bf16 %v7330_v50  ;;  %7038 = vmatprep.subr.bf16.mxu0 %v7037_v48  ;;  %6707 = vmatprep.mubr.msk.f32.mxu1 %vm326_vm1, %v2562_v51 }
 0xcc1   :  { %7040 = vmatpush3.bf16.msra.mxu0 %v7037_v48 }
 0xcc2   :  { %v7472_v33 = vpop.eup %7471  ;;  %v7047_v56 = vpack.c.bf16 %v7332_v52, %v7331_v53 }
 0xcc3   :  { %v7335_v58 = vpop.permute.xlu1 %7334  ;;  %v2023_v59 = vmul.f32 %v7472_v33, %v7464_v26 }
 0xcc4   :  { %v7337_v60 = vunpack.i.h.bf16 %v7335_v58  ;;  %v7336_v7 = vunpack.i.l.bf16 %v7335_v58  ;;  %6658 = vmatmul.mubr.msk.f32.vlgmr.msra.gmra.mrb[12].mxu0 %vm414_vm3, %v1820_v55  ;;  %7048 = vmatprep.subr.bf16.mxu0 %v7047_v56  ;;  %v1706_v55 = vld [vmem:[#allocation11 + $0x18] sm:$0xff] }
 0xcc5   :  { %7050 = vmatpush3.bf16.msra.mxu0 %v7047_v56  ;;  %6671 = vmatprep.mubr.msk.f32.mxu0 %vm414_vm3, %v2023_v59 }
 0xcc6   :  { %v7474_v5 = vpop.eup %7473  ;;  %v7061_v61 = vpack.c.bf16 %v7337_v60, %v7336_v7  ;;  %6674 = vmatprep.subr.mxu0 %v1704_v15 }
 0xcc7   :  { %v2024_v62 = vmul.f32 %v7474_v5, %v7466_v29  ;;  %v2564_v63 = vpop.permute.xlu1 %2563 }
 0xcc8   :  { %7063 = vmatprep.subr.msk.bf16.mxu1 %vm8194_vm2, %v7061_v61 }
 0xcc9   :  { %6672 = vmatmul.mubr.msk.f32.vlgmr.msra.gmra.mrb[14].mxu0 %vm414_vm3, %v2024_v62  ;;  %7066 = vmatpush3.bf16.xpose.msk.msra.mxu1 %vm8194_vm2, %v7061_v61 }
 0xcca   :  { %6675 = vmatpush3.msra.mxu0 %v1704_v15 }
 0xccb   :  { %6679 = vmatprep.subr.mxu0 %v1703_v16 }
 0xcd0   :  { %6708 = vmatmul.mubr.msk.f32.vlgmr.msra.gmra.mrb[18].mxu1 %vm326_vm1, %v2564_v63  ;;  %v6165_v63 = vld [vmem:[%s8865_s13] ss:$0 sm:$0xff] }
 0xcf0   :  { %v2371_v0 = vpop.xlane.xlu0 %2370 }
 0xcf1   :  { %v2375_v1 = vsub.f32 %v2367_v37, %v2371_v0 }
 0xcf3   :  { %v2377_v2 = vmul.f32 1.442695, %v2375_v1 }
 0xcf5   :  { %7475 = vpow2.f32 %v2377_v2 }
 0xcf8   :  { %v2374_v3 = vpop.xlane.xlu1 %2373 }
 0xcf9   :  { %v2376_v4 = vsub.f32 %v2368_v40, %v2374_v3 }
 0xcfb   :  { %v2379_v6 = vmul.f32 1.442695, %v2376_v4 }
 0xcfc   :  { %v7340_v12 = vpop.permute.xlu1 %7339 }
 0xcfd   :  { %7477 = vpow2.f32 %v2379_v6  ;;  %v7342_v20 = vunpack.i.h.bf16 %v7340_v12  ;;  %v7341_v32 = vunpack.i.l.bf16 %v7340_v12 }
 0xcff   :  { %v7476_v8 = vpop.eup %7475  ;;  %v7057_v23 = vpack.c.bf16 %v7342_v20, %v7341_v32  ;;  %v2903_v20 = vld [vmem:[#allocation16 + $0x8] sm:$0xff] }
 0xd00   :  { %v2381_v9 = vsel %vm414_vm3, %v7476_v8, 0.0  ;;  %v7345_v28 = vpop.permute.xlu1 %7344 }
 0xd01   :  { %2382 = vadd.xlane.f32.xlu0 %v2381_v9  ;;  %v7347_v37 = vunpack.i.h.bf16 %v7345_v28  ;;  %v7346_v38 = vunpack.i.l.bf16 %v7345_v28  ;;  %v2998_v28 = vld [vmem:[%s8874_s22 + $0x10] sm:$0xff] }
 0xd03   :  { %v7067_v43 = vpack.c.bf16 %v7347_v37, %v7346_v38 }
 0xd07   :  { %v7478_v11 = vpop.eup %7477 }
 0xd08   :  { %v2384_v14 = vsel %vm414_vm3, %v7478_v11, 0.0 }
 0xd09   :  { %2385 = vadd.xlane.f32.xlu0 %v2384_v14 }
 0xd8e   :  { %v2383_v18 = vpop.xlane.xlu0 %2382 }
 0xd8f   :  { %7479 = vrcp.f32 %v2383_v18 }
 0xd96   :  { %v2386_v35 = vpop.xlane.xlu0 %2385 }
 0xd97   :  { %v6659_v10 = vpop.f32.mrb[12].mxu0  ;;  %7481 = vrcp.f32 %v2386_v35 }
 0xd98   :  { %v1899_v19 = vpop.f32.mrb[13].mxu0 }
 0xd99   :  { %v7480_v24 = vpop.eup %7479 }
 0xd9a   :  { %v2389_v34 = vmul.f32 %v7480_v24, %v7476_v8  ;;  %v2996_v24 = vld [vmem:[%s8874_s22] sm:$0xff] }
 0xd9c   :  { %v6673_v21 = vpop.f32.mrb[14].mxu0 }
 0xd9d   :  { %v2103_v22 = vpop.f32.mrb[15].mxu0 }
 0xd9e   :  { %6676 = vmatprep.mubr.msk.f32.mxu0 %vm326_vm1, %v2103_v22  ;;  %v2905_v22 = vld [vmem:[#allocation16 + $0x18] sm:$0xff] }
 0xd9f   :  { %6677 = vmatmul.mubr.msk.f32.vlgmr.msra.gmra.mrb[16].mxu0 %vm326_vm1, %v6673_v21  ;;  %v2904_v21 = vld [vmem:[#allocation16 + $0x10] sm:$0xff] }
 0xda0   :  { %6680 = vmatpush3.msra.mxu0 %v1703_v16  ;;  %6681 = vmatprep.mubr.msk.f32.mxu0 %vm326_vm1, %v1899_v19 }
 0xda1   :  { %7058 = vmatprep.subr.bf16.mxu0 %v7057_v23  ;;  %v7482_v31 = vpop.eup %7481 }
 0xda2   :  { %v2390_v40 = vmul.f32 %v7482_v31, %v7478_v11  ;;  %v3000_v31 = vld [vmem:[%s8874_s22 + $0x20] sm:$0xff] }
 0xda3   :  { %v6709_v26 = vpop.f32.mrb[18].mxu1 }
 0xda4   :  { %v2643_v29 = vpop.f32.mrb[19].mxu1  ;;  %v2653_v13 = vmul.f32 0.35355338, %v6709_v26  ;;  %v2997_v26 = vld [vmem:[%s8874_s22 + $0x8] sm:$0xff] }
 0xda5   :  { %v2652_v30 = vmul.f32 0.35355338, %v2643_v29  ;;  %v7079_v29 = vpack.c.bf16 %v2997_v26, %v2996_v24 }
 0xda6   :  { %v2655_v42 = vadd.f32 %v2653_v13, %v8381_v54  ;;  %v2999_v13 = vld [vmem:[%s8874_s22 + $0x18] sm:$0xff] }
 0xda7   :  { %6682 = vmatmul.mubr.msk.f32.vlgmr.msra.gmra.mrb[16].mxu0 %vm326_vm1, %v6659_v10  ;;  %v2654_v39 = vadd.f32 %v2652_v30, %v8383_v57  ;;  %v7083_v30 = vpack.c.bf16 %v2999_v13, %v2998_v28  ;;  %v6174_v13 = vld [vmem:[#allocation13] ss:$0 sm:$0xff] }
 0xda8   :  { %7060 = vmatpush3.bf16.msra.mxu0 %v7057_v23  ;;  %6695 = vmatprep.mubr.msk.f32.mxu0 %vm414_vm3, %v2389_v34  ;;  %v2659_v44 = vsel %vm414_vm3, %v2655_v42, -inf  ;;  %v7075_v23 = vpack.c.bf16 %v2905_v22, %v2904_v21  ;;  %v3001_v34 = vld [vmem:[%s8874_s22 + $0x28] sm:$0xff] }
 0xda9   :  { %v2656_v41 = vsel %vm414_vm3, %v2654_v39, -inf  ;;  %6698 = vmatprep.subr.mxu0 %v1705_v36 }
 0xdaa   :  { %2657 = vmax.xlane.f32.xlu0 %v2656_v41 }
 0xdab   :  { %6696 = vmatmul.mubr.msk.f32.vlgmr.msra.gmra.mrb[18].mxu0 %vm414_vm3, %v2390_v40 }
 0xdac   :  { %6699 = vmatpush3.msra.mxu0 %v1705_v36  ;;  %v7087_v36 = vpack.c.bf16 %v3001_v34, %v3000_v31  ;;  %v6175_v31 = vld [vmem:[#allocation14] ss:$0 sm:$0xff] }
 0xdad   :  { %7068 = vmatprep.subr.bf16.mxu0 %v7067_v43 }
 0xdae   :  { %2660 = vmax.xlane.f32.xlu0 %v2659_v44  ;;  %v6166_v44 = vld [vmem:[%s8868_s16] ss:$0 sm:$0xff] }
 0xe37   :  { %v2658_v45 = vpop.xlane.xlu0 %2657 }
 0xe38   :  { %v2662_v57 = vsub.f32 %v2654_v39, %v2658_v45 }
 0xe3a   :  { %v2664_v46 = vmul.f32 1.442695, %v2662_v57  ;;  %v6167_v57 = vld [vmem:[%s8869_s17] ss:$0 sm:$0xff] }
 0xe3b   :  { %v2661_v47 = vpop.xlane.xlu0 %2660 }
 0xe3c   :  { %7483 = vpow2.f32 %v2664_v46  ;;  %v2663_v48 = vsub.f32 %v2655_v42, %v2661_v47 }
 0xe3e   :  { %v2666_v49 = vmul.f32 1.442695, %v2663_v48 }
 0xe40   :  { %7485 = vpow2.f32 %v2666_v49 }
 0xe46   :  { %v7484_v50 = vpop.eup %7483 }
 0xe47   :  { %v2668_v54 = vsel %vm414_vm3, %v7484_v50, 0.0 }
 0xe48   :  { %2669 = vadd.xlane.f32.xlu0 %v2668_v54 }
 0xe4a   :  { %v7486_v51 = vpop.eup %7485 }
 0xe4b   :  { %v2671_v52 = vsel %vm414_vm3, %v7486_v51, 0.0 }
 0xe4c   :  { %2672 = vadd.xlane.f32.xlu0 %v2671_v52  ;;  %v3003_v52 = vld [vmem:[%s8874_s22 + $0x38] sm:$0xff] }
 0xe7e   :  { %v6697_v53 = vpop.f32.mrb[18].mxu0 }
 0xe7f   :  { %v2469_v33 = vpop.f32.mrb[19].mxu0 }
 0xe80   :  { %6700 = vmatprep.mubr.msk.f32.mxu0 %vm326_vm1, %v2469_v33  ;;  %v6168_v33 = vld [vmem:[#allocation17] ss:$0 sm:$0xff] }
 0xe81   :  { %6701 = vmatmul.mubr.msk.f32.vlgmr.msra.gmra.mrb[16].mxu0 %vm326_vm1, %v6697_v53 }
 0xe82   :  { %7070 = vmatpush3.bf16.msra.mxu0 %v7067_v43 }
 0xe83   :  { %6717 = vmatprep.subr.mxu0 %v1706_v55 }
 0xed5   :  { %v2670_v56 = vpop.xlane.xlu0 %2669 }
 0xed6   :  { %7487 = vrcp.f32 %v2670_v56 }
 0xed9   :  { %v2673_v58 = vpop.xlane.xlu0 %2672 }
 0xeda   :  { %7489 = vrcp.f32 %v2673_v58 }
 0xee0   :  { %v7488_v59 = vpop.eup %7487 }
 0xee1   :  { %v2676_v60 = vmul.f32 %v7488_v59, %v7484_v50 }
 0xee3   :  { %6714 = vmatprep.mubr.msk.f32.mxu0 %vm414_vm3, %v2676_v60 }
 0xee4   :  { %v7490_v7 = vpop.eup %7489 }
 0xee5   :  { %v2677_v5 = vmul.f32 %v7490_v7, %v7486_v51  ;;  %v3002_v51 = vld [vmem:[%s8874_s22 + $0x30] sm:$0xff] }
 0xee6   :  { %v7091_v53 = vpack.c.bf16 %v3003_v52, %v3002_v51 }
 0xee7   :  { %6715 = vmatmul.mubr.msk.f32.vlgmr.msra.gmra.mrb[20].mxu0 %vm414_vm3, %v2677_v5  ;;  %v6171_v5 = vld [vmem:[%s8875_s23] ss:$0 sm:$0xff] }
 0xee8   :  { %6718 = vmatpush3.msra.mxu0 %v1706_v55 }
 0xee9   :  { %7080 = vmatprep.subr.bf16.mxu0 %v7079_v29 }
 0xfba   :  { %v6716_v61 = vpop.f32.mrb[20].mxu0 }
 0xfbb   :  { %v2756_v62 = vpop.f32.mrb[21].mxu0 }
 0xfbc   :  { %6719 = vmatprep.mubr.msk.f32.mxu0 %vm326_vm1, %v2756_v62 }
 0xfbd   :  { %6720 = vmatmul.mubr.msk.f32.vlgmr.msra.gmra.mrb[16].mxu0 %vm326_vm1, %v6716_v61 }
 0xfbe   :  { %7082 = vmatpush3.bf16.msra.mxu0 %v7079_v29 }
 0xfbf   :  { %7084 = vmatprep.subr.bf16.mxu0 %v7083_v30 }
 0xfc2   :  { %7086 = vmatpush3.bf16.msra.mxu0 %v7083_v30 }
 0xfc3   :  { %7088 = vmatprep.subr.bf16.mxu0 %v7087_v36 }
 0xfc6   :  { %7090 = vmatpush3.bf16.msra.mxu0 %v7087_v36 }
 0xfc7   :  { %7092 = vmatprep.subr.bf16.mxu0 %v7091_v53 }
 0xfca   :  { %7094 = vmatpush3.bf16.msra.mxu0 %v7091_v53 }
0x1090   :  { %v6721_v0 = vpop.f32.mrb[16].mxu0 }
0x1091   :  { %v2855_v1 = vadd.f32 %v6721_v0, %v6165_v63  ;;  %v2837_v2 = vpop.f32.mrb[17].mxu0 }
0x1092   :  { %v2854_v3 = vadd.f32 %v6165_v63, %v2837_v2 }
0x1093   :  { %v2857_v4 = vadd.f32 %v2855_v1, %v8333_v27 }
0x1094   :  { %v2856_v6 = vadd.f32 %v2854_v3, %v8329_v25  ;;  %v2902_v25 = vld [vmem:[#allocation16] sm:$0xff] }
0x1095   :  { %v2863_v8 = vsel %vm233_vm0, %v2857_v4, 0.0  ;;  %v7071_v32 = vpack.c.bf16 %v2903_v20, %v2902_v25  ;;  %v6178_v25 = vld [vmem:[%s8914_s0 + $0x30] sm:$0xff]  ;;  %v6179_v20 = vld [vmem:[%s8914_s0 + $0x38] sm:$0xff] }
0x1096   :  { %2864 = vadd.xlane.f32.xlu1 %v2863_v8  ;;  %v2860_v9 = vsel %vm233_vm0, %v2856_v6, 0.0 }
0x1097   :  { %2861 = vadd.xlane.f32.xlu0 %v2860_v9  ;;  %7072 = vmatprep.subr.bf16.mxu1 %v7071_v32 }
0x1098   :  { %7074 = vmatpush3.bf16.msra.mxu1 %v7071_v32  ;;  %v7099_v32 = vpack.c.bf16 %v6179_v20, %v6178_v25 }
0x1099   :  { %7076 = vmatprep.subr.bf16.mxu1 %v7075_v23 }
0x109c   :  { %7078 = vmatpush3.bf16.msra.mxu1 %v7075_v23 }
0x1123   :  { %v2865_v11 = vpop.xlane.xlu1 %2864 }
0x1124   :  { %v2867_v14 = vmul.f32 0.03125, %v2865_v11  ;;  %v2862_v15 = vpop.xlane.xlu0 %2861 }
0x1125   :  { %v2866_v16 = vmul.f32 0.03125, %v2862_v15 }
0x1126   :  { %v2869_v18 = vsub.f32 %v2857_v4, %v2867_v14 }
0x1127   :  { %v2868_v10 = vsub.f32 %v2856_v6, %v2866_v16 }
0x1128   :  { %v2871_v35 = vmul.f32 %v2869_v18, %v2869_v18 }
0x1129   :  { %v2870_v12 = vmul.f32 %v2868_v10, %v2868_v10 }
0x112a   :  { %v2875_v27 = vsel %vm233_vm0, %v2871_v35, 0.0  ;;  %v6177_v35 = vld [vmem:[%s8914_s0 + $0x28] sm:$0xff] }
0x112b   :  { %v2872_v19 = vsel %vm233_vm0, %v2870_v12, 0.0 }
0x112c   :  { %2873 = vadd.xlane.f32.xlu0 %v2872_v19  ;;  %v6176_v19 = vld [vmem:[%s8914_s0 + $0x20] sm:$0xff] }
0x1130   :  { %2876 = vadd.xlane.f32.xlu0 %v2875_v27  ;;  %v7095_v27 = vpack.c.bf16 %v6177_v35, %v6176_v19 }
0x1132   :  { %7096 = vmatprep.subr.bf16.mxu1 %v7095_v27 }
0x11b9   :  { %v2874_v37 = vpop.xlane.xlu0 %2873 }
0x11ba   :  { %v2878_v38 = vmul.f32 0.03125, %v2874_v37 }
0x11bc   :  { %v2880_v39 = vadd.f32 1e-05, %v2878_v38 }
0x11bd   :  { %v2877_v40 = vpop.xlane.xlu0 %2876 }
0x11be   :  { %7491 = vrsqrt.f32 %v2880_v39  ;;  %v2879_v41 = vmul.f32 0.03125, %v2877_v40 }
0x11c0   :  { %v2881_v42 = vadd.f32 1e-05, %v2879_v41  ;;  %v6181_v41 = vld [vmem:[%s8915_s25 + $0x1] ss:$0 sm:$0xff]  ;;  %s8921_s25 = smov 104  }
0x11c2   :  { %7493 = vrsqrt.f32 %v2881_v42 }
0x11c8   :  { %v7492_v43 = vpop.eup %7491 }
0x11c9   :  { %v2884_v45 = vmul.f32 %v7492_v43, %v2868_v10 }
0x11cb   :  { %v2892_v46 = vmul.f32 %v6166_v44, %v2884_v45 }
0x11cc   :  { %v7494_v47 = vpop.eup %7493 }
0x11cd   :  { %v2885_v48 = vmul.f32 %v7494_v47, %v2869_v18  ;;  %v2900_v49 = vadd.f32 %v6167_v57, %v2892_v46 }
0x11cf   :  { %v2893_v50 = vmul.f32 %v6166_v44, %v2885_v48  ;;  %6730 = vmatprep.mubr.msk.f32.mxu1 %vm233_vm0, %v2900_v49 }
0x11d1   :  { %v2901_v54 = vadd.f32 %v6167_v57, %v2893_v50 }
0x11d3   :  { %6731 = vmatmul.mubr.msk.f32.vlgmr.msra.gmra.mrb[20].mxu1 %vm233_vm0, %v2901_v54 }
0x11d4   :  { %7098 = vmatpush3.bf16.msra.mxu1 %v7095_v27 }
0x11d5   :  { %7100 = vmatprep.subr.bf16.mxu1 %v7099_v32 }
0x11d8   :  { %7102 = vmatpush3.bf16.msra.mxu1 %v7099_v32 }
0x12a6   :  { %v6732_v55 = vpop.f32.mrb[20].mxu1 }
0x12a7   :  { %v2991_v56 = vadd.f32 %v6732_v55, %v6168_v33  ;;  %v2985_v58 = vpop.f32.mrb[21].mxu1 }
0x12a8   :  { %v2986_v59 = vadd.f32 %v6168_v33, %v2985_v58 }
0x12a9   :  { %v2995_v7 = vmax.f32 %v2991_v56, 0.0 }
0x12aa   :  { %v2994_v60 = vmax.f32 %v2986_v59, 0.0 }
0x12ac   :  { %6749 = vmatprep.mubr.msk.f32.mxu0 %vm3011_vm4, %v2994_v60 }
0x12ad   :  { %6750 = vmatmul.mubr.msk.f32.vlgmr.msra.gmra.mrb[22].mxu0 %vm3011_vm4, %v2995_v7 }
0x1380   :  { %v6751_v61 = vpop.f32.mrb[22].mxu0 }
0x1381   :  { %v3084_v62 = vpop.f32.mrb[23].mxu0  ;;  %v3090_v63 = vadd.f32 %v6751_v61, %v6171_v5 }
0x1382   :  { %v3085_v0 = vadd.f32 %v6171_v5, %v3084_v62 }
0x1383   :  { %v3094_v3 = vadd.f32 %v3090_v63, %v2901_v54 }
0x1384   :  { %v3093_v1 = vadd.f32 %v3085_v0, %v2900_v49  ;;  %v8560_v0 = vld [vmem:[#allocation7 + $0x8] sm:$0xff] }
0x1385   :  { %v3100_v4 = vsel %vm233_vm0, %v3094_v3, 0.0 }
0x1386   :  { %v3097_v2 = vsel %vm233_vm0, %v3093_v1, 0.0 }
0x1387   :  { %3098 = vadd.xlane.f32.xlu0 %v3097_v2  ;;  %v8563_v2 = vld [vmem:[#allocation7] sm:$0xff] }
0x138b   :  { %3101 = vadd.xlane.f32.xlu0 %v3100_v4 }
0x1414   :  { %v3099_v6 = vpop.xlane.xlu0 %3098 }
0x1415   :  { %v3103_v8 = vmul.f32 0.03125, %v3099_v6 }
0x1417   :  { %v3105_v9 = vsub.f32 %v3093_v1, %v3103_v8 }
0x1418   :  { %v3102_v11 = vpop.xlane.xlu0 %3101 }
0x1419   :  { %v3104_v14 = vmul.f32 0.03125, %v3102_v11  ;;  %v3107_v15 = vmul.f32 %v3105_v9, %v3105_v9 }
0x141b   :  { %v3106_v16 = vsub.f32 %v3094_v3, %v3104_v14  ;;  %v3109_v18 = vsel %vm233_vm0, %v3107_v15, 0.0 }
0x141c   :  { %3110 = vadd.xlane.f32.xlu0 %v3109_v18 }
0x141d   :  { %v3108_v10 = vmul.f32 %v3106_v16, %v3106_v16 }
0x141f   :  { %v3112_v12 = vsel %vm233_vm0, %v3108_v10, 0.0 }
0x1420   :  { %3113 = vadd.xlane.f32.xlu0 %v3112_v12 }
0x14a9   :  { %v3111_v21 = vpop.xlane.xlu0 %3110 }
0x14aa   :  { %v3115_v22 = vmul.f32 0.03125, %v3111_v21 }
0x14ac   :  { %v3117_v23 = vadd.f32 1e-05, %v3115_v22 }
0x14ad   :  { %v3114_v24 = vpop.xlane.xlu0 %3113 }
0x14ae   :  { %7495 = vrsqrt.f32 %v3117_v23  ;;  %v3116_v26 = vmul.f32 0.03125, %v3114_v24 }
0x14b0   :  { %v3118_v28 = vadd.f32 1e-05, %v3116_v26 }
0x14b2   :  { %7497 = vrsqrt.f32 %v3118_v28 }
0x14b8   :  { %v7496_v29 = vpop.eup %7495 }
0x14b9   :  { %v3121_v30 = vmul.f32 %v7496_v29, %v3105_v9 }
0x14bb   :  { %v3129_v34 = vmul.f32 %v6174_v13, %v3121_v30 }
0x14bc   :  { %v7498_v36 = vpop.eup %7497 }
0x14bd   :  { %v3122_v37 = vmul.f32 %v7498_v36, %v3106_v16  ;;  %v8507_v38 = vadd.f32 %v6175_v31, %v3129_v34 }
0x14bf   :  { %v3130_v39 = vmul.f32 %v6174_v13, %v3122_v37  ;;  %6760 = vmatprep.mubr.msk.f32.mxu1 %vm233_vm0, %v8507_v38 }
0x14c1   :  { %v8511_v40 = vadd.f32 %v6175_v31, %v3130_v39 }
0x14c3   :  { %6761 = vmatmul.mubr.msk.f32.vlgmr.msra.gmra.mrb[22].mxu1 %vm233_vm0, %v8511_v40 }
0x1596   :  { %v6762_v42 = vpop.f32.mrb[22].mxu1 }
0x1597   :  { %v8518_v43 = vadd.f32 %v6762_v42, %v6181_v41  ;;  %v3224_v44 = vpop.f32.mrb[23].mxu1 }
0x1598   :  { %v8520_v45 = vadd.f32 %v6181_v41, %v3224_v44 }
0x159a   :  { %6767 = vmatprep.mubr.msk.f32.mxu1 %vm326_vm1, %v8520_v45  ;;  %v8526_v57 = vpack.i.bf16 %v8518_v43, %v8520_v45 }
0x159c   :  { %7354 = vrot.lane.b32.xlu1 %v8526_v57, %s7853_s8  ;;  %7349 = vrot.lane.b32.xlu0 %v8526_v57, %s7852_s3 }
0x15a0   :  { %7359 = vrot.lane.b32.xlu1 %v8526_v57, %s7855_s19  ;;  %3442 = vrot.lane.b32.xlu0 %v8520_v45, %s7851_s26 }
0x15a4   :  { %3810 = vrot.lane.b32.xlu1 %v8518_v43, %s7854_s6  ;;  %3444 = vrot.lane.b32.xlu0 %v8518_v43, %s7851_s26 }
0x15a8   :  { %3808 = vrot.lane.b32.xlu0 %v8520_v45, %s7854_s6 }
0x160e   :  { %v7355_v46 = vpop.permute.xlu1 %7354  ;;  %v7350_v47 = vpop.permute.xlu0 %7349 }
0x160f   :  { %v7357_v48 = vunpack.i.h.bf16 %v7355_v46  ;;  %v7356_v49 = vunpack.i.l.bf16 %v7355_v46  ;;  %v7352_v50 = vunpack.i.h.bf16 %v7350_v47  ;;  %v7351_v54 = vunpack.i.l.bf16 %v7350_v47 }
0x1611   :  { %v7103_v51 = vpack.c.bf16 %v7352_v50, %v7351_v54  ;;  %v7113_v52 = vpack.c.bf16 %v7357_v48, %v7356_v49 }
0x1612   :  { %v7360_v53 = vpop.permute.xlu1 %7359  ;;  %v3443_v56 = vpop.permute.xlu0 %3442 }
0x1613   :  { %7105 = vmatprep.subr.msk.bf16.mxu1 %vm8194_vm2, %v7103_v51  ;;  %v7362_v33 = vunpack.i.h.bf16 %v7360_v53  ;;  %v7361_v55 = vunpack.i.l.bf16 %v7360_v53 }
0x1614   :  { %7108 = vmatpush3.bf16.xpose.msk.msra.mxu1 %vm8194_vm2, %v7103_v51 }
0x1615   :  { %7115 = vmatprep.subr.msk.bf16.mxu1 %vm8194_vm2, %v7113_v52  ;;  %v7123_v58 = vpack.c.bf16 %v7362_v33, %v7361_v55 }
0x1616   :  { %v3445_v59 = vpop.permute.xlu0 %3444  ;;  %v3811_v7 = vpop.permute.xlu1 %3810 }
0x161a   :  { %v3809_v60 = vpop.permute.xlu0 %3808 }
0x161b   :  { %6768 = vmatmul.mubr.msk.f32.vlgmr.msra.gmra.mrb[24].mxu1 %vm326_vm1, %v8518_v43 }
0x161c   :  { %7118 = vmatpush3.bf16.xpose.msk.msra.mxu1 %vm8194_vm2, %v7113_v52  ;;  %6781 = vmatprep.mubr.msk.f32.mxu1 %vm326_vm1, %v3443_v56 }
0x161d   :  { %7125 = vmatprep.subr.msk.bf16.mxu1 %vm8194_vm2, %v7123_v58 }
0x1623   :  { %6782 = vmatmul.mubr.msk.f32.vlgmr.msra.gmra.mrb[26].mxu1 %vm326_vm1, %v3445_v59 }
0x1624   :  { %7128 = vmatpush3.bf16.xpose.msk.msra.mxu1 %vm8194_vm2, %v7123_v58  ;;  %6805 = vmatprep.mubr.msk.f32.mxu1 %vm326_vm1, %v3809_v60 }
0x162b   :  { %6806 = vmatmul.mubr.msk.f32.vlgmr.msra.gmra.mrb[28].mxu1 %vm326_vm1, %v3811_v7 }
0x16ee   :  { %v6769_v5 = vpop.f32.mrb[24].mxu1 }
0x16ef   :  { %v3330_v61 = vmul.f32 0.35355338, %v6769_v5  ;;  %v3320_v62 = vpop.f32.mrb[25].mxu1 }
0x16f0   :  { %v3329_v63 = vmul.f32 0.35355338, %v3320_v62 }
0x16f1   :  { %v3332_v1 = vadd.f32 %v8560_v0, %v3330_v61 }
0x16f2   :  { %v3331_v3 = vadd.f32 %v8563_v2, %v3329_v63 }
0x16f3   :  { %v3336_v4 = vsel %vm414_vm3, %v3332_v1, -inf }
0x16f4   :  { %3337 = vmax.xlane.f32.xlu1 %v3336_v4  ;;  %v3333_v6 = vsel %vm414_vm3, %v3331_v3, -inf }
0x16f5   :  { %3334 = vmax.xlane.f32.xlu0 %v3333_v6 }
0x16f6   :  { %v6783_v8 = vpop.f32.mrb[26].mxu1 }
0x16f7   :  { %v3524_v9 = vpop.f32.mrb[27].mxu1  ;;  %v3534_v11 = vmul.f32 0.35355338, %v6783_v8 }
0x16f8   :  { %v3533_v14 = vmul.f32 0.35355338, %v3524_v9 }
0x16f9   :  { %v3536_v16 = vadd.f32 %v8560_v0, %v3534_v11 }
0x16fa   :  { %v3535_v15 = vadd.f32 %v8563_v2, %v3533_v14 }
0x16fb   :  { %v3540_v19 = vsel %vm414_vm3, %v3536_v16, -inf }
0x16fc   :  { %v3537_v18 = vsel %vm414_vm3, %v3535_v15, -inf }
0x16fd   :  { %3538 = vmax.xlane.f32.xlu0 %v3537_v18 }
0x16fe   :  { %v6807_v10 = vpop.f32.mrb[28].mxu1 }
0x16ff   :  { %v3890_v12 = vpop.f32.mrb[29].mxu1  ;;  %v3900_v42 = vmul.f32 0.35355338, %v6807_v10 }
0x1700   :  { %v3899_v44 = vmul.f32 0.35355338, %v3890_v12 }
0x1701   :  { %3541 = vmax.xlane.f32.xlu0 %v3540_v19  ;;  %v3902_v46 = vadd.f32 %v8560_v0, %v3900_v42 }
0x1702   :  { %v3901_v47 = vadd.f32 %v8563_v2, %v3899_v44 }
0x1703   :  { %v3906_v49 = vsel %vm414_vm3, %v3902_v46, -inf }
0x1704   :  { %v3903_v48 = vsel %vm414_vm3, %v3901_v47, -inf }
0x1781   :  { %v3338_v35 = vpop.xlane.xlu1 %3337 }
0x1782   :  { %v3340_v27 = vsub.f32 %v3332_v1, %v3338_v35  ;;  %v3335_v25 = vpop.xlane.xlu0 %3334 }
0x1783   :  { %v3339_v20 = vsub.f32 %v3331_v3, %v3335_v25 }
0x1784   :  { %v3343_v32 = vmul.f32 1.442695, %v3340_v27 }
0x1785   :  { %v3341_v21 = vmul.f32 1.442695, %v3339_v20 }
0x1786   :  { %7499 = vpow2.f32 %v3343_v32  ;;  %v6185_v32 = vld [vmem:[%s8918_s2 + $0x28] sm:$0xff] }
0x1787   :  { %7501 = vpow2.f32 %v3341_v21  ;;  %v6184_v21 = vld [vmem:[%s8918_s2 + $0x20] sm:$0xff] }
0x178a   :  { %v3539_v22 = vpop.xlane.xlu0 %3538 }
0x178b   :  { %v3543_v23 = vsub.f32 %v3535_v15, %v3539_v22 }
0x178d   :  { %v3545_v24 = vmul.f32 1.442695, %v3543_v23 }
0x178e   :  { %v3542_v26 = vpop.xlane.xlu0 %3541 }
0x178f   :  { %7503 = vpow2.f32 %v3545_v24  ;;  %v3544_v28 = vsub.f32 %v3536_v16, %v3542_v26 }
0x1790   :  { %v7500_v29 = vpop.eup %7499 }
0x1791   :  { %v7502_v13 = vpop.eup %7501  ;;  %v3547_v30 = vmul.f32 1.442695, %v3544_v28  ;;  %v3348_v31 = vsel %vm414_vm3, %v7500_v29, 0.0 }
0x1792   :  { %3349 = vadd.xlane.f32.xlu0 %v3348_v31  ;;  %v3345_v34 = vsel %vm414_vm3, %v7502_v13, 0.0 }
0x1793   :  { %7505 = vpow2.f32 %v3547_v30  ;;  %3346 = vadd.xlane.f32.xlu1 %v3345_v34 }
0x1799   :  { %v7504_v36 = vpop.eup %7503 }
0x179a   :  { %v3549_v37 = vsel %vm414_vm3, %v7504_v36, 0.0 }
0x179b   :  { %3550 = vadd.xlane.f32.xlu1 %v3549_v37 }
0x179d   :  { %v7506_v39 = vpop.eup %7505 }
0x179e   :  { %v3552_v41 = vsel %vm414_vm3, %v7506_v39, 0.0 }
0x179f   :  { %3553 = vadd.xlane.f32.xlu0 %v3552_v41 }
0x17ac   :  { %7364 = vrot.lane.b32.xlu1 %v8526_v57, %s7858_s7  ;;  %s8923_s7 = smov 48  }
0x17b0   :  { %7374 = vrot.lane.b32.xlu1 %v8526_v57, %s7857_s20 }
0x17b4   :  { %4095 = vrot.lane.b32.xlu1 %v8520_v45, %s8921_s25 }
0x17b5   :  { %7369 = vrot.lane.b32.xlu0 %v8526_v57, %s8922_s18 }
0x17b9   :  { %4097 = vrot.lane.b32.xlu0 %v8518_v43, %s8921_s25 }
0x17d8   :  { %3904 = vmax.xlane.f32.xlu1 %v3903_v48  ;;  %3907 = vmax.xlane.f32.xlu0 %v3906_v49 }
0x181f   :  { %v3350_v45 = vpop.xlane.xlu0 %3349 }
0x1820   :  { %v3347_v50 = vpop.xlane.xlu1 %3346 }
0x1821   :  { %7507 = vrcp.f32 %v3347_v50 }
0x1822   :  { %7509 = vrcp.f32 %v3350_v45 }
0x1828   :  { %v3551_v54 = vpop.xlane.xlu1 %3550 }
0x1829   :  { %7511 = vrcp.f32 %v3551_v54 }
0x182b   :  { %v7508_v51 = vpop.eup %7507 }
0x182c   :  { %v7365_v43 = vpop.permute.xlu1 %7364  ;;  %v3554_v52 = vpop.xlane.xlu0 %3553  ;;  %v3353_v53 = vmul.f32 %v7508_v51, %v7502_v13 }
0x182d   :  { %v7367_v33 = vunpack.i.h.bf16 %v7365_v43  ;;  %v7366_v55 = vunpack.i.l.bf16 %v7365_v43  ;;  %7513 = vrcp.f32 %v3554_v52  ;;  %v7510_v58 = vpop.eup %7509 }
0x182e   :  { %6774 = vmatprep.mubr.msk.f32.mxu0 %vm414_vm3, %v3353_v53  ;;  %v3354_v1 = vmul.f32 %v7510_v58, %v7500_v29 }
0x182f   :  { %v7109_v56 = vpack.c.bf16 %v7367_v33, %v7366_v55 }
0x1830   :  { %v7375_v59 = vpop.permute.xlu1 %7374  ;;  %v7370_v60 = vpop.permute.xlu0 %7369 }
0x1831   :  { %v7377_v7 = vunpack.i.h.bf16 %v7375_v59  ;;  %v7376_v5 = vunpack.i.l.bf16 %v7375_v59  ;;  %v7372_v61 = vunpack.i.h.bf16 %v7370_v60  ;;  %v7371_v62 = vunpack.i.l.bf16 %v7370_v60  ;;  %7110 = vmatprep.subr.bf16.mxu0 %v7109_v56 }
0x1832   :  { %7112 = vmatpush3.bf16.msra.mxu0 %v7109_v56 }
0x1833   :  { %v7512_v63 = vpop.eup %7511  ;;  %v7133_v3 = vpack.c.bf16 %v7377_v7, %v7376_v5  ;;  %v7119_v4 = vpack.c.bf16 %v7372_v61, %v7371_v62 }
0x1834   :  { %v4096_v6 = vpop.permute.xlu1 %4095  ;;  %v3557_v8 = vmul.f32 %v7512_v63, %v7504_v36  ;;  %v4098_v14 = vpop.permute.xlu0 %4097 }
0x1835   :  { %6775 = vmatmul.mubr.msk.f32.vlgmr.msra.gmra.mrb[24].mxu0 %vm414_vm3, %v3354_v1  ;;  %7120 = vmatprep.subr.bf16.mxu0 %v7119_v4 }
0x1836   :  { %7135 = vmatprep.subr.msk.bf16.mxu1 %vm8194_vm2, %v7133_v3  ;;  %6824 = vmatprep.mubr.msk.f32.mxu1 %vm326_vm1, %v4096_v6 }
0x1837   :  { %v7514_v9 = vpop.eup %7513  ;;  %7122 = vmatpush3.bf16.msra.mxu0 %v7119_v4  ;;  %6788 = vmatprep.mubr.msk.f32.mxu0 %vm414_vm3, %v3557_v8 }
0x1838   :  { %v3558_v11 = vmul.f32 %v7514_v9, %v7506_v39  ;;  %7138 = vmatpush3.bf16.xpose.msk.msra.mxu1 %vm8194_vm2, %v7133_v3  ;;  %6791 = vmatprep.subr.mxu0 %v6185_v32  ;;  %v6187_v3 = vld [vmem:[%s8918_s2 + $0x38] sm:$0xff] }
0x183a   :  { %6789 = vmatmul.mubr.msk.f32.vlgmr.msra.gmra.mrb[26].mxu0 %vm414_vm3, %v3558_v11 }
0x183b   :  { %6792 = vmatpush3.msra.mxu0 %v6185_v32 }
0x183c   :  { %6796 = vmatprep.subr.mxu0 %v6184_v21 }
0x183f   :  { %6825 = vmatmul.mubr.msk.f32.vlgmr.msra.gmra.mrb[30].mxu1 %vm326_vm1, %v4098_v14  ;;  %v7577_v14 = vld [vmem:[#allocation5] sm:$0xff] }
0x1865   :  { %v3905_v15 = vpop.xlane.xlu1 %3904  ;;  %v3908_v16 = vpop.xlane.xlu0 %3907 }
0x1866   :  { %v3909_v18 = vsub.f32 %v3901_v47, %v3905_v15  ;;  %v3910_v10 = vsub.f32 %v3902_v46, %v3908_v16  ;;  %v6221_v15 = vld [vmem:[%s8919_s30 + $0x1] ss:$0 sm:$0xff] }
0x1868   :  { %v3911_v12 = vmul.f32 1.442695, %v3909_v18  ;;  %v3913_v19 = vmul.f32 1.442695, %v3910_v10 }
0x186a   :  { %7515 = vpow2.f32 %v3911_v12 }
0x186b   :  { %7517 = vpow2.f32 %v3913_v19 }
0x1874   :  { %v7516_v35 = vpop.eup %7515 }
0x1875   :  { %v7518_v27 = vpop.eup %7517  ;;  %v3915_v25 = vsel %vm414_vm3, %v7516_v35, 0.0 }
0x1876   :  { %3916 = vadd.xlane.f32.xlu0 %v3915_v25  ;;  %v3918_v20 = vsel %vm414_vm3, %v7518_v27, 0.0 }
0x1877   :  { %3919 = vadd.xlane.f32.xlu1 %v3918_v20 }
0x188c   :  { %7379 = vrot.lane.b32.xlu0 %v8526_v57, %s8923_s7 }
0x1903   :  { %v3917_v22 = vpop.xlane.xlu0 %3916 }
0x1904   :  { %v3920_v28 = vpop.xlane.xlu1 %3919  ;;  %7519 = vrcp.f32 %v3917_v22 }
0x1905   :  { %7521 = vrcp.f32 %v3920_v28 }
0x1907   :  { %v7380_v24 = vpop.permute.xlu0 %7379 }
0x1908   :  { %v6776_v23 = vpop.f32.mrb[24].mxu0  ;;  %v7382_v29 = vunpack.i.h.bf16 %v7380_v24  ;;  %v7381_v13 = vunpack.i.l.bf16 %v7380_v24 }
0x1909   :  { %v3433_v26 = vpop.f32.mrb[25].mxu0 }
0x190a   :  { %v7129_v34 = vpack.c.bf16 %v7382_v29, %v7381_v13  ;;  %v4534_v13 = vld [vmem:[#allocation10 + $0x28] sm:$0xff] }
0x190d   :  { %v6790_v30 = vpop.f32.mrb[26].mxu0 }
0x190e   :  { %v3637_v31 = vpop.f32.mrb[27].mxu0  ;;  %v7520_v42 = vpop.eup %7519 }
0x190f   :  { %6793 = vmatprep.mubr.msk.f32.mxu0 %vm326_vm1, %v3637_v31  ;;  %v7522_v46 = vpop.eup %7521  ;;  %v3923_v48 = vmul.f32 %v7520_v42, %v7516_v35  ;;  %v4535_v31 = vld [vmem:[#allocation10 + $0x30] sm:$0xff] }
0x1910   :  { %6794 = vmatmul.mubr.msk.f32.vlgmr.msra.gmra.mrb[28].mxu0 %vm326_vm1, %v6790_v30  ;;  %v3924_v50 = vmul.f32 %v7522_v46, %v7518_v27  ;;  %v6229_v46 = vld [vmem:[%s8920_s21 + $0x38] sm:$0xff] }
0x1911   :  { %6797 = vmatpush3.msra.mxu0 %v6184_v21  ;;  %6798 = vmatprep.mubr.msk.f32.mxu0 %vm326_vm1, %v3433_v26 }
0x1912   :  { %v6826_v36 = vpop.f32.mrb[30].mxu1  ;;  %7130 = vmatprep.subr.bf16.mxu0 %v7129_v34 }
0x1913   :  { %v4177_v37 = vpop.f32.mrb[31].mxu1  ;;  %v4187_v39 = vmul.f32 0.35355338, %v6826_v36 }
0x1914   :  { %v4186_v41 = vmul.f32 0.35355338, %v4177_v37  ;;  %v7578_v37 = vld [vmem:[#allocation5 + $0x8] sm:$0xff] }
0x1915   :  { %v4189_v49 = vadd.f32 %v8560_v0, %v4187_v39  ;;  %v6226_v39 = vld [vmem:[%s8920_s21 + $0x20] sm:$0xff] }
0x1916   :  { %v4188_v44 = vadd.f32 %v8563_v2, %v4186_v41  ;;  %v6186_v2 = vld [vmem:[%s8918_s2 + $0x30] sm:$0xff]  ;;  %v6227_v41 = vld [vmem:[%s8920_s21 + $0x28] sm:$0xff] }
0x1917   :  { %v4193_v45 = vsel %vm414_vm3, %v4189_v49, -inf  ;;  %v7143_v42 = vpack.c.bf16 %v6227_v41, %v6226_v39 }
0x1918   :  { %v4190_v47 = vsel %vm414_vm3, %v4188_v44, -inf  ;;  %6799 = vmatmul.mubr.msk.f32.vlgmr.msra.gmra.mrb[28].mxu0 %vm326_vm1, %v6776_v23 }
0x1919   :  { %4191 = vmax.xlane.f32.xlu1 %v4190_v47  ;;  %7132 = vmatpush3.bf16.msra.mxu0 %v7129_v34  ;;  %v4536_v34 = vld [vmem:[#allocation10 + $0x38] sm:$0xff] }
0x191a   :  { %6812 = vmatprep.mubr.msk.f32.mxu0 %vm414_vm3, %v3923_v48  ;;  %6815 = vmatprep.subr.mxu0 %v6186_v2  ;;  %v7155_v36 = vpack.c.bf16 %v4536_v34, %v4535_v31 }
0x191b   :  { %7144 = vmatprep.subr.bf16.mxu1 %v7143_v42 }
0x191c   :  { %6813 = vmatmul.mubr.msk.f32.vlgmr.msra.gmra.mrb[30].mxu0 %vm414_vm3, %v3924_v50  ;;  %7146 = vmatpush3.bf16.msra.mxu1 %v7143_v42 }
0x191d   :  { %4194 = vmax.xlane.f32.xlu1 %v4193_v45  ;;  %6816 = vmatpush3.msra.mxu0 %v6186_v2 }
0x19a6   :  { %v4192_v54 = vpop.xlane.xlu1 %4191 }
0x19a7   :  { %v4196_v51 = vsub.f32 %v4188_v44, %v4192_v54  ;;  %v6228_v44 = vld [vmem:[%s8920_s21 + $0x30] sm:$0xff] }
0x19a8   :  { %v7147_v47 = vpack.c.bf16 %v6229_v46, %v6228_v44 }
0x19a9   :  { %v4198_v52 = vmul.f32 1.442695, %v4196_v51 }
0x19aa   :  { %v4195_v43 = vpop.xlane.xlu1 %4194  ;;  %7148 = vmatprep.subr.bf16.mxu1 %v7147_v47 }
0x19ab   :  { %v4197_v0 = vsub.f32 %v4189_v49, %v4195_v43  ;;  %7150 = vmatpush3.bf16.msra.mxu1 %v7147_v47  ;;  %v6224_v43 = vld [vmem:[%s8866_s14 + $0x1] ss:$0 sm:$0xff] }
0x19ad   :  { %v4200_v53 = vmul.f32 1.442695, %v4197_v0 }
0x19af   :  { %7523 = vpow2.f32 %v4200_v53 }
0x19b0   :  { %7525 = vpow2.f32 %v4198_v52  ;;  %v6225_v52 = vld [vmem:[%s8867_s15 + $0x1] ss:$0 sm:$0xff] }
0x19b9   :  { %v7524_v33 = vpop.eup %7523 }
0x19ba   :  { %v4205_v55 = vsel %vm414_vm3, %v7524_v33, 0.0  ;;  %v7526_v56 = vpop.eup %7525 }
0x19bb   :  { %4206 = vadd.xlane.f32.xlu1 %v4205_v55  ;;  %v4202_v58 = vsel %vm414_vm3, %v7526_v56, 0.0 }
0x19bf   :  { %4203 = vadd.xlane.f32.xlu1 %v4202_v58 }
0x19d0   :  { %7384 = vrot.lane.b32.xlu1 %v8526_v57, %s8924_s4 }
0x19ef   :  { %v6814_v59 = vpop.f32.mrb[30].mxu0 }
0x19f0   :  { %v4003_v60 = vpop.f32.mrb[31].mxu0 }
0x19f1   :  { %6817 = vmatprep.mubr.msk.f32.mxu0 %vm326_vm1, %v4003_v60  ;;  %v6235_v60 = vld [vmem:[%s8863_s11 + $0x1] ss:$0 sm:$0xff] }
0x19f2   :  { %6818 = vmatmul.mubr.msk.f32.vlgmr.msra.gmra.mrb[28].mxu0 %vm326_vm1, %v6814_v59 }
0x1a48   :  { %v4207_v7 = vpop.xlane.xlu1 %4206 }
0x1a49   :  { %7527 = vrcp.f32 %v4207_v7 }
0x1a4c   :  { %v4204_v5 = vpop.xlane.xlu1 %4203 }
0x1a4d   :  { %7529 = vrcp.f32 %v4204_v5 }
0x1a50   :  { %v7385_v61 = vpop.permute.xlu1 %7384 }
0x1a51   :  { %v7387_v62 = vunpack.i.h.bf16 %v7385_v61  ;;  %v7386_v63 = vunpack.i.l.bf16 %v7385_v61 }
0x1a53   :  { %v7139_v1 = vpack.c.bf16 %v7387_v62, %v7386_v63  ;;  %v7528_v57 = vpop.eup %7527 }
0x1a54   :  { %v4211_v8 = vmul.f32 %v7528_v57, %v7524_v33 }
0x1a55   :  { %7140 = vmatprep.subr.bf16.mxu0 %v7139_v1 }
0x1a56   :  { %7142 = vmatpush3.bf16.msra.mxu0 %v7139_v1 }
0x1a57   :  { %v7530_v4 = vpop.eup %7529  ;;  %6834 = vmatprep.subr.mxu0 %v6187_v3 }
0x1a58   :  { %v4210_v6 = vmul.f32 %v7530_v4, %v7526_v56 }
0x1a5a   :  { %6831 = vmatprep.mubr.msk.f32.mxu0 %vm414_vm3, %v4210_v6 }
0x1a5b   :  { %6832 = vmatmul.mubr.msk.f32.vlgmr.msra.gmra.mrb[32].mxu0 %vm414_vm3, %v4211_v8  ;;  %v6231_v8 = vld [vmem:[%s8861_s9 + $0x1] ss:$0 sm:$0xff] }
0x1a5c   :  { %6835 = vmatpush3.msra.mxu0 %v6187_v3 }
0x1b2e   :  { %v6833_v9 = vpop.f32.mrb[32].mxu0 }
0x1b2f   :  { %v4290_v11 = vpop.f32.mrb[33].mxu0 }
0x1b30   :  { %6836 = vmatprep.mubr.msk.f32.mxu0 %vm326_vm1, %v4290_v11 }
0x1b31   :  { %6837 = vmatmul.mubr.msk.f32.vlgmr.msra.gmra.mrb[28].mxu0 %vm326_vm1, %v6833_v9 }
0x1b32   :  { %6858 = vmatprep.mubr.msk.f32.mxu0 %vm233_vm0, %v7577_v14 }
0x1c04   :  { %v6838_v16 = vpop.f32.mrb[28].mxu0 }
0x1c05   :  { %v4389_v18 = vadd.f32 %v6838_v16, %v6221_v15  ;;  %v4371_v10 = vpop.f32.mrb[29].mxu0 }
0x1c06   :  { %v4388_v12 = vadd.f32 %v6221_v15, %v4371_v10 }
0x1c07   :  { %v4391_v19 = vadd.f32 %v4389_v18, %v8511_v40 }
0x1c08   :  { %v4390_v35 = vadd.f32 %v4388_v12, %v8507_v38  ;;  %v4533_v38 = vld [vmem:[#allocation10 + $0x20] sm:$0xff] }
0x1c09   :  { %v4399_v27 = vsel %vm233_vm0, %v4391_v19, 0.0  ;;  %v7151_v30 = vpack.c.bf16 %v4534_v13, %v4533_v38 }
0x1c0a   :  { %4400 = vadd.xlane.f32.xlu1 %v4399_v27  ;;  %v4396_v25 = vsel %vm233_vm0, %v4390_v35, 0.0 }
0x1c0b   :  { %4397 = vadd.xlane.f32.xlu0 %v4396_v25  ;;  %7152 = vmatprep.subr.bf16.mxu0 %v7151_v30 }
0x1c0c   :  { %7154 = vmatpush3.bf16.msra.mxu0 %v7151_v30 }
0x1c0d   :  { %7156 = vmatprep.subr.bf16.mxu0 %v7155_v36 }
0x1c10   :  { %7158 = vmatpush3.bf16.msra.mxu0 %v7155_v36 }
0x1c13   :  { %6859 = vmatmul.mubr.msk.f32.vlgmr.msra.gmra.mrb[34].mxu0 %vm233_vm0, %v7578_v37 }
0x1c97   :  { %v4401_v20 = vpop.xlane.xlu1 %4400 }
0x1c98   :  { %v4403_v32 = vmul.f32 0.03125, %v4401_v20  ;;  %v4398_v21 = vpop.xlane.xlu0 %4397 }
0x1c99   :  { %v4402_v22 = vmul.f32 0.03125, %v4398_v21 }
0x1c9a   :  { %v4405_v23 = vsub.f32 %v4391_v19, %v4403_v32 }
0x1c9b   :  { %v4404_v24 = vsub.f32 %v4390_v35, %v4402_v22 }
0x1c9c   :  { %v4407_v29 = vmul.f32 %v4405_v23, %v4405_v23 }
0x1c9d   :  { %v4406_v26 = vmul.f32 %v4404_v24, %v4404_v24 }
0x1c9e   :  { %v4411_v40 = vsel %vm233_vm0, %v4407_v29, 0.0 }
0x1c9f   :  { %v4408_v28 = vsel %vm233_vm0, %v4406_v26, 0.0  ;;  %v8720_v26 = vld [vmem:[#allocation8] sm:$0xff] }
0x1ca0   :  { %4409 = vadd.xlane.f32.xlu0 %v4408_v28 }
0x1ca4   :  { %4412 = vadd.xlane.f32.xlu0 %v4411_v40 }
0x1ce6   :  { %v6860_v7 = vpop.f32.mrb[34].mxu0 }
0x1ce7   :  { %v4617_v5 = vadd.f32 %v6860_v7, %v6235_v60  ;;  %v4611_v61 = vpop.f32.mrb[35].mxu0 }
0x1ce8   :  { %v4612_v62 = vadd.f32 %v6235_v60, %v4611_v61 }
0x1cea   :  { %v7159_v63 = vpack.c.bf16 %v4617_v5, %v4612_v62  ;;  %v8676_v1 = vpack.i.bf16 %v4617_v5, %v4612_v62 }
0x1cec   :  { %7161 = vmatprep.subr.msk.bf16.mxu1 %vm8194_vm2, %v7159_v63  ;;  %7389 = vrot.lane.b32.xlu0 %v8676_v1, %s7851_s26 }
0x1d2d   :  { %v4410_v48 = vpop.xlane.xlu0 %4409 }
0x1d2e   :  { %v4414_v49 = vmul.f32 0.03125, %v4410_v48 }
0x1d30   :  { %v4416_v50 = vadd.f32 1e-05, %v4414_v49 }
0x1d31   :  { %v4413_v45 = vpop.xlane.xlu0 %4412 }
0x1d32   :  { %7531 = vrsqrt.f32 %v4416_v50  ;;  %v4415_v2 = vmul.f32 0.03125, %v4413_v45 }
0x1d34   :  { %v4417_v54 = vadd.f32 1e-05, %v4415_v2 }
0x1d36   :  { %7533 = vrsqrt.f32 %v4417_v54 }
0x1d3c   :  { %v7532_v51 = vpop.eup %7531 }
0x1d3d   :  { %v4420_v0 = vmul.f32 %v7532_v51, %v4404_v24 }
0x1d3f   :  { %v4428_v53 = vmul.f32 %v6224_v43, %v4420_v0 }
0x1d40   :  { %v7534_v33 = vpop.eup %7533 }
0x1d41   :  { %v4421_v55 = vmul.f32 %v7534_v33, %v4405_v23  ;;  %v8665_v56 = vadd.f32 %v6225_v52, %v4428_v53  ;;  %v8717_v23 = vld [vmem:[#allocation8 + $0x8] sm:$0xff] }
0x1d43   :  { %v4429_v58 = vmul.f32 %v6224_v43, %v4421_v55  ;;  %6847 = vmatprep.mubr.msk.f32.mxu1 %vm233_vm0, %v8665_v56 }
0x1d45   :  { %v8669_v59 = vadd.f32 %v6225_v52, %v4429_v58 }
0x1d47   :  { %6848 = vmatmul.mubr.msk.f32.vlgmr.msra.gmra.mrb[32].mxu1 %vm233_vm0, %v8669_v59 }
0x1d48   :  { %7164 = vmatpush3.bf16.xpose.msk.msra.mxu1 %vm8194_vm2, %v7159_v63 }
0x1d5e   :  { %v7390_v3 = vpop.permute.xlu0 %7389 }
0x1d5f   :  { %v7392_v57 = vunpack.i.h.bf16 %v7390_v3  ;;  %v7391_v4 = vunpack.i.l.bf16 %v7390_v3 }
0x1d61   :  { %v7169_v6 = vpack.c.bf16 %v7392_v57, %v7391_v4 }
0x1d63   :  { %7171 = vmatprep.subr.msk.bf16.mxu1 %vm8194_vm2, %v7169_v6 }
0x1e1a   :  { %v6849_v9 = vpop.f32.mrb[32].mxu1 }
0x1e1b   :  { %v8689_v11 = vadd.f32 %v6849_v9, %v6231_v8  ;;  %v4523_v14 = vpop.f32.mrb[33].mxu1 }
0x1e1c   :  { %v8691_v15 = vadd.f32 %v6231_v8, %v4523_v14 }
0x1e1d   :  { %4829 = vrot.lane.b32.xlu0 %v8689_v11, %s7851_s26 }
0x1e1e   :  { %4827 = vrot.lane.b32.xlu1 %v8691_v15, %s7851_s26  ;;  %6865 = vmatprep.mubr.msk.f32.mxu1 %vm326_vm1, %v8691_v15 }
0x1e1f   :  { %6866 = vmatmul.mubr.msk.f32.vlgmr.msra.gmra.mrb[34].mxu1 %vm326_vm1, %v8689_v11 }
0x1e20   :  { %7174 = vmatpush3.bf16.xpose.msk.msra.mxu1 %vm8194_vm2, %v7169_v6 }
0x1e21   :  { %7394 = vrot.lane.b32.xlu0 %v8676_v1, %s7854_s6 }
0x1e22   :  { %5193 = vrot.lane.b32.xlu1 %v8691_v15, %s7854_s6 }
0x1e25   :  { %5195 = vrot.lane.b32.xlu0 %v8689_v11, %s7854_s6 }
0x1e8f   :  { %v4830_v16 = vpop.permute.xlu0 %4829 }
0x1e90   :  { %v4828_v18 = vpop.permute.xlu1 %4827 }
0x1e91   :  { %6879 = vmatprep.mubr.msk.f32.mxu1 %vm326_vm1, %v4828_v18 }
0x1e92   :  { %6880 = vmatmul.mubr.msk.f32.vlgmr.msra.gmra.mrb[36].mxu1 %vm326_vm1, %v4830_v16 }
0x1e93   :  { %v7395_v10 = vpop.permute.xlu0 %7394 }
0x1e94   :  { %v7397_v12 = vunpack.i.h.bf16 %v7395_v10  ;;  %v7396_v19 = vunpack.i.l.bf16 %v7395_v10  ;;  %v5194_v35 = vpop.permute.xlu1 %5193 }
0x1e95   :  { %6903 = vmatprep.mubr.msk.f32.mxu1 %vm326_vm1, %v5194_v35 }
0x1e96   :  { %v7179_v27 = vpack.c.bf16 %v7397_v12, %v7396_v19 }
0x1e97   :  { %v5196_v25 = vpop.permute.xlu0 %5195 }
0x1e98   :  { %7181 = vmatprep.subr.msk.bf16.mxu1 %vm8194_vm2, %v7179_v27 }
0x1e99   :  { %7184 = vmatpush3.bf16.xpose.msk.msra.mxu1 %vm8194_vm2, %v7179_v27 }
0x1ea0   :  { %6904 = vmatmul.mubr.msk.f32.vlgmr.msra.gmra.mrb[38].mxu1 %vm326_vm1, %v5196_v25 }
0x1ef2   :  { %v6867_v20 = vpop.f32.mrb[34].mxu1 }
0x1ef3   :  { %v4715_v32 = vmul.f32 0.35355338, %v6867_v20  ;;  %v4705_v21 = vpop.f32.mrb[35].mxu1 }
0x1ef4   :  { %v4714_v22 = vmul.f32 0.35355338, %v4705_v21 }
0x1ef5   :  { %v4717_v24 = vadd.f32 %v8717_v23, %v4715_v32 }
0x1ef6   :  { %v4716_v28 = vadd.f32 %v8720_v26, %v4714_v22 }
0x1ef7   :  { %v4721_v29 = vsel %vm414_vm3, %v4717_v24, -inf }
0x1ef8   :  { %4722 = vmax.xlane.f32.xlu0 %v4721_v29  ;;  %v4718_v40 = vsel %vm414_vm3, %v4716_v28, -inf }
0x1ef9   :  { %4719 = vmax.xlane.f32.xlu1 %v4718_v40 }
0x1f65   :  { %v6881_v38 = vpop.f32.mrb[36].mxu1 }
0x1f66   :  { %v4919_v13 = vmul.f32 0.35355338, %v6881_v38  ;;  %v4909_v30 = vpop.f32.mrb[37].mxu1 }
0x1f67   :  { %v4918_v31 = vmul.f32 0.35355338, %v4909_v30 }
0x1f68   :  { %v4921_v34 = vadd.f32 %v8717_v23, %v4919_v13 }
0x1f69   :  { %v4920_v36 = vadd.f32 %v8720_v26, %v4918_v31 }
0x1f6a   :  { %v4925_v37 = vsel %vm414_vm3, %v4921_v34, -inf }
0x1f6b   :  { %4926 = vmax.xlane.f32.xlu1 %v4925_v37  ;;  %v4922_v39 = vsel %vm414_vm3, %v4920_v36, -inf }
0x1f6c   :  { %4923 = vmax.xlane.f32.xlu0 %v4922_v39 }
0x1f73   :  { %v6905_v41 = vpop.f32.mrb[38].mxu1 }
0x1f74   :  { %v5275_v42 = vpop.f32.mrb[39].mxu1  ;;  %v5285_v57 = vmul.f32 0.35355338, %v6905_v41 }
0x1f75   :  { %v5284_v3 = vmul.f32 0.35355338, %v5275_v42 }
0x1f76   :  { %v5287_v6 = vadd.f32 %v8717_v23, %v5285_v57 }
0x1f77   :  { %v5286_v4 = vadd.f32 %v8720_v26, %v5284_v3 }
0x1f78   :  { %v5291_v9 = vsel %vm414_vm3, %v5287_v6, -inf }
0x1f79   :  { %v5288_v8 = vsel %vm414_vm3, %v5286_v4, -inf }
0x1f85   :  { %v4723_v44 = vpop.xlane.xlu0 %4722 }
0x1f86   :  { %v4725_v46 = vsub.f32 %v4717_v24, %v4723_v44  ;;  %v4720_v47 = vpop.xlane.xlu1 %4719 }
0x1f87   :  { %v4724_v48 = vsub.f32 %v4716_v28, %v4720_v47 }
0x1f88   :  { %v4728_v49 = vmul.f32 1.442695, %v4725_v46 }
0x1f89   :  { %v4726_v50 = vmul.f32 1.442695, %v4724_v48  ;;  %v4622_v48 = vld [vmem:[#allocation11 + $0x28] sm:$0xff] }
0x1f8a   :  { %7535 = vpow2.f32 %v4728_v49  ;;  %v4621_v49 = vld [vmem:[#allocation11 + $0x20] sm:$0xff] }
0x1f8b   :  { %7537 = vpow2.f32 %v4726_v50 }
0x1f94   :  { %v8729_v45 = vpop.eup %7535 }
0x1f95   :  { %v7538_v2 = vpop.eup %7537  ;;  %v4733_v54 = vsel %vm414_vm3, %v8729_v45, 0.0 }
0x1f96   :  { %4734 = vadd.xlane.f32.xlu1 %v4733_v54  ;;  %v4730_v51 = vsel %vm414_vm3, %v7538_v2, 0.0 }
0x1f97   :  { %4731 = vadd.xlane.f32.xlu0 %v4730_v51 }
0x1ff8   :  { %v4927_v43 = vpop.xlane.xlu1 %4926 }
0x1ff9   :  { %v4929_v0 = vsub.f32 %v4921_v34, %v4927_v43  ;;  %v4924_v52 = vpop.xlane.xlu0 %4923 }
0x1ffa   :  { %v4928_v53 = vsub.f32 %v4920_v36, %v4924_v52 }
0x1ffb   :  { %v4932_v33 = vmul.f32 1.442695, %v4929_v0 }
0x1ffc   :  { %v4930_v55 = vmul.f32 1.442695, %v4928_v53 }
0x1ffd   :  { %7539 = vpow2.f32 %v4932_v33 }
0x1ffe   :  { %7541 = vpow2.f32 %v4930_v55 }
0x2007   :  { %v7540_v58 = vpop.eup %7539 }
0x2008   :  { %v7542_v60 = vpop.eup %7541  ;;  %v4937_v7 = vsel %vm414_vm3, %v7540_v58, 0.0 }
0x2009   :  { %4938 = vadd.xlane.f32.xlu1 %v4937_v7  ;;  %v4934_v5 = vsel %vm414_vm3, %v7542_v60, 0.0 }
0x200a   :  { %4935 = vadd.xlane.f32.xlu0 %v4934_v5 }
0x201a   :  { %7404 = vrot.lane.b32.xlu1 %v8676_v1, %s7853_s8 }
0x201e   :  { %7409 = vrot.lane.b32.xlu1 %v8676_v1, %s8921_s25 }
0x2020   :  { %7399 = vrot.lane.b32.xlu0 %v8676_v1, %s7852_s3 }
0x2022   :  { %5482 = vrot.lane.b32.xlu1 %v8689_v11, %s8921_s25 }
0x2023   :  { %v4735_v11 = vpop.xlane.xlu1 %4734 }
0x2024   :  { %5480 = vrot.lane.b32.xlu0 %v8691_v15, %s8921_s25  ;;  %v4732_v61 = vpop.xlane.xlu0 %4731 }
0x2025   :  { %7543 = vrcp.f32 %v4732_v61 }
0x2026   :  { %7545 = vrcp.f32 %v4735_v11 }
0x202f   :  { %v7544_v62 = vpop.eup %7543 }
0x2030   :  { %v4738_v63 = vmul.f32 %v7544_v62, %v7538_v2  ;;  %v7546_v20 = vpop.eup %7545 }
0x2031   :  { %v4739_v40 = vmul.f32 %v7546_v20, %v8729_v45 }
0x2032   :  { %6872 = vmatprep.mubr.msk.f32.mxu0 %vm414_vm3, %v4738_v63 }
0x2043   :  { %5289 = vmax.xlane.f32.xlu0 %v5288_v8  ;;  %v4623_v8 = vld [vmem:[#allocation11 + $0x30] sm:$0xff] }
0x2046   :  { %5292 = vmax.xlane.f32.xlu1 %v5291_v9 }
0x2057   :  { %7414 = vrot.lane.b32.xlu1 %v8676_v1, %s7855_s19 }
0x2096   :  { %v4939_v14 = vpop.xlane.xlu1 %4938 }
0x2097   :  { %v4936_v15 = vpop.xlane.xlu0 %4935 }
0x2098   :  { %7547 = vrcp.f32 %v4936_v15 }
0x2099   :  { %7549 = vrcp.f32 %v4939_v14 }
0x209a   :  { %v7405_v16 = vpop.permute.xlu1 %7404 }
0x209b   :  { %v7400_v18 = vpop.permute.xlu0 %7399  ;;  %v7407_v10 = vunpack.i.h.bf16 %v7405_v16  ;;  %v7406_v12 = vunpack.i.l.bf16 %v7405_v16 }
0x209c   :  { %v7402_v19 = vunpack.i.h.bf16 %v7400_v18  ;;  %v7401_v35 = vunpack.i.l.bf16 %v7400_v18 }
0x209d   :  { %v7175_v24 = vpack.c.bf16 %v7407_v10, %v7406_v12 }
0x209e   :  { %v7165_v27 = vpack.c.bf16 %v7402_v19, %v7401_v35  ;;  %v7410_v25 = vpop.permute.xlu1 %7409 }
0x209f   :  { %v7412_v32 = vunpack.i.h.bf16 %v7410_v25  ;;  %v7411_v21 = vunpack.i.l.bf16 %v7410_v25  ;;  %v5481_v22 = vpop.permute.xlu0 %5480 }
0x20a0   :  { %7166 = vmatprep.subr.bf16.mxu0 %v7165_v27  ;;  %6922 = vmatprep.mubr.msk.f32.mxu1 %vm326_vm1, %v5481_v22 }
0x20a1   :  { %v7189_v28 = vpack.c.bf16 %v7412_v32, %v7411_v21  ;;  %7168 = vmatpush3.bf16.msra.mxu0 %v7165_v27 }
0x20a2   :  { %v7548_v29 = vpop.eup %7547  ;;  %7176 = vmatprep.subr.bf16.mxu0 %v7175_v24  ;;  %v5483_v31 = vpop.permute.xlu1 %5482 }
0x20a3   :  { %v7550_v38 = vpop.eup %7549  ;;  %7191 = vmatprep.subr.msk.bf16.mxu1 %vm8194_vm2, %v7189_v28  ;;  %v4942_v13 = vmul.f32 %v7548_v29, %v7542_v60 }
0x20a4   :  { %6873 = vmatmul.mubr.msk.f32.vlgmr.msra.gmra.mrb[36].mxu0 %vm414_vm3, %v4739_v40  ;;  %7194 = vmatpush3.bf16.xpose.msk.msra.mxu1 %vm8194_vm2, %v7189_v28  ;;  %v4943_v30 = vmul.f32 %v7550_v38, %v7540_v58 }
0x20a5   :  { %7178 = vmatpush3.bf16.msra.mxu0 %v7175_v24  ;;  %6886 = vmatprep.mubr.msk.f32.mxu0 %vm414_vm3, %v4942_v13  ;;  %v4624_v24 = vld [vmem:[#allocation11 + $0x38] sm:$0xff] }
0x20a6   :  { %6889 = vmatprep.subr.mxu0 %v4622_v48 }
0x20a8   :  { %6887 = vmatmul.mubr.msk.f32.vlgmr.msra.gmra.mrb[38].mxu0 %vm414_vm3, %v4943_v30  ;;  %v6271_v30 = vld [vmem:[%s8865_s13 + $0x1] ss:$0 sm:$0xff] }
0x20a9   :  { %6890 = vmatpush3.msra.mxu0 %v4622_v48 }
0x20aa   :  { %6894 = vmatprep.subr.mxu0 %v4621_v49 }
0x20ab   :  { %6923 = vmatmul.mubr.msk.f32.vlgmr.msra.gmra.mrb[40].mxu1 %vm326_vm1, %v5483_v31 }
0x20d0   :  { %v5290_v34 = vpop.xlane.xlu0 %5289 }
0x20d1   :  { %v5294_v36 = vsub.f32 %v5286_v4, %v5290_v34 }
0x20d3   :  { %v5296_v37 = vmul.f32 1.442695, %v5294_v36  ;;  %v5293_v39 = vpop.xlane.xlu1 %5292 }
0x20d4   :  { %v5295_v41 = vsub.f32 %v5287_v6, %v5293_v39 }
0x20d5   :  { %7551 = vpow2.f32 %v5296_v37 }
0x20d6   :  { %v5298_v42 = vmul.f32 1.442695, %v5295_v41 }
0x20d7   :  { %v7415_v45 = vpop.permute.xlu1 %7414 }
0x20d8   :  { %7553 = vpow2.f32 %v5298_v42  ;;  %v7417_v43 = vunpack.i.h.bf16 %v7415_v45  ;;  %v7416_v0 = vunpack.i.l.bf16 %v7415_v45 }
0x20da   :  { %v7185_v33 = vpack.c.bf16 %v7417_v43, %v7416_v0  ;;  %v5826_v0 = vld [vmem:[#allocation16 + $0x30] sm:$0xff] }
0x20df   :  { %v7552_v44 = vpop.eup %7551 }
0x20e0   :  { %v5300_v17 = vsel %vm414_vm3, %v7552_v44, 0.0 }
0x20e1   :  { %5301 = vadd.xlane.f32.xlu0 %v5300_v17 }
0x20e2   :  { %v7554_v46 = vpop.eup %7553 }
0x20e3   :  { %v5303_v47 = vsel %vm414_vm3, %v7554_v46, 0.0 }
0x20e5   :  { %5304 = vadd.xlane.f32.xlu0 %v5303_v47 }
0x216e   :  { %v5302_v50 = vpop.xlane.xlu0 %5301 }
0x216f   :  { %7555 = vrcp.f32 %v5302_v50 }
0x2172   :  { %v5305_v54 = vpop.xlane.xlu0 %5304 }
0x2173   :  { %7557 = vrcp.f32 %v5305_v54 }
0x2177   :  { %v6874_v2 = vpop.f32.mrb[36].mxu0 }
0x2178   :  { %v4818_v51 = vpop.f32.mrb[37].mxu0 }
0x2179   :  { %v7556_v5 = vpop.eup %7555 }
0x217a   :  { %v5308_v57 = vmul.f32 %v7556_v5, %v7552_v44 }
0x217b   :  { %v6888_v52 = vpop.f32.mrb[38].mxu0 }
0x217c   :  { %v5022_v53 = vpop.f32.mrb[39].mxu0 }
0x217d   :  { %6891 = vmatprep.mubr.msk.f32.mxu0 %vm326_vm1, %v5022_v53  ;;  %v7558_v3 = vpop.eup %7557 }
0x217e   :  { %6892 = vmatmul.mubr.msk.f32.vlgmr.msra.gmra.mrb[40].mxu0 %vm326_vm1, %v6888_v52  ;;  %v6924_v55 = vpop.f32.mrb[40].mxu1  ;;  %v5309_v4 = vmul.f32 %v7558_v3, %v7554_v46  ;;  %v5827_v52 = vld [vmem:[#allocation16 + $0x38] sm:$0xff] }
0x217f   :  { %6895 = vmatpush3.msra.mxu0 %v4621_v49  ;;  %6896 = vmatprep.mubr.msk.f32.mxu0 %vm326_vm1, %v4818_v51  ;;  %v5562_v58 = vpop.f32.mrb[41].mxu1  ;;  %v5572_v60 = vmul.f32 0.35355338, %v6924_v55  ;;  %v5825_v51 = vld [vmem:[#allocation16 + $0x28] sm:$0xff]  ;;  %v7203_v53 = vpack.c.bf16 %v5827_v52, %v5826_v0  ;;  %v6291_v0 = vld [vmem:[#allocation13 + $0x1] ss:$0 sm:$0xff] }
0x2180   :  { %7186 = vmatprep.subr.bf16.mxu0 %v7185_v33  ;;  %v5571_v7 = vmul.f32 0.35355338, %v5562_v58  ;;  %v6280_v55 = vld [vmem:[%s8874_s22 + $0x48] sm:$0xff]  ;;  %v6281_v58 = vld [vmem:[%s8874_s22 + $0x50] sm:$0xff] }
0x2181   :  { %v5574_v62 = vadd.f32 %v8717_v23, %v5572_v60 }
0x2182   :  { %v5573_v61 = vadd.f32 %v8720_v26, %v5571_v7  ;;  %v6282_v7 = vld [vmem:[%s8874_s22 + $0x58] sm:$0xff] }
0x2183   :  { %v5578_v6 = vsel %vm414_vm3, %v5574_v62, -inf  ;;  %v7211_v5 = vpack.c.bf16 %v6282_v7, %v6281_v58 }
0x2184   :  { %v5575_v63 = vsel %vm414_vm3, %v5573_v61, -inf }
0x2185   :  { %5576 = vmax.xlane.f32.xlu0 %v5575_v63 }
0x2186   :  { %6897 = vmatmul.mubr.msk.f32.vlgmr.msra.gmra.mrb[40].mxu0 %vm326_vm1, %v6874_v2 }
0x2187   :  { %7188 = vmatpush3.bf16.msra.mxu0 %v7185_v33  ;;  %6910 = vmatprep.mubr.msk.f32.mxu0 %vm414_vm3, %v5308_v57  ;;  %v6279_v33 = vld [vmem:[%s8874_s22 + $0x40] sm:$0xff] }
0x2188   :  { %6913 = vmatprep.subr.mxu0 %v4623_v8  ;;  %v7207_v60 = vpack.c.bf16 %v6280_v55, %v6279_v33 }
0x2189   :  { %5579 = vmax.xlane.f32.xlu0 %v5578_v6 }
0x218a   :  { %6911 = vmatmul.mubr.msk.f32.vlgmr.msra.gmra.mrb[42].mxu0 %vm414_vm3, %v5309_v4 }
0x218b   :  { %6914 = vmatpush3.msra.mxu0 %v4623_v8 }
0x2212   :  { %v5577_v23 = vpop.xlane.xlu0 %5576 }
0x2213   :  { %v5581_v26 = vsub.f32 %v5573_v61, %v5577_v23  ;;  %v6283_v61 = vld [vmem:[%s8874_s22 + $0x60] sm:$0xff] }
0x2215   :  { %v5583_v14 = vmul.f32 1.442695, %v5581_v26 }
0x2216   :  { %v5580_v9 = vpop.xlane.xlu0 %5579 }
0x2217   :  { %v5582_v11 = vsub.f32 %v5574_v62, %v5580_v9  ;;  %v6284_v62 = vld [vmem:[%s8874_s22 + $0x68] sm:$0xff]  ;;  %v6274_v9 = vld [vmem:[%s8868_s16 + $0x1] ss:$0 sm:$0xff] }
0x2218   :  { %v7215_v63 = vpack.c.bf16 %v6284_v62, %v6283_v61 }
0x2219   :  { %v5585_v15 = vmul.f32 1.442695, %v5582_v11 }
0x221b   :  { %7559 = vpow2.f32 %v5585_v15 }
0x221c   :  { %7561 = vpow2.f32 %v5583_v14  ;;  %v6275_v14 = vld [vmem:[%s8869_s17 + $0x1] ss:$0 sm:$0xff] }
0x2225   :  { %v7560_v16 = vpop.eup %7559 }
0x2226   :  { %v5590_v18 = vsel %vm414_vm3, %v7560_v16, 0.0  ;;  %v7562_v10 = vpop.eup %7561 }
0x2227   :  { %5591 = vadd.xlane.f32.xlu0 %v5590_v18  ;;  %v5587_v12 = vsel %vm414_vm3, %v7562_v10, 0.0 }
0x222b   :  { %5588 = vadd.xlane.f32.xlu0 %v5587_v12 }
0x2241   :  { %7419 = vrot.lane.b32.xlu0 %v8676_v1, %s7857_s20 }
0x225d   :  { %v6912_v19 = vpop.f32.mrb[42].mxu0 }
0x225e   :  { %v5388_v35 = vpop.f32.mrb[43].mxu0 }
0x225f   :  { %6915 = vmatprep.mubr.msk.f32.mxu0 %vm326_vm1, %v5388_v35  ;;  %v6285_v35 = vld [vmem:[%s8874_s22 + $0x70] sm:$0xff] }
0x2260   :  { %6916 = vmatmul.mubr.msk.f32.vlgmr.msra.gmra.mrb[40].mxu0 %vm326_vm1, %v6912_v19 }
0x22b4   :  { %v5592_v27 = vpop.xlane.xlu0 %5591 }
0x22b5   :  { %7563 = vrcp.f32 %v5592_v27  ;;  %v6286_v27 = vld [vmem:[%s8874_s22 + $0x78] sm:$0xff]  ;;  %s7862_s22 = smov [#allocation19]  }
0x22b8   :  { %v5589_v25 = vpop.xlane.xlu0 %5588 }
0x22b9   :  { %7565 = vrcp.f32 %v5589_v25  ;;  %v7219_v25 = vpack.c.bf16 %v6286_v27, %v6285_v35 }
0x22bc   :  { %v7420_v20 = vpop.permute.xlu0 %7419 }
0x22bd   :  { %v7422_v32 = vunpack.i.h.bf16 %v7420_v20  ;;  %v7421_v21 = vunpack.i.l.bf16 %v7420_v20  ;;  %v6276_v20 = vld [vmem:[#allocation17 + $0x1] ss:$0 sm:$0xff] }
0x22bf   :  { %v7195_v22 = vpack.c.bf16 %v7422_v32, %v7421_v21  ;;  %v7564_v28 = vpop.eup %7563 }
0x22c0   :  { %v5596_v40 = vmul.f32 %v7564_v28, %v7560_v16 }
0x22c1   :  { %7196 = vmatprep.subr.bf16.mxu0 %v7195_v22 }
0x22c2   :  { %7198 = vmatpush3.bf16.msra.mxu0 %v7195_v22 }
0x22c3   :  { %v7566_v29 = vpop.eup %7565  ;;  %6932 = vmatprep.subr.mxu0 %v4624_v24 }
0x22c4   :  { %v5595_v1 = vmul.f32 %v7566_v29, %v7562_v10 }
0x22c6   :  { %6929 = vmatprep.mubr.msk.f32.mxu0 %vm414_vm3, %v5595_v1  ;;  %v6288_v1 = vld [vmem:[%s8875_s23 + $0x1] ss:$0 sm:$0xff]  ;;  %s6072_s23 = sshll.u32 %s7862_s22, 4  ;;  %s6073_s23 = int_to_ptr.vmem [resolvable:$true] %s6072_s23 }
0x22c7   :  { %6930 = vmatmul.mubr.msk.f32.vlgmr.msra.gmra.mrb[44].mxu0 %vm414_vm3, %v5596_v40  ;;  %s7801_s0 = scalar_lea.vmem %s6073_s23, 256  ;;  %p7806_p11 = scmp.lt.s32.totalorder %s6073_s23, %s6073_s23 }
0x22c8   :  { %6933 = vmatpush3.msra.mxu0 %v4624_v24  ;;  %p7802_p10 = scmp.ne.s32.totalorder %s6073_s23, %s7801_s0  ;;  %p7807_p12 = scmp.lt.s32.totalorder %s7801_s0, %s7801_s0 }
0x22c9   :  { %7208 = vmatprep.subr.bf16.mxu0 %v7207_v60 }
0x22ca   :  { %p7808_p13 = por %p7807_p12, %p7806_p11 }
0x22cc   :  { %p7809_p0 = pnand %p7808_p13, %p7802_p10 }
0x239a   :  { %v6931_v38 = vpop.f32.mrb[44].mxu0 }
0x239b   :  { %v5675_v13 = vpop.f32.mrb[45].mxu0 }
0x239c   :  { %6934 = vmatprep.mubr.msk.f32.mxu0 %vm326_vm1, %v5675_v13 }
0x239d   :  { %6935 = vmatmul.mubr.msk.f32.vlgmr.msra.gmra.mrb[40].mxu0 %vm326_vm1, %v6931_v38 }
0x239e   :  { %7210 = vmatpush3.bf16.msra.mxu0 %v7207_v60 }
0x239f   :  { %7212 = vmatprep.subr.bf16.mxu0 %v7211_v5 }
0x23a2   :  { %7214 = vmatpush3.bf16.msra.mxu0 %v7211_v5 }
0x23a3   :  { %7216 = vmatprep.subr.bf16.mxu0 %v7215_v63 }
0x23a6   :  { %7218 = vmatpush3.bf16.msra.mxu0 %v7215_v63 }
0x23a7   :  { %7220 = vmatprep.subr.bf16.mxu0 %v7219_v25 }
0x23aa   :  { %7222 = vmatpush3.bf16.msra.mxu0 %v7219_v25 }
0x2470   :  { %v6936_v31 = vpop.f32.mrb[40].mxu0 }
0x2471   :  { %v5774_v34 = vadd.f32 %v6936_v31, %v6271_v30  ;;  %v5756_v36 = vpop.f32.mrb[41].mxu0 }
0x2472   :  { %v5773_v37 = vadd.f32 %v6271_v30, %v5756_v36 }
0x2473   :  { %v5776_v39 = vadd.f32 %v5774_v34, %v8669_v59 }
0x2474   :  { %v5775_v41 = vadd.f32 %v5773_v37, %v8665_v56  ;;  %v5824_v56 = vld [vmem:[#allocation16 + $0x20] sm:$0xff] }
0x2475   :  { %v5784_v42 = vsel %vm233_vm0, %v5776_v39, 0.0  ;;  %v7199_v43 = vpack.c.bf16 %v5825_v51, %v5824_v56 }
0x2476   :  { %5785 = vadd.xlane.f32.xlu0 %v5784_v42  ;;  %v5781_v44 = vsel %vm233_vm0, %v5775_v41, 0.0 }
0x2477   :  { %5782 = vadd.xlane.f32.xlu1 %v5781_v44  ;;  %7200 = vmatprep.subr.bf16.mxu1 %v7199_v43 }
0x2478   :  { %7202 = vmatpush3.bf16.msra.mxu1 %v7199_v43 }
0x2479   :  { %7204 = vmatprep.subr.bf16.mxu1 %v7203_v53 }
0x247c   :  { %7206 = vmatpush3.bf16.msra.mxu1 %v7203_v53  ;;  %v6292_v53 = vld [vmem:[#allocation14 + $0x1] ss:$0 sm:$0xff] }
0x2503   :  { %v5786_v17 = vpop.xlane.xlu0 %5785 }
0x2504   :  { %v5788_v46 = vmul.f32 0.03125, %v5786_v17  ;;  %v5783_v47 = vpop.xlane.xlu1 %5782 }
0x2505   :  { %v5787_v48 = vmul.f32 0.03125, %v5783_v47 }
0x2506   :  { %v5790_v49 = vsub.f32 %v5776_v39, %v5788_v46 }
0x2507   :  { %v5789_v50 = vsub.f32 %v5775_v41, %v5787_v48 }
0x2508   :  { %v5792_v54 = vmul.f32 %v5790_v49, %v5790_v49 }
0x2509   :  { %v5791_v45 = vmul.f32 %v5789_v50, %v5789_v50 }
0x250a   :  { %v5796_v59 = vsel %vm233_vm0, %v5792_v54, 0.0 }
0x250b   :  { %v5793_v2 = vsel %vm233_vm0, %v5791_v45, 0.0 }
0x250c   :  { %5794 = vadd.xlane.f32.xlu1 %v5793_v2 }
0x2510   :  { %5797 = vadd.xlane.f32.xlu1 %v5796_v59 }
0x2599   :  { %v5795_v3 = vpop.xlane.xlu1 %5794 }
0x259a   :  { %v5799_v57 = vmul.f32 0.03125, %v5795_v3 }
0x259c   :  { %v5801_v4 = vadd.f32 1e-05, %v5799_v57 }
0x259d   :  { %v5798_v6 = vpop.xlane.xlu1 %5797 }
0x259e   :  { %7567 = vrsqrt.f32 %v5801_v4  ;;  %v5800_v8 = vmul.f32 0.03125, %v5798_v6 }
0x25a0   :  { %v5802_v23 = vadd.f32 1e-05, %v5800_v8 }
0x25a2   :  { %7569 = vrsqrt.f32 %v5802_v23 }
0x25a8   :  { %v7568_v26 = vpop.eup %7567 }
0x25a9   :  { %v5805_v11 = vmul.f32 %v7568_v26, %v5789_v50 }
0x25ab   :  { %v5813_v15 = vmul.f32 %v6274_v9, %v5805_v11 }
0x25ac   :  { %v7570_v16 = vpop.eup %7569 }
0x25ad   :  { %v5806_v18 = vmul.f32 %v7570_v16, %v5790_v49  ;;  %v5821_v10 = vadd.f32 %v6275_v14, %v5813_v15 }
0x25af   :  { %v5814_v12 = vmul.f32 %v6274_v9, %v5806_v18  ;;  %6945 = vmatprep.mubr.msk.f32.mxu1 %vm233_vm0, %v5821_v10 }
0x25b1   :  { %v5822_v19 = vadd.f32 %v6275_v14, %v5814_v12 }
0x25b3   :  { %6946 = vmatmul.mubr.msk.f32.vlgmr.msra.gmra.mrb[42].mxu1 %vm233_vm0, %v5822_v19 }
0x2686   :  { %v6947_v32 = vpop.f32.mrb[42].mxu1 }
0x2687   :  { %v5914_v21 = vadd.f32 %v6947_v32, %v6276_v20  ;;  %v5908_v22 = vpop.f32.mrb[43].mxu1 }
0x2688   :  { %v5909_v24 = vadd.f32 %v6276_v20, %v5908_v22 }
0x2689   :  { %v5918_v29 = vmax.f32 %v5914_v21, 0.0 }
0x268a   :  { %v5917_v28 = vmax.f32 %v5909_v24, 0.0 }
0x268c   :  { %6964 = vmatprep.mubr.msk.f32.mxu0 %vm3011_vm4, %v5917_v28 }
0x268d   :  { %6965 = vmatmul.mubr.msk.f32.vlgmr.msra.gmra.mrb[46].mxu0 %vm3011_vm4, %v5918_v29 }
0x2760   :  { %v6966_v40 = vpop.f32.mrb[46].mxu0 }
0x2761   :  { %v6008_v38 = vpop.f32.mrb[47].mxu0  ;;  %v6014_v13 = vadd.f32 %v6966_v40, %v6288_v1 }
0x2762   :  { %v6009_v30 = vadd.f32 %v6288_v1, %v6008_v38 }
0x2763   :  { %v6018_v34 = vadd.f32 %v6014_v13, %v5822_v19 }
0x2764   :  { %v6017_v31 = vadd.f32 %v6009_v30, %v5821_v10 }
0x2765   :  { %v6026_v37 = vsel %vm233_vm0, %v6018_v34, 0.0 }
0x2766   :  { %v6023_v36 = vsel %vm233_vm0, %v6017_v31, 0.0 }
0x2767   :  { %6024 = vadd.xlane.f32.xlu1 %v6023_v36 }
0x276b   :  { %6027 = vadd.xlane.f32.xlu1 %v6026_v37 }
0x27f4   :  { %v6025_v39 = vpop.xlane.xlu1 %6024 }
0x27f5   :  { %v6029_v41 = vmul.f32 0.03125, %v6025_v39 }
0x27f7   :  { %v6031_v42 = vsub.f32 %v6017_v31, %v6029_v41 }
0x27f8   :  { %v6028_v44 = vpop.xlane.xlu1 %6027 }
0x27f9   :  { %v6030_v17 = vmul.f32 0.03125, %v6028_v44  ;;  %v6033_v46 = vmul.f32 %v6031_v42, %v6031_v42 }
0x27fb   :  { %v6032_v47 = vsub.f32 %v6018_v34, %v6030_v17  ;;  %v6035_v48 = vsel %vm233_vm0, %v6033_v46, 0.0 }
0x27fc   :  { %6036 = vadd.xlane.f32.xlu1 %v6035_v48 }
0x27fd   :  { %v6034_v49 = vmul.f32 %v6032_v47, %v6032_v47 }
0x27ff   :  { %v6038_v50 = vsel %vm233_vm0, %v6034_v49, 0.0 }
0x2800   :  { %6039 = vadd.xlane.f32.xlu0 %v6038_v50 }
0x2889   :  { %v6037_v45 = vpop.xlane.xlu1 %6036 }
0x288a   :  { %v6041_v2 = vmul.f32 0.03125, %v6037_v45 }
0x288c   :  { %v6043_v54 = vadd.f32 1e-05, %v6041_v2 }
0x288d   :  { %v6040_v59 = vpop.xlane.xlu0 %6039 }
0x288e   :  { %7571 = vrsqrt.f32 %v6043_v54  ;;  %v6042_v56 = vmul.f32 0.03125, %v6040_v59 }
0x2890   :  { %v6044_v51 = vadd.f32 1e-05, %v6042_v56 }
0x2892   :  { %7573 = vrsqrt.f32 %v6044_v51 }
0x2898   :  { %v7572_v43 = vpop.eup %7571 }
0x2899   :  { %v6047_v52 = vmul.f32 %v7572_v43, %v6031_v42 }
0x289b   :  { %v6055_v33 = vmul.f32 %v6291_v0, %v6047_v52 }
0x289c   :  { %v7574_v55 = vpop.eup %7573 }
0x289d   :  { %v6048_v58 = vmul.f32 %v7574_v55, %v6032_v47  ;;  %v6063_v60 = vadd.f32 %v6292_v53, %v6055_v33 }
0x289f   :  { %v6056_v7 = vmul.f32 %v6291_v0, %v6048_v58  ;;  %6065 = vst.msk [vmem:[#allocation19] sm:$0xff] %vm233_vm0, %v6063_v60 }
0x28a1   :  { %v6064_v5 = vadd.f32 %v6292_v53, %v6056_v7 }
0x28a3   :  { %6066 = vst.msk [vmem:[#allocation19 + $0x8] sm:$0xff] %vm233_vm0, %v6064_v5 }
0x28a4   :  { %7812 = shalt.err (!%p7809_p0)
}
0x28a5   :  { %s8925_s11 = sld [smem:[#allocation36_spill]] }
0x28ab   :  { %s7813_s15 = scalar_lea.hbm %s8925_s11, 256 }
0x28ac   :  { %p7814_p1 = scmp.ne.s32.totalorder %s8925_s11, %s7813_s15  ;;  %p7817_p2 = scmp.lt.u32.totalorder %s7813_s15, %s8925_s11 }
0x28ae   :  { %p7819_p3 = pnand %p7817_p2, %p7814_p1 }
0x28b0   :  { %7822 = shalt.err (!%p7819_p3)
}
0x28b1   :  { %s8926_s8 = smov 8   ;;  %s8927_s6 = smov 128  }
0x28b2   :  { %6078 = dma.vmem_to_hbm [thread:$0]  %s6073_s23, 256, %s8925_s11, [#allocation4], %s8927_s6, %s8927_s6, %s8926_s8  }
0x28b3   :  { %7835 = dma.done.wait [#allocation4], 256  }
0x28b4   :  { %7836 = vsyncadd [#allocation4], 4294967040 }
0x28b5   :  { %6082 = vsyncpa [#allocation3], 1 }
0x28b6   :  { %6083 = vsyncpa [#allocation6], 1 }
0x28b7   :  { %6084 = vsyncpa [#allocation9], 1 }
0x28b8   :  { %6085 = vsyncpa [#allocation12], 1 }
0x28b9   :  { %6086 = vsyncpa [#allocation15], 1 }
0x28ba   :  { %6087 = vsyncpa [#allocation18], 1 }
0x28bb   :  { %6088 = vsyncpa [#allocation4], 1 }

</bundles_post_ra>
